<compile_context>
chip_gen: v5e
topology: v5e:2x2
jax: 0.10.0
libtpu: 0.0.40
codegen_flags: <defaults>
</compile_context>

<pallas_src>
import functools

import jax
import jax.numpy as jnp
from jax.experimental import pallas as pl
from jax.experimental.pallas import tpu as pltpu

KW = 4        # conv kernel size (module hard-codes kw=4)
PADW = 2      # padding = ceil((kw-1)/2) = 2
_EPS = 1e-5
_LANE = 128


def _round_up(x, m):
    return ((x + m - 1) // m) * m


def _out_hw(h, w, stride):
    ho = (h + 2 * PADW - KW) // stride + 1
    wo = (w + 2 * PADW - KW) // stride + 1
    return ho, wo


def _vmem_budget_bytes():
    """Per-generation VMEM budget: ~48 MiB on v7x (64 MiB physical per TC),
    ~96 MiB on v5e/v6e (128 MiB physical). Leaves headroom for compiler scratch."""
    cap = 128 * 1024 * 1024
    try:
        cap = int(pltpu.get_tpu_info().vmem_capacity_bytes)
    except Exception:
        pass
    return max(32 * 1024 * 1024, min((cap * 3) // 4, 110 * 1024 * 1024))


def _choose_tiles(k, cout, hw, budget, force_hw_tile=None):
    """Pick (tc, hw_tile, hw_pad, single_tile) so double-buffered x/w/out fit `budget`."""
    tc = min(cout, 128)
    while cout % tc:
        tc //= 2
    tc = max(tc, 1)
    w_bytes = 2 * tc * k * 2                       # double-buffered bf16 weight tile
    fixed = w_bytes + (2 << 20)                    # + slack (bias, stats, scratch)
    per_lane = 2 * k * 2 + 2 * tc * 4 + tc * 4     # dbl-buf bf16 taps + dbl-buf f32 out + acc
    max_lanes = max(_LANE, (budget - fixed) // per_lane)
    hw128 = _round_up(hw, _LANE)
    if force_hw_tile is not None:
        hw_tile = force_hw_tile
    elif hw128 <= max_lanes:
        hw_tile = hw128                            # whole spatial map in one lane-dense tile
    else:
        hw_tile = max(_LANE, min(2048, (max_lanes // _LANE) * _LANE))
    hw_pad = _round_up(hw, hw_tile)
    return tc, hw_tile, hw_pad, hw_pad == hw_tile


# ----------------------------------------------------------------------------------
# Wrapper-side layout plumbing: im2col.  The 16 (ky,kx) tap windows of the 4x4 conv
# (padding 2, stride s) are stacked along the contraction axis as a dense
# (N, 16*Cin, HW_pad) bf16 slab, zero-padded on the lane axis to HW_pad.
# ----------------------------------------------------------------------------------
def _extract_taps(x_nchw, stride, ho, wo, hw_pad):
    n, c, _, _ = x_nchw.shape
    hw = ho * wo
    xp = jnp.pad(x_nchw.astype(jnp.bfloat16),
                 ((0, 0), (0, 0), (PADW, PADW), (PADW, PADW)))
    taps = []
    for ky in range(KW):
        for kx in range(KW):
            win = jax.lax.slice(
                xp,
                (0, 0, ky, kx),
                (n, c, ky + stride * (ho - 1) + 1, kx + stride * (wo - 1) + 1),
                (1, 1, stride, stride))
            taps.append(win.reshape(n, c, hw))
    t = jnp.concatenate(taps, axis=1)              # (N, 16*Cin, HW), K-order = (ky,kx,cin)
    if hw_pad > hw:
        t = jnp.pad(t, ((0, 0), (0, 0), (0, hw_pad - hw)))
    return t


# ----------------------------------------------------------------------------------
# Kernels
# ----------------------------------------------------------------------------------
def _conv_kernel(*refs, has_bias, fuse_norm, emit_stats, do_act, inv_hw):
    # refs: x (1,K,HWT) bf16 | w (TC,K) bf16 | [bias (TC,1) f32] |
    #       out (1,TC,HWT) f32 | [psum (1,1,TC,1) f32, psq (1,1,TC,1) f32]
    i = 0
    x_ref = refs[i]; i += 1
    w_ref = refs[i]; i += 1
    if has_bias:
        b_ref = refs[i]; i += 1
    o_ref = refs[i]; i += 1
    if emit_stats:
        sum_ref = refs[i]; i += 1
        sq_ref = refs[i]; i += 1

    # Single im2col matmul: (TC, K) @ (K, HWT) with f32 accumulation on the MXU.
    acc = jnp.dot(w_ref[...], x_ref[0], preferred_element_type=jnp.float32)

    if has_bias:
        acc = acc + b_ref[...]                      # (TC,1) broadcast over lanes

    if fuse_norm:
        # Padded lanes are exactly zero (zero taps, no bias on norm layers), so the
        # sums over the full tile divided by the true pixel count are exact.
        s = jnp.sum(acc, axis=-1, keepdims=True)
        sq = jnp.sum(acc * acc, axis=-1, keepdims=True)
        mean = s * inv_hw
        var = sq * inv_hw - mean * mean             # biased var (InstanceNorm2d)
        acc = (acc - mean) * jax.lax.rsqrt(var + _EPS)

    if emit_stats:
        sum_ref[...] = jnp.sum(acc, axis=-1, keepdims=True)[None, None]
        sq_ref[...] = jnp.sum(acc * acc, axis=-1, keepdims=True)[None, None]

    if do_act:
        acc = jnp.maximum(acc, 0.2 * acc)           # LeakyReLU(0.2)

    o_ref[...] = acc[None]


def _norm_act_kernel(y_ref, sc_ref, sh_ref, o_ref, *, do_act):
    # y (1,TC,HWT) f32 | scale (1,TC,1) f32 | shift (1,TC,1) f32 | out (1,TC,HWT) f32
    y = y_ref[0] * sc_ref[0] + sh_ref[0]
    if do_act:
        y = jnp.maximum(y, 0.2 * y)
    o_ref[...] = y[None]


def _head_kernel(x_ref, w_ref, b_ref, o_ref):
    # Cout == 1 head: VPU broadcast-multiply + sublane reduction (no M=1 MXU matmul).
    # x (1,K,HWT) bf16 | w (K,1) f32 | b (1,1) f32 | out (1,1,HWT) f32
    x = x_ref[0].astype(jnp.float32)
    acc = jnp.sum(x * w_ref[...], axis=0, keepdims=True)
    o_ref[...] = (acc + b_ref[...])[None]


# ----------------------------------------------------------------------------------
# Layer wrappers
# ----------------------------------------------------------------------------------
def conv4x4_layer(x_nchw, w, b, *, stride, do_norm, do_act, force_hw_tile=None):
    """One discriminator layer (Cout > 1): conv4x4 [+bias] [+InstanceNorm] [+LeakyReLU]."""
    n, cin, h, wd = x_nchw.shape
    cout = w.shape[0]
    ho, wo = _out_hw(h, wd, stride)
    hw = ho * wo
    k = KW * KW * cin

    has_bias = b is not None
    assert not (do_norm and has_bias)              # norm layers have their bias removed

    budget = _vmem_budget_bytes()
    tc, hw_tile, hw_pad, single = _choose_tiles(k, cout, hw, budget, force_hw_tile)
    n_hw = hw_pad // hw_tile
    fuse_norm = do_norm and single
    emit_stats = do_norm and not single

    taps = _extract_taps(x_nchw, stride, ho, wo, hw_pad)            # (N, K, hw_pad) bf16
    w2 = jnp.transpose(w, (0, 2, 3, 1)).reshape(cout, k).astype(jnp.bfloat16)

    in_specs = [
        pl.BlockSpec((1, k, hw_tile), lambda bi, j, hh: (bi, 0, hh)),
        pl.BlockSpec((tc, k), lambda bi, j, hh: (j, 0)),
    ]
    args = [taps, w2]
    if has_bias:
        in_specs.append(pl.BlockSpec((tc, 1), lambda bi, j, hh: (j, 0)))
        args.append(jnp.asarray(b, jnp.float32).reshape(cout, 1))

    y_shape = jax.ShapeDtypeStruct((n, cout, hw_pad), jnp.float32)
    y_spec = pl.BlockSpec((1, tc, hw_tile), lambda bi, j, hh: (bi, j, hh))
    if emit_stats:
        stat_shape = jax.ShapeDtypeStruct((n, n_hw, cout, 1), jnp.float32)
        stat_spec = pl.BlockSpec((1, 1, tc, 1), lambda bi, j, hh: (bi, hh, j, 0))
        out_shape = (y_shape, stat_shape, stat_shape)
        out_specs = (y_spec, stat_spec, stat_spec)
    else:
        out_shape = y_shape
        out_specs = y_spec

    kern = functools.partial(
        _conv_kernel, has_bias=has_bias, fuse_norm=fuse_norm, emit_stats=emit_stats,
        do_act=(do_act and not emit_stats), inv_hw=1.0 / hw)

    outs = pl.pallas_call(
        kern,
        out_shape=out_shape,
        grid=(n, cout // tc, n_hw),
        in_specs=in_specs,
        out_specs=out_specs,
        compiler_params=pltpu.CompilerParams(
            dimension_semantics=("parallel", "parallel", "parallel"),
            vmem_limit_bytes=budget),
    )(*args)

    if emit_stats:
        y, psum, psq = outs
        s = jnp.sum(psum, axis=1)[..., 0]          # (N, Cout) exact f32 partial sums
        sq = jnp.sum(psq, axis=1)[..., 0]
        mean = s * (1.0 / hw)
        var = sq * (1.0 / hw) - mean * mean
        scale = jax.lax.rsqrt(var + _EPS)
        shift = -mean * scale
        y = pl.pallas_call(
            functools.partial(_norm_act_kernel, do_act=do_act),
            out_shape=jax.ShapeDtypeStruct((n, cout, hw_pad), jnp.float32),
            grid=(n, cout // tc, n_hw),
            in_specs=[
                pl.BlockSpec((1, tc, hw_tile), lambda bi, j, hh: (bi, j, hh)),
                pl.BlockSpec((1, tc, 1), lambda bi, j, hh: (bi, j, 0)),
                pl.BlockSpec((1, tc, 1), lambda bi, j, hh: (bi, j, 0)),
            ],
            out_specs=pl.BlockSpec((1, tc, hw_tile), lambda bi, j, hh: (bi, j, hh)),
            compiler_params=pltpu.CompilerParams(
                dimension_semantics=("parallel", "parallel", "parallel"),
                vmem_limit_bytes=budget),
        )(y, scale.reshape(n, cout, 1).astype(jnp.float32),
          shift.reshape(n, cout, 1).astype(jnp.float32))
    else:
        y = outs

    return y[:, :, :hw].reshape(n, cout, ho, wo)


def head_layer(x_nchw, w, b, *, stride=1):
    """Final Cout=1 conv (with bias, no norm/act), computed on the VPU."""
    n, cin, h, wd = x_nchw.shape
    ho, wo = _out_hw(h, wd, stride)
    hw = ho * wo
    k = KW * KW * cin

    budget = _vmem_budget_bytes()
    per_lane = 2 * k * 2 + 2 * 4 + 8 * k           # dbl-buf bf16 taps + out + f32 temps
    max_lanes = max(_LANE, (budget - (2 << 20)) // per_lane)
    hw128 = _round_up(hw, _LANE)
    hw_tile = hw128 if hw128 <= max_lanes else max(_LANE, min(2048, (max_lanes // _LANE) * _LANE))
    hw_pad = _round_up(hw, hw_tile)

    taps = _extract_taps(x_nchw, stride, ho, wo, hw_pad)            # (N, K, hw_pad) bf16
    wv = jnp.transpose(w, (0, 2, 3, 1)).reshape(1, k)
    wv = wv.astype(jnp.bfloat16).astype(jnp.float32).reshape(k, 1)  # bf16-rounded, f32 math
    bv = (jnp.asarray(b, jnp.float32) if b is not None
          else jnp.zeros((1,), jnp.float32)).reshape(1, 1)

    y = pl.pallas_call(
        _head_kernel,
        out_shape=jax.ShapeDtypeStruct((n, 1, hw_pad), jnp.float32),
        grid=(n, hw_pad // hw_tile),
        in_specs=[
            pl.BlockSpec((1, k, hw_tile), lambda bi, hh: (bi, 0, hh)),
            pl.BlockSpec((k, 1), lambda bi, hh: (0, 0)),
            pl.BlockSpec((1, 1), lambda bi, hh: (0, 0)),
        ],
        out_specs=pl.BlockSpec((1, 1, hw_tile), lambda bi, hh: (bi, 0, hh)),
        compiler_params=pltpu.CompilerParams(
            dimension_semantics=("parallel", "parallel"),
            vmem_limit_bytes=budget),
    )(taps, wv, bv)

    return y[:, :, :hw].reshape(n, 1, ho, wo)


# ----------------------------------------------------------------------------------
# Full NLayerDiscriminator forward (returns all intermediate features, the default).
# ----------------------------------------------------------------------------------
def make_discriminator(key, input_nc, ndf, n_layers):
    """Returns (layer_cfgs, params). cfg = (Cin, Cout, stride, has_bias, do_norm, do_act)."""
    cfgs = [(input_nc, ndf, 2, True, False, True)]
    nf = ndf
    for nlayer in range(1, n_layers):
        nf_prev, nf = nf, min(nf * 2, 512)
        stride = 1 if nlayer == n_layers - 1 else 2
        cfgs.append((nf_prev, nf, stride, False, True, True))
    cfgs.append((nf, 1, 1, True, False, False))

    params = []
    for (cin, cout, _s, has_bias, _n, _a) in cfgs:
        key, kw_, kb_ = jax.random.split(key, 3)
        w = jax.random.normal(kw_, (cout, cin, KW, KW), jnp.float32) / jnp.sqrt(16.0 * cin)
        b = (jax.random.normal(kb_, (cout,), jnp.float32) * 0.01) if has_bias else None
        params.append((w, b))
    return cfgs, params


def nlayer_discriminator_forward(x_nchw, cfgs, params):
    feats = []
    h = x_nchw
    for (cin, cout, stride, has_bias, do_norm, do_act), (w, b) in zip(cfgs, params):
        if cout == 1:
            h = head_layer(h, w, b, stride=stride)
        else:
            h = conv4x4_layer(h, w, b, stride=stride, do_norm=do_norm, do_act=do_act)
        feats.append(h)
    return tuple(feats)


# ----------------------------------------------------------------------------------
# Plain-JAX reference (same bf16-operand / f32-accumulate semantics) for verification.
# ----------------------------------------------------------------------------------
def _reference_layer(h, w, b, *, stride, do_norm, do_act):
    hr = h.astype(jnp.bfloat16).astype(jnp.float32)
    wr = w.astype(jnp.bfloat16).astype(jnp.float32)
    y = jax.lax.conv_general_dilated(
        hr, wr, window_strides=(stride, stride), padding=((PADW, PADW), (PADW, PADW)),
        dimension_numbers=("NCHW", "OIHW", "NCHW"))
    if b is not None:
        y = y + b[None, :, None, None]
    if do_norm:
        mean = jnp.mean(y, axis=(2, 3), keepdims=True)
        var = jnp.mean(jnp.square(y - mean), axis=(2, 3), keepdims=True)
        y = (y - mean) * jax.lax.rsqrt(var + _EPS)
    if do_act:
        y = jnp.maximum(y, 0.2 * y)
    return y


def _reference_forward(x_nchw, cfgs, params):
    feats = []
    h = x_nchw
    for (cin, cout, stride, has_bias, do_norm, do_act), (w, b) in zip(cfgs, params):
        h = _reference_layer(h, w, b, stride=stride, do_norm=do_norm, do_act=do_act)
        feats.append(h)
    return tuple(feats)


if __name__ == "__main__":
    # Small deterministic example: input_nc = label_nc(4) + output_nc(3) + instance(1) = 8,
    # ndf = 16, n_layers_D = 4 (module default), batch 2, 32x32 spatial.
    N, INPUT_NC, NDF, N_LAYERS, H, W = 2, 8, 16, 4, 32, 32

    key = jax.random.PRNGKey(0)
    kx, kp = jax.random.split(key)
    x = jax.random.normal(kx, (N, INPUT_NC, H, W), jnp.float32)
    cfgs, params = make_discriminator(kp, INPUT_NC, NDF, N_LAYERS)

    fwd = jax.jit(lambda xin, p: nlayer_discriminator_forward(xin, cfgs, p))
    feats = fwd(x, params)
    feats = jax.block_until_ready(feats)

    # The module returns results[1:]  ->  one feature map per layer (n_layers_D + 1).
    assert len(feats) == N_LAYERS + 1
    expected_shapes = [(N, 16, 17, 17), (N, 32, 9, 9), (N, 64, 5, 5),
                       (N, 128, 6, 6), (N, 1, 7, 7)]
    for f, s in zip(feats, expected_shapes):
        assert f.shape == s, (f.shape, s)

    ref_feats = _reference_forward(x, cfgs, params)
    for i, (f, r) in enumerate(zip(feats, ref_feats)):
        err = float(jnp.max(jnp.abs(f - r)))
        assert err < 3e-3, (i, err)

    # Extra check: exercise the HW-tiled two-pass InstanceNorm path (forced 128-lane
    # tiles so the spatial map spans several grid steps, as it would at real sizes).
    k2 = jax.random.PRNGKey(0)
    ka, kb = jax.random.split(k2)
    x2 = jax.random.normal(ka, (1, 8, 40, 40), jnp.float32)
    w2 = jax.random.normal(kb, (16, 8, KW, KW), jnp.float32) / jnp.sqrt(16.0 * 8)
    tiled = jax.jit(functools.partial(conv4x4_layer, stride=2, do_norm=True,
                                      do_act=True, force_hw_tile=128))
    y2 = jax.block_until_ready(tiled(x2, w2, None))
    r2 = _reference_layer(x2, w2, None, stride=2, do_norm=True, do_act=True)
    assert y2.shape == (1, 16, 21, 21), y2.shape
    err2 = float(jnp.max(jnp.abs(y2 - r2)))
    assert err2 < 3e-3, err2

    print("KERNEL_OK")
</pallas_src>

<mosaic_0001>
module attributes {stable_mosaic.version = 11 : i64} {
  func.func @_conv_kernel(%arg0: i32, %arg1: i32, %arg2: i32, %arg3: memref<1x128x384xbf16, #tpu.memory_space<vmem>>, %arg4: memref<16x128xbf16, #tpu.memory_space<vmem>>, %arg5: memref<16x1xf32, #tpu.memory_space<vmem>>, %arg6: memref<1x16x384xf32, #tpu.memory_space<vmem>>) attributes {dimension_semantics = [#tpu.dimension_semantics<parallel>, #tpu.dimension_semantics<parallel>, #tpu.dimension_semantics<parallel>], iteration_bounds = array<i64: 2, 1, 1>, scalar_prefetch = 0 : i64, scratch_operands = 0 : i64, tpu.core_type = #tpu.core_type<tc>, window_params = [{transform_indices = @transform_0, window_bounds = array<i64: 1, 128, 384>}, {transform_indices = @transform_1, window_bounds = array<i64: 16, 128>}, {transform_indices = @transform_2, window_bounds = array<i64: 16, 1>}, {transform_indices = @transform_3, window_bounds = array<i64: 1, 16, 384>}]} {
    %c0 = arith.constant 0 : index
    %c0_0 = arith.constant 0 : index
    %0 = vector.load %arg4[%c0, %c0_0] : memref<16x128xbf16, #tpu.memory_space<vmem>>, vector<16x128xbf16>
    %c0_1 = arith.constant 0 : index
    %c0_2 = arith.constant 0 : index
    %c0_3 = arith.constant 0 : index
    %1 = vector.load %arg3[%c0_1, %c0_2, %c0_3] : memref<1x128x384xbf16, #tpu.memory_space<vmem>>, vector<1x128x384xbf16>
    %2 = vector.shape_cast %1 : vector<1x128x384xbf16> to vector<128x384xbf16>
    %cst = arith.constant dense<0.000000e+00> : vector<16x384xf32>
    %3 = tpu.matmul %0, %2, %cst {dimension_numbers = #tpu.dot_dimension_numbers<[1], [0], [0], [1], [0, 0, 1, 1], [], []>} : vector<16x128xbf16>, vector<128x384xbf16>, vector<16x384xf32> -> vector<16x384xf32>
    %c0_4 = arith.constant 0 : index
    %c0_5 = arith.constant 0 : index
    %4 = vector.load %arg5[%c0_4, %c0_5] : memref<16x1xf32, #tpu.memory_space<vmem>>, vector<16x1xf32>
    %5 = vector.broadcast %4 : vector<16x1xf32> to vector<16x384xf32>
    %6 = arith.addf %3, %5 : vector<16x384xf32>
    %cst_6 = arith.constant 2.000000e-01 : f32
    %7 = vector.broadcast %cst_6 : f32 to vector<16x384xf32>
    %8 = arith.mulf %7, %6 : vector<16x384xf32>
    %9 = arith.maximumf %6, %8 : vector<16x384xf32>
    %10 = vector.shape_cast %9 : vector<16x384xf32> to vector<1x16x384xf32>
    %c0_7 = arith.constant 0 : index
    %c0_8 = arith.constant 0 : index
    %c0_9 = arith.constant 0 : index
    %11 = vector.load %arg6[%c0_7, %c0_8, %c0_9] : memref<1x16x384xf32, #tpu.memory_space<vmem>>, vector<1x16x384xf32>
    tpu.vector_store %arg6[%c0_7, %c0_8, %c0_9], %10 {strides = array<i32>} : memref<1x16x384xf32, #tpu.memory_space<vmem>>, vector<1x16x384xf32>,
    return
  }
  func.func @transform_0(%arg0: i32, %arg1: i32, %arg2: i32) -> (i32, i32, i32) {
    %c0_i32 = arith.constant 0 : i32
    %c0_i32_0 = arith.constant 0 : i32
    return %arg0, %c0_i32, %arg2 : i32, i32, i32
  }
  func.func @transform_1(%arg0: i32, %arg1: i32, %arg2: i32) -> (i32, i32) {
    %c0_i32 = arith.constant 0 : i32
    %c0_i32_0 = arith.constant 0 : i32
    return %arg1, %c0_i32 : i32, i32
  }
  func.func @transform_2(%arg0: i32, %arg1: i32, %arg2: i32) -> (i32, i32) {
    %c0_i32 = arith.constant 0 : i32
    %c0_i32_0 = arith.constant 0 : i32
    return %arg1, %c0_i32 : i32, i32
  }
  func.func @transform_3(%arg0: i32, %arg1: i32, %arg2: i32) -> (i32, i32, i32) {
    %c0_i32 = arith.constant 0 : i32
    return %arg0, %arg1, %arg2 : i32, i32, i32
  }
}

module attributes {stable_mosaic.version = 11 : i64} {
  func.func @_conv_kernel(%arg0: i32, %arg1: i32, %arg2: i32, %arg3: memref<1x256x128xbf16, #tpu.memory_space<vmem>>, %arg4: memref<32x256xbf16, #tpu.memory_space<vmem>>, %arg5: memref<1x32x128xf32, #tpu.memory_space<vmem>>) attributes {dimension_semantics = [#tpu.dimension_semantics<parallel>, #tpu.dimension_semantics<parallel>, #tpu.dimension_semantics<parallel>], iteration_bounds = array<i64: 2, 1, 1>, scalar_prefetch = 0 : i64, scratch_operands = 0 : i64, tpu.core_type = #tpu.core_type<tc>, window_params = [{transform_indices = @transform_0, window_bounds = array<i64: 1, 256, 128>}, {transform_indices = @transform_1, window_bounds = array<i64: 32, 256>}, {transform_indices = @transform_2, window_bounds = array<i64: 1, 32, 128>}]} {
    %c0 = arith.constant 0 : index
    %c0_0 = arith.constant 0 : index
    %0 = vector.load %arg4[%c0, %c0_0] : memref<32x256xbf16, #tpu.memory_space<vmem>>, vector<32x256xbf16>
    %c0_1 = arith.constant 0 : index
    %c0_2 = arith.constant 0 : index
    %c0_3 = arith.constant 0 : index
    %1 = vector.load %arg3[%c0_1, %c0_2, %c0_3] : memref<1x256x128xbf16, #tpu.memory_space<vmem>>, vector<1x256x128xbf16>
    %2 = vector.shape_cast %1 : vector<1x256x128xbf16> to vector<256x128xbf16>
    %cst = arith.constant dense<0.000000e+00> : vector<32x128xf32>
    %3 = tpu.matmul %0, %2, %cst {dimension_numbers = #tpu.dot_dimension_numbers<[1], [0], [0], [1], [0, 0, 1, 1], [], []>} : vector<32x256xbf16>, vector<256x128xbf16>, vector<32x128xf32> -> vector<32x128xf32>
    %cst_4 = arith.constant dense<0.000000e+00> : vector<32xf32>
    %4 = vector.multi_reduction <add>, %3, %cst_4 [1] : vector<32x128xf32> to vector<32xf32>
    %5 = vector.shape_cast %4 : vector<32xf32> to vector<32x1xf32>
    %6 = arith.mulf %3, %3 : vector<32x128xf32>
    %cst_5 = arith.constant dense<0.000000e+00> : vector<32xf32>
    %7 = vector.multi_reduction <add>, %6, %cst_5 [1] : vector<32x128xf32> to vector<32xf32>
    %8 = vector.shape_cast %7 : vector<32xf32> to vector<32x1xf32>
    %cst_6 = arith.constant 0.0123456791 : f32
    %9 = vector.broadcast %cst_6 : f32 to vector<32x1xf32>
    %10 = arith.mulf %5, %9 : vector<32x1xf32>
    %cst_7 = arith.constant 0.0123456791 : f32
    %11 = vector.broadcast %cst_7 : f32 to vector<32x1xf32>
    %12 = arith.mulf %8, %11 : vector<32x1xf32>
    %13 = arith.mulf %10, %10 : vector<32x1xf32>
    %14 = arith.subf %12, %13 : vector<32x1xf32>
    %15 = vector.broadcast %10 : vector<32x1xf32> to vector<32x128xf32>
    %16 = arith.subf %3, %15 : vector<32x128xf32>
    %cst_8 = arith.constant 9.99999974E-6 : f32
    %17 = vector.broadcast %cst_8 : f32 to vector<32x1xf32>
    %18 = arith.addf %14, %17 : vector<32x1xf32>
    %19 = math.rsqrt %18 : vector<32x1xf32>
    %20 = vector.broadcast %19 : vector<32x1xf32> to vector<32x128xf32>
    %21 = arith.mulf %16, %20 : vector<32x128xf32>
    %cst_9 = arith.constant 2.000000e-01 : f32
    %22 = vector.broadcast %cst_9 : f32 to vector<32x128xf32>
    %23 = arith.mulf %22, %21 : vector<32x128xf32>
    %24 = arith.maximumf %21, %23 : vector<32x128xf32>
    %25 = vector.shape_cast %24 : vector<32x128xf32> to vector<1x32x128xf32>
    %c0_10 = arith.constant 0 : index
    %c0_11 = arith.constant 0 : index
    %c0_12 = arith.constant 0 : index
    %26 = vector.load %arg5[%c0_10, %c0_11, %c0_12] : memref<1x32x128xf32, #tpu.memory_space<vmem>>, vector<1x32x128xf32>
    tpu.vector_store %arg5[%c0_10, %c0_11, %c0_12], %25 {strides = array<i32>} : memref<1x32x128xf32, #tpu.memory_space<vmem>>, vector<1x32x128xf32>,
    return
  }
  func.func @transform_0(%arg0: i32, %arg1: i32, %arg2: i32) -> (i32, i32, i32) {
    %c0_i32 = arith.constant 0 : i32
    %c0_i32_0 = arith.constant 0 : i32
    return %arg0, %c0_i32, %arg2 : i32, i32, i32
  }
  func.func @transform_1(%arg0: i32, %arg1: i32, %arg2: i32) -> (i32, i32) {
    %c0_i32 = arith.constant 0 : i32
    %c0_i32_0 = arith.constant 0 : i32
    return %arg1, %c0_i32 : i32, i32
  }
  func.func @transform_2(%arg0: i32, %arg1: i32, %arg2: i32) -> (i32, i32, i32) {
    %c0_i32 = arith.constant 0 : i32
    return %arg0, %arg1, %arg2 : i32, i32, i32
  }
}

module attributes {stable_mosaic.version = 11 : i64} {
  func.func @_conv_kernel(%arg0: i32, %arg1: i32, %arg2: i32, %arg3: memref<1x512x128xbf16, #tpu.memory_space<vmem>>, %arg4: memref<64x512xbf16, #tpu.memory_space<vmem>>, %arg5: memref<1x64x128xf32, #tpu.memory_space<vmem>>) attributes {dimension_semantics = [#tpu.dimension_semantics<parallel>, #tpu.dimension_semantics<parallel>, #tpu.dimension_semantics<parallel>], iteration_bounds = array<i64: 2, 1, 1>, scalar_prefetch = 0 : i64, scratch_operands = 0 : i64, tpu.core_type = #tpu.core_type<tc>, window_params = [{transform_indices = @transform_0, window_bounds = array<i64: 1, 512, 128>}, {transform_indices = @transform_1, window_bounds = array<i64: 64, 512>}, {transform_indices = @transform_2, window_bounds = array<i64: 1, 64, 128>}]} {
    %c0 = arith.constant 0 : index
    %c0_0 = arith.constant 0 : index
    %0 = vector.load %arg4[%c0, %c0_0] : memref<64x512xbf16, #tpu.memory_space<vmem>>, vector<64x512xbf16>
    %c0_1 = arith.constant 0 : index
    %c0_2 = arith.constant 0 : index
    %c0_3 = arith.constant 0 : index
    %1 = vector.load %arg3[%c0_1, %c0_2, %c0_3] : memref<1x512x128xbf16, #tpu.memory_space<vmem>>, vector<1x512x128xbf16>
    %2 = vector.shape_cast %1 : vector<1x512x128xbf16> to vector<512x128xbf16>
    %cst = arith.constant dense<0.000000e+00> : vector<64x128xf32>
    %3 = tpu.matmul %0, %2, %cst {dimension_numbers = #tpu.dot_dimension_numbers<[1], [0], [0], [1], [0, 0, 1, 1], [], []>} : vector<64x512xbf16>, vector<512x128xbf16>, vector<64x128xf32> -> vector<64x128xf32>
    %cst_4 = arith.constant dense<0.000000e+00> : vector<64xf32>
    %4 = vector.multi_reduction <add>, %3, %cst_4 [1] : vector<64x128xf32> to vector<64xf32>
    %5 = vector.shape_cast %4 : vector<64xf32> to vector<64x1xf32>
    %6 = arith.mulf %3, %3 : vector<64x128xf32>
    %cst_5 = arith.constant dense<0.000000e+00> : vector<64xf32>
    %7 = vector.multi_reduction <add>, %6, %cst_5 [1] : vector<64x128xf32> to vector<64xf32>
    %8 = vector.shape_cast %7 : vector<64xf32> to vector<64x1xf32>
    %cst_6 = arith.constant 4.000000e-02 : f32
    %9 = vector.broadcast %cst_6 : f32 to vector<64x1xf32>
    %10 = arith.mulf %5, %9 : vector<64x1xf32>
    %cst_7 = arith.constant 4.000000e-02 : f32
    %11 = vector.broadcast %cst_7 : f32 to vector<64x1xf32>
    %12 = arith.mulf %8, %11 : vector<64x1xf32>
    %13 = arith.mulf %10, %10 : vector<64x1xf32>
    %14 = arith.subf %12, %13 : vector<64x1xf32>
    %15 = vector.broadcast %10 : vector<64x1xf32> to vector<64x128xf32>
    %16 = arith.subf %3, %15 : vector<64x128xf32>
    %cst_8 = arith.constant 9.99999974E-6 : f32
    %17 = vector.broadcast %cst_8 : f32 to vector<64x1xf32>
    %18 = arith.addf %14, %17 : vector<64x1xf32>
    %19 = math.rsqrt %18 : vector<64x1xf32>
    %20 = vector.broadcast %19 : vector<64x1xf32> to vector<64x128xf32>
    %21 = arith.mulf %16, %20 : vector<64x128xf32>
    %cst_9 = arith.constant 2.000000e-01 : f32
    %22 = vector.broadcast %cst_9 : f32 to vector<64x128xf32>
    %23 = arith.mulf %22, %21 : vector<64x128xf32>
    %24 = arith.maximumf %21, %23 : vector<64x128xf32>
    %25 = vector.shape_cast %24 : vector<64x128xf32> to vector<1x64x128xf32>
    %c0_10 = arith.constant 0 : index
    %c0_11 = arith.constant 0 : index
    %c0_12 = arith.constant 0 : index
    %26 = vector.load %arg5[%c0_10, %c0_11, %c0_12] : memref<1x64x128xf32, #tpu.memory_space<vmem>>, vector<1x64x128xf32>
    tpu.vector_store %arg5[%c0_10, %c0_11, %c0_12], %25 {strides = array<i32>} : memref<1x64x128xf32, #tpu.memory_space<vmem>>, vector<1x64x128xf32>,
    return
  }
  func.func @transform_0(%arg0: i32, %arg1: i32, %arg2: i32) -> (i32, i32, i32) {
    %c0_i32 = arith.constant 0 : i32
    %c0_i32_0 = arith.constant 0 : i32
    return %arg0, %c0_i32, %arg2 : i32, i32, i32
  }
  func.func @transform_1(%arg0: i32, %arg1: i32, %arg2: i32) -> (i32, i32) {
    %c0_i32 = arith.constant 0 : i32
    %c0_i32_0 = arith.constant 0 : i32
    return %arg1, %c0_i32 : i32, i32
  }
  func.func @transform_2(%arg0: i32, %arg1: i32, %arg2: i32) -> (i32, i32, i32) {
    %c0_i32 = arith.constant 0 : i32
    return %arg0, %arg1, %arg2 : i32, i32, i32
  }
}

module attributes {stable_mosaic.version = 11 : i64} {
  func.func @_conv_kernel(%arg0: i32, %arg1: i32, %arg2: i32, %arg3: memref<1x1024x128xbf16, #tpu.memory_space<vmem>>, %arg4: memref<128x1024xbf16, #tpu.memory_space<vmem>>, %arg5: memref<1x128x128xf32, #tpu.memory_space<vmem>>) attributes {dimension_semantics = [#tpu.dimension_semantics<parallel>, #tpu.dimension_semantics<parallel>, #tpu.dimension_semantics<parallel>], iteration_bounds = array<i64: 2, 1, 1>, scalar_prefetch = 0 : i64, scratch_operands = 0 : i64, tpu.core_type = #tpu.core_type<tc>, window_params = [{transform_indices = @transform_0, window_bounds = array<i64: 1, 1024, 128>}, {transform_indices = @transform_1, window_bounds = array<i64: 128, 1024>}, {transform_indices = @transform_2, window_bounds = array<i64: 1, 128, 128>}]} {
    %c0 = arith.constant 0 : index
    %c0_0 = arith.constant 0 : index
    %0 = vector.load %arg4[%c0, %c0_0] : memref<128x1024xbf16, #tpu.memory_space<vmem>>, vector<128x1024xbf16>
    %c0_1 = arith.constant 0 : index
    %c0_2 = arith.constant 0 : index
    %c0_3 = arith.constant 0 : index
    %1 = vector.load %arg3[%c0_1, %c0_2, %c0_3] : memref<1x1024x128xbf16, #tpu.memory_space<vmem>>, vector<1x1024x128xbf16>
    %2 = vector.shape_cast %1 : vector<1x1024x128xbf16> to vector<1024x128xbf16>
    %cst = arith.constant dense<0.000000e+00> : vector<128x128xf32>
    %3 = tpu.matmul %0, %2, %cst {dimension_numbers = #tpu.dot_dimension_numbers<[1], [0], [0], [1], [0, 0, 1, 1], [], []>} : vector<128x1024xbf16>, vector<1024x128xbf16>, vector<128x128xf32> -> vector<128x128xf32>
    %cst_4 = arith.constant dense<0.000000e+00> : vector<128xf32>
    %4 = vector.multi_reduction <add>, %3, %cst_4 [1] : vector<128x128xf32> to vector<128xf32>
    %5 = vector.shape_cast %4 : vector<128xf32> to vector<128x1xf32>
    %6 = arith.mulf %3, %3 : vector<128x128xf32>
    %cst_5 = arith.constant dense<0.000000e+00> : vector<128xf32>
    %7 = vector.multi_reduction <add>, %6, %cst_5 [1] : vector<128x128xf32> to vector<128xf32>
    %8 = vector.shape_cast %7 : vector<128xf32> to vector<128x1xf32>
    %cst_6 = arith.constant 0.027777778 : f32
    %9 = vector.broadcast %cst_6 : f32 to vector<128x1xf32>
    %10 = arith.mulf %5, %9 : vector<128x1xf32>
    %cst_7 = arith.constant 0.027777778 : f32
    %11 = vector.broadcast %cst_7 : f32 to vector<128x1xf32>
    %12 = arith.mulf %8, %11 : vector<128x1xf32>
    %13 = arith.mulf %10, %10 : vector<128x1xf32>
    %14 = arith.subf %12, %13 : vector<128x1xf32>
    %15 = vector.broadcast %10 : vector<128x1xf32> to vector<128x128xf32>
    %16 = arith.subf %3, %15 : vector<128x128xf32>
    %cst_8 = arith.constant 9.99999974E-6 : f32
    %17 = vector.broadcast %cst_8 : f32 to vector<128x1xf32>
    %18 = arith.addf %14, %17 : vector<128x1xf32>
    %19 = math.rsqrt %18 : vector<128x1xf32>
    %20 = vector.broadcast %19 : vector<128x1xf32> to vector<128x128xf32>
    %21 = arith.mulf %16, %20 : vector<128x128xf32>
    %cst_9 = arith.constant 2.000000e-01 : f32
    %22 = vector.broadcast %cst_9 : f32 to vector<128x128xf32>
    %23 = arith.mulf %22, %21 : vector<128x128xf32>
    %24 = arith.maximumf %21, %23 : vector<128x128xf32>
    %25 = vector.shape_cast %24 : vector<128x128xf32> to vector<1x128x128xf32>
    %c0_10 = arith.constant 0 : index
    %c0_11 = arith.constant 0 : index
    %c0_12 = arith.constant 0 : index
    %26 = vector.load %arg5[%c0_10, %c0_11, %c0_12] : memref<1x128x128xf32, #tpu.memory_space<vmem>>, vector<1x128x128xf32>
    tpu.vector_store %arg5[%c0_10, %c0_11, %c0_12], %25 {strides = array<i32>} : memref<1x128x128xf32, #tpu.memory_space<vmem>>, vector<1x128x128xf32>,
    return
  }
  func.func @transform_0(%arg0: i32, %arg1: i32, %arg2: i32) -> (i32, i32, i32) {
    %c0_i32 = arith.constant 0 : i32
    %c0_i32_0 = arith.constant 0 : i32
    return %arg0, %c0_i32, %arg2 : i32, i32, i32
  }
  func.func @transform_1(%arg0: i32, %arg1: i32, %arg2: i32) -> (i32, i32) {
    %c0_i32 = arith.constant 0 : i32
    %c0_i32_0 = arith.constant 0 : i32
    return %arg1, %c0_i32 : i32, i32
  }
  func.func @transform_2(%arg0: i32, %arg1: i32, %arg2: i32) -> (i32, i32, i32) {
    %c0_i32 = arith.constant 0 : i32
    return %arg0, %arg1, %arg2 : i32, i32, i32
  }
}

module attributes {stable_mosaic.version = 11 : i64} {
  func.func @_head_kernel(%arg0: i32, %arg1: i32, %arg2: memref<1x2048x128xbf16, #tpu.memory_space<vmem>>, %arg3: memref<2048x1xf32, #tpu.memory_space<vmem>>, %arg4: memref<1x1xf32, #tpu.memory_space<vmem>>, %arg5: memref<1x1x128xf32, #tpu.memory_space<vmem>>) attributes {dimension_semantics = [#tpu.dimension_semantics<parallel>, #tpu.dimension_semantics<parallel>], iteration_bounds = array<i64: 2, 1>, scalar_prefetch = 0 : i64, scratch_operands = 0 : i64, tpu.core_type = #tpu.core_type<tc>, window_params = [{transform_indices = @transform_0, window_bounds = array<i64: 1, 2048, 128>}, {pipeline_mode = #tpu.pipeline_mode<synchronous>, transform_indices = @transform_1, window_bounds = array<i64: 2048, 1>}, {pipeline_mode = #tpu.pipeline_mode<synchronous>, transform_indices = @transform_2, window_bounds = array<i64: 1, 1>}, {transform_indices = @transform_3, window_bounds = array<i64: 1, 1, 128>}]} {
    %c0 = arith.constant 0 : index
    %c0_0 = arith.constant 0 : index
    %c0_1 = arith.constant 0 : index
    %0 = vector.load %arg2[%c0, %c0_0, %c0_1] : memref<1x2048x128xbf16, #tpu.memory_space<vmem>>, vector<1x2048x128xbf16>
    %1 = vector.shape_cast %0 : vector<1x2048x128xbf16> to vector<2048x128xbf16>
    %2 = arith.extf %1 : vector<2048x128xbf16> to vector<2048x128xf32>
    %c0_2 = arith.constant 0 : index
    %c0_3 = arith.constant 0 : index
    %3 = vector.load %arg3[%c0_2, %c0_3] : memref<2048x1xf32, #tpu.memory_space<vmem>>, vector<2048x1xf32>
    %4 = vector.broadcast %3 : vector<2048x1xf32> to vector<2048x128xf32>
    %5 = arith.mulf %2, %4 : vector<2048x128xf32>
    %cst = arith.constant dense<0.000000e+00> : vector<128xf32>
    %6 = vector.multi_reduction <add>, %5, %cst [0] : vector<2048x128xf32> to vector<128xf32>
    %7 = vector.shape_cast %6 : vector<128xf32> to vector<1x128xf32>
    %c0_4 = arith.constant 0 : index
    %c0_5 = arith.constant 0 : index
    %8 = vector.load %arg4[%c0_4, %c0_5] : memref<1x1xf32, #tpu.memory_space<vmem>>, vector<1x1xf32>
    %9 = vector.broadcast %8 : vector<1x1xf32> to vector<1x128xf32>
    %10 = arith.addf %7, %9 : vector<1x128xf32>
    %11 = vector.shape_cast %10 : vector<1x128xf32> to vector<1x1x128xf32>
    %c0_6 = arith.constant 0 : index
    %c0_7 = arith.constant 0 : index
    %c0_8 = arith.constant 0 : index
    %12 = vector.load %arg5[%c0_6, %c0_7, %c0_8] : memref<1x1x128xf32, #tpu.memory_space<vmem>>, vector<1x1x128xf32>
    tpu.vector_store %arg5[%c0_6, %c0_7, %c0_8], %11 {strides = array<i32>} : memref<1x1x128xf32, #tpu.memory_space<vmem>>, vector<1x1x128xf32>,
    return
  }
  func.func @transform_0(%arg0: i32, %arg1: i32) -> (i32, i32, i32) {
    %c0_i32 = arith.constant 0 : i32
    %c0_i32_0 = arith.constant 0 : i32
    return %arg0, %c0_i32, %arg1 : i32, i32, i32
  }
  func.func @transform_1(%arg0: i32, %arg1: i32) -> (i32, i32) {
    %c0_i32 = arith.constant 0 : i32
    %c0_i32_0 = arith.constant 0 : i32
    %c0_i32_1 = arith.constant 0 : i32
    return %c0_i32, %c0_i32_0 : i32, i32
  }
  func.func @transform_2(%arg0: i32, %arg1: i32) -> (i32, i32) {
    %c0_i32 = arith.constant 0 : i32
    %c0_i32_0 = arith.constant 0 : i32
    %c0_i32_1 = arith.constant 0 : i32
    return %c0_i32, %c0_i32_0 : i32, i32
  }
  func.func @transform_3(%arg0: i32, %arg1: i32) -> (i32, i32, i32) {
    %c0_i32 = arith.constant 0 : i32
    %c0_i32_0 = arith.constant 0 : i32
    return %arg0, %c0_i32, %arg1 : i32, i32, i32
  }
}

</mosaic_0001>

<bundles_post_ra>
// kernel: _lambda_.5
= control target key start
LH: loop header
LB: loop body
LE: loop exit
PB: predicated region body
PF: predicated region fallthrough
CT: control target
= control target key end

     0   :  { %s862_s12 = smov 0   ;;  %s864_s13 = smov 0   ;;  %s958_s0 = inlined_call_operand.vmem [shape: bf16[2,128,384], index: 0, kind: input, shape index: {}]   ;;  %s959_s1 = inlined_call_operand.vmem [shape: bf16[16,128], index: 1, kind: input, shape index: {}]   ;;  %s960_s2 = inlined_call_operand.vmem [shape: f32[16,1], index: 2, kind: input, shape index: {}]   ;;  %s961_s3 = inlined_call_operand.vmem [shape: f32[2,16,384], index: 3, kind: output, shape index: {}]  }
   0x1   :  { %s866_s14 = smov 0  }
   0x2 LB: > { %s32_s15 = sadd.s32 1, %s835_s13  ;;  %p659_p0 = scmp.ge.s32.totalorder %s839_s14, 1  ;;  %s839_s14 = sphi %s866_s14, %s13_s14   ;;  %s835_s13 = sphi %s864_s13, %s963_s13   ;;  %s831_s12 = sphi %s862_s12, %s962_s12  }
   0x3   : > { %p34_p1 = scmp.ge.s32.totalorder %s32_s15, 2  ;;  %p189_p2 = scmp.lt.s32.totalorder %s839_s14, 3 }
   0x5   : > { %s965_s15 = smov (%p34_p1, %s32_s15), 0  ;;  %p190_p3 = pnand %p659_p0, %p189_p2 }
   0x6   : > { %p237_p4 = scmp.lt.s32.totalorder (!%p190_p3), %s831_s12, 1 }
   0x7   : > { %193 = sbr.rel (%p190_p3) target bundleno = 198 (0xc6), region = 32 }
   0xc   : > { %s967_s12 = smov (!%p237_p4, %s831_s12), 1  ;;  %v308_v48 = vld [vmem:[%s960_s2] sm:$0xff]  ;;  %v841_v52 = vmov 0   ;;  %v309_v63 = vld [vmem:[%s960_s2 + $0x8] sm:$0xff] }
   0xd   : > { %s789_s16 = smul.u32 192, %s967_s12  ;;  %816 = vset.pattern.permute.xlu0 %v841_v52 }
   0xe   : > { %312 = vperm.xlu0 %816, %v308_v48   ;;  %s790_s26 = smul.u32 48, %s967_s12 }
   0xf   : > { %s886_s19 = scalar_lea.vmem %s958_s0, %s789_s16 }
  0x10   : > { %v752_v0 = vld [vmem:[%s886_s19 + $0xa8] sm:$0xf]  ;;  %v787_v1 = vld [vmem:[%s886_s19 + $0xb0] sm:$0xf0]  ;;  %v786_v2 = vld [vmem:[%s886_s19 + $0xac] sm:$0xf]  ;;  %s271_s29 = scalar_lea.vmem %s961_s3, %s790_s26 }
  0x11   : > { %v753_v3 = vor.u32 %v787_v1, %v752_v0  ;;  %v754_v4 = vld [vmem:[%s886_s19 + $0xb4] sm:$0xf0]  ;;  %v760_v5 = vld [vmem:[%s886_s19 + $0xb0] sm:$0xf]  ;;  %v788_v6 = vld [vmem:[%s886_s19 + $0xb8] sm:$0xf0] }
  0x12   : > { %v757_v7 = vor.u32 %v786_v2, %v754_v4  ;;  %v761_v8 = vor.u32 %v788_v6, %v760_v5  ;;  %v740_v9 = vld [vmem:[%s886_s19 + $0x90] sm:$0xf]  ;;  %v784_v10 = vld [vmem:[%s886_s19 + $0x98] sm:$0xf0]  ;;  %v783_v11 = vld [vmem:[%s886_s19 + $0x94] sm:$0xf] }
  0x13   : > { %454 = vmatpush.bf16.msra.mxu0 %v753_v3  ;;  %v741_v12 = vor.u32 %v784_v10, %v740_v9  ;;  %v742_v13 = vld [vmem:[%s886_s19 + $0x9c] sm:$0xf0]  ;;  %v748_v14 = vld [vmem:[%s886_s19 + $0x98] sm:$0xf]  ;;  %v785_v15 = vld [vmem:[%s886_s19 + $0xa0] sm:$0xf0] }
  0x14   : > { %468 = vmatpush.bf16.msra.mxu1 %v757_v7  ;;  %482 = vmatpush.bf16.msra.mxu2 %v761_v8  ;;  %v745_v16 = vor.u32 %v783_v11, %v742_v13  ;;  %v749_v17 = vor.u32 %v785_v15, %v748_v14  ;;  %v728_v18 = vld [vmem:[%s886_s19 + $0x78] sm:$0xf]  ;;  %v781_v19 = vld [vmem:[%s886_s19 + $0x80] sm:$0xf0]  ;;  %v780_v20 = vld [vmem:[%s886_s19 + $0x7c] sm:$0xf] }
  0x15   : > { %v730_v21 = vld [vmem:[%s886_s19 + $0x84] sm:$0xf0]  ;;  %v736_v22 = vld [vmem:[%s886_s19 + $0x80] sm:$0xf]  ;;  %v782_v23 = vld [vmem:[%s886_s19 + $0x88] sm:$0xf0]  ;;  %v729_v24 = vor.u32 %v781_v19, %v728_v18 }
  0x16   : > { %v733_v25 = vor.u32 %v780_v20, %v730_v21  ;;  %v737_v26 = vor.u32 %v782_v23, %v736_v22  ;;  %v716_v27 = vld [vmem:[%s886_s19 + $0x60] sm:$0xf]  ;;  %v778_v28 = vld [vmem:[%s886_s19 + $0x68] sm:$0xf0]  ;;  %v777_v29 = vld [vmem:[%s886_s19 + $0x64] sm:$0xf]  ;;  %317 = vperm.xlu0 %816, %v309_v63  }
  0x17   : > { %455 = vmatpush.bf16.msra.mxu0 %v741_v12  ;;  %v718_v30 = vld [vmem:[%s886_s19 + $0x6c] sm:$0xf0]  ;;  %v724_v31 = vld [vmem:[%s886_s19 + $0x68] sm:$0xf]  ;;  %v779_v32 = vld [vmem:[%s886_s19 + $0x70] sm:$0xf0]  ;;  %v717_v33 = vor.u32 %v778_v28, %v716_v27 }
  0x18   : > { %469 = vmatpush.bf16.msra.mxu1 %v745_v16  ;;  %483 = vmatpush.bf16.msra.mxu2 %v749_v17  ;;  %v721_v34 = vor.u32 %v777_v29, %v718_v30  ;;  %v725_v35 = vor.u32 %v779_v32, %v724_v31  ;;  %v704_v36 = vld [vmem:[%s886_s19 + $0x48] sm:$0xf]  ;;  %v775_v37 = vld [vmem:[%s886_s19 + $0x50] sm:$0xf0]  ;;  %v774_v38 = vld [vmem:[%s886_s19 + $0x4c] sm:$0xf] }
  0x19   : > { %v706_v39 = vld [vmem:[%s886_s19 + $0x54] sm:$0xf0]  ;;  %v712_v40 = vld [vmem:[%s886_s19 + $0x50] sm:$0xf]  ;;  %v776_v41 = vld [vmem:[%s886_s19 + $0x58] sm:$0xf0]  ;;  %v705_v42 = vor.u32 %v775_v37, %v704_v36 }
  0x1a   : > { %v692_v43 = vld [vmem:[%s886_s19 + $0x30] sm:$0xf]  ;;  %v709_v44 = vor.u32 %v774_v38, %v706_v39  ;;  %v713_v45 = vor.u32 %v776_v41, %v712_v40  ;;  %v772_v46 = vld [vmem:[%s886_s19 + $0x38] sm:$0xf0]  ;;  %v771_v47 = vld [vmem:[%s886_s19 + $0x34] sm:$0xf] }
  0x1b   : > { %456 = vmatpush.bf16.msra.mxu0 %v729_v24  ;;  %v694_v49 = vld [vmem:[%s886_s19 + $0x3c] sm:$0xf0]  ;;  %v700_v50 = vld [vmem:[%s886_s19 + $0x38] sm:$0xf]  ;;  %v773_v51 = vld [vmem:[%s886_s19 + $0x40] sm:$0xf0]  ;;  %v693_v53 = vor.u32 %v772_v46, %v692_v43 }
  0x1c   : > { %470 = vmatpush.bf16.msra.mxu1 %v733_v25  ;;  %484 = vmatpush.bf16.msra.mxu2 %v737_v26  ;;  %v697_v54 = vor.u32 %v771_v47, %v694_v49  ;;  %v701_v55 = vor.u32 %v773_v51, %v700_v50  ;;  %v680_v56 = vld [vmem:[%s886_s19 + $0x18] sm:$0xf]  ;;  %v769_v57 = vld [vmem:[%s886_s19 + $0x20] sm:$0xf0]  ;;  %v768_v58 = vld [vmem:[%s886_s19 + $0x1c] sm:$0xf] }
  0x1d   : > { %v682_v59 = vld [vmem:[%s886_s19 + $0x24] sm:$0xf0]  ;;  %v688_v60 = vld [vmem:[%s886_s19 + $0x20] sm:$0xf]  ;;  %v770_v61 = vld [vmem:[%s886_s19 + $0x28] sm:$0xf0]  ;;  %v681_v62 = vor.u32 %v769_v57, %v680_v56 }
  0x1e   : > { %v685_v0 = vor.u32 %v768_v58, %v682_v59  ;;  %v689_v1 = vor.u32 %v770_v61, %v688_v60  ;;  %v668_v2 = vld [vmem:[%s886_s19] sm:$0xf]  ;;  %v766_v3 = vld [vmem:[%s886_s19 + $0x8] sm:$0xf0]  ;;  %v765_v4 = vld [vmem:[%s886_s19 + $0x4] sm:$0xf] }
  0x1f   : > { %457 = vmatpush.bf16.msra.mxu0 %v717_v33  ;;  %v670_v5 = vld [vmem:[%s886_s19 + $0xc] sm:$0xf0]  ;;  %v676_v6 = vld [vmem:[%s886_s19 + $0x8] sm:$0xf]  ;;  %v767_v7 = vld [vmem:[%s886_s19 + $0x10] sm:$0xf0]  ;;  %v669_v8 = vor.u32 %v766_v3, %v668_v2 }
  0x20   : > { %471 = vmatpush.bf16.msra.mxu1 %v721_v34  ;;  %485 = vmatpush.bf16.msra.mxu2 %v725_v35  ;;  %v673_v9 = vor.u32 %v765_v4, %v670_v5  ;;  %v677_v10 = vor.u32 %v767_v7, %v676_v6  ;;  %v764_v11 = vld [vmem:[%s959_s1] sm:$0xff] }
  0x23   : > { %458 = vmatpush.bf16.msra.mxu0 %v705_v42 }
  0x24   : > { %472 = vmatpush.bf16.msra.mxu1 %v709_v44  ;;  %486 = vmatpush.bf16.msra.mxu2 %v713_v45 }
  0x27   : > { %459 = vmatpush.bf16.msra.mxu0 %v693_v53 }
  0x28   : > { %473 = vmatpush.bf16.msra.mxu1 %v697_v54  ;;  %487 = vmatpush.bf16.msra.mxu2 %v701_v55 }
  0x2b   : > { %460 = vmatpush.bf16.msra.mxu0 %v681_v62 }
  0x2c   : > { %474 = vmatpush.bf16.msra.mxu1 %v685_v0  ;;  %488 = vmatpush.bf16.msra.mxu2 %v689_v1 }
  0x2f   : > { %461 = vmatpush.bf16.msra.mxu0 %v669_v8 }
  0x30   : > { %475 = vmatpush.bf16.msra.mxu1 %v673_v9  ;;  %489 = vmatpush.bf16.msra.mxu2 %v677_v10 }
  0x32   : > { %462 = vmatmul.bf16.vlgmr.msra.gmra.mxu0 %v764_v11 }
  0x33   : > { %476 = vmatmul.bf16.vlgmr.msra.gmra.mxu1 %v764_v11  ;;  %490 = vmatmul.bf16.vlgmr.msra.gmra.mxu2 %v764_v11 }
  0x80   : > { %v313_v12 = vpop.permute.xlu0 %312 }
  0x88   : > { %v318_v22 = vpop.permute.xlu0 %317 }
  0xaf   : > { %v463_v13 = vpop.f32.mrf.mxu0 }
  0xb0   : > { %v464_v14 = vadd.f32 %v463_v13, %v313_v12  ;;  %v477_v15 = vpop.f32.mrf.mxu1 }
  0xb1   : > { %v478_v16 = vadd.f32 %v477_v15, %v313_v12 }
  0xb2   : > { %v496_v17 = vmul.f32 0.2, %v464_v14 }
  0xb3   : > { %v497_v18 = vmul.f32 0.2, %v478_v16 }
  0xb4   : > { %v502_v19 = vmax.f32 %v464_v14, %v496_v17 }
  0xb5   : > { %v503_v20 = vmax.f32 %v478_v16, %v497_v18 }
  0xb6   : > { %508 = vst [vmem:[%s271_s29] sm:$0xff] %v502_v19  ;;  %v491_v21 = vpop.f32.mrf.mxu2 }
  0xb7   : > { %509 = vst [vmem:[%s271_s29 + $0x8] sm:$0xff] %v503_v20  ;;  %v492_v23 = vadd.f32 %v491_v21, %v313_v12  ;;  %v465_v24 = vpop.f32.mrf.mxu0 }
  0xb8   : > { %v466_v25 = vadd.f32 %v465_v24, %v318_v22  ;;  %v479_v26 = vpop.f32.mrf.mxu1 }
  0xb9   : > { %v498_v27 = vmul.f32 0.2, %v492_v23  ;;  %v480_v28 = vadd.f32 %v479_v26, %v318_v22 }
  0xba   : > { %v499_v29 = vmul.f32 0.2, %v466_v25 }
  0xbb   : > { %v504_v30 = vmax.f32 %v492_v23, %v498_v27  ;;  %v500_v31 = vmul.f32 0.2, %v480_v28 }
  0xbc   : > { %v505_v32 = vmax.f32 %v466_v25, %v499_v29 }
  0xbd   : > { %510 = vst [vmem:[%s271_s29 + $0x10] sm:$0xff] %v504_v30  ;;  %v506_v33 = vmax.f32 %v480_v28, %v500_v31 }
  0xbe   : > { %511 = vst [vmem:[%s271_s29 + $0x18] sm:$0xff] %v505_v32  ;;  %v493_v34 = vpop.f32.mrf.mxu2 }
  0xbf   : > { %512 = vst [vmem:[%s271_s29 + $0x20] sm:$0xff] %v506_v33  ;;  %v494_v35 = vadd.f32 %v493_v34, %v318_v22 }
  0xc1   : > { %v501_v36 = vmul.f32 0.2, %v494_v35 }
  0xc3   : > { %v507_v37 = vmax.f32 %v494_v35, %v501_v36 }
  0xc5   : > { %513 = vst [vmem:[%s271_s29 + $0x28] sm:$0xff] %v507_v37 }
  0xc6 PF: > { %s13_s14 = sadd.s32 1, %s839_s14   ;;  %s962_s12 = smov %s835_s13 }
  0xc7   : > { %p10_p5 = scmp.ge.s32.totalorder %s13_s14, 4   ;;  %s963_s13 = smov %s965_s15 }
  0xc9   :  { %12 = sbr.rel (!%p10_p5) target bundleno = 2 (0x2), region = 68 }

// kernel: _lambda_.6
= control target key start
LH: loop header
LB: loop body
LE: loop exit
PB: predicated region body
PF: predicated region fallthrough
CT: control target
= control target key end

     0   :  { %s824_s9 = smov 0   ;;  %s826_s10 = smov 0   ;;  %s943_s0 = inlined_call_operand.vmem [shape: bf16[2,256,128], index: 0, kind: input, shape index: {}]   ;;  %s944_s1 = inlined_call_operand.vmem [shape: bf16[32,256], index: 1, kind: input, shape index: {}]   ;;  %s945_s2 = inlined_call_operand.vmem [shape: f32[2,32,128], index: 2, kind: output, shape index: {}]  }
   0x1   :  { %s828_s11 = smov 0  }
   0x2 LB: > { %s31_s12 = sadd.s32 1, %s803_s10  ;;  %p628_p0 = scmp.ge.s32.totalorder %s807_s11, 1  ;;  %s807_s11 = sphi %s828_s11, %s12_s11   ;;  %s803_s10 = sphi %s826_s10, %s947_s10   ;;  %s799_s9 = sphi %s824_s9, %s946_s9  }
   0x3   : > { %p33_p1 = scmp.ge.s32.totalorder %s31_s12, 2  ;;  %p152_p2 = scmp.lt.s32.totalorder %s807_s11, 3 }
   0x5   : > { %s949_s12 = smov (%p33_p1, %s31_s12), 0  ;;  %p153_p3 = pnand %p628_p0, %p152_p2 }
   0x6   : > { %p190_p4 = scmp.lt.s32.totalorder (!%p153_p3), %s799_s9, 1 }
   0x7   : > { %156 = sbr.rel (%p153_p3) target bundleno = 345 (0x159), region = 28 }
   0xc   : > { %s951_s9 = smov (!%p190_p4, %s799_s9), 1  ;;  %v635_v14 = vld [vmem:[%s944_s1] sm:$0xf]  ;;  %v718_v16 = vld [vmem:[%s944_s1 + $0x4] sm:$0xf0] }
   0xd   : > { %s715_s13 = sshll.u32 %s951_s9, 7  ;;  %v643_v17 = vld [vmem:[%s944_s1 + $0x10] sm:$0xf]  ;;  %v720_v19 = vld [vmem:[%s944_s1 + $0x14] sm:$0xf0]  ;;  %v636_v24 = vor.u32 %v718_v16, %v635_v14  ;;  %s716_s5 = sshll.u32 %s951_s9, 5 }
   0xe   : > { %s848_s16 = scalar_lea.vmem %s943_s0, %s715_s13  ;;  %v717_v20 = vld [vmem:[%s944_s1 + $0x4] sm:$0xf]  ;;  %v637_v21 = vld [vmem:[%s944_s1 + $0x8] sm:$0xf0]  ;;  %v719_v22 = vld [vmem:[%s944_s1 + $0x14] sm:$0xf]  ;;  %v644_v25 = vor.u32 %v720_v19, %v643_v17  ;;  %s923_s8 = scalar_lea.vmem %s945_s2, %s716_s5 }
   0xf   : > { %v728_v0 = vld [vmem:[%s848_s16 + $0x38] sm:$0xff]  ;;  %v727_v2 = vld [vmem:[%s848_s16 + $0x30] sm:$0xff]  ;;  %v726_v4 = vld [vmem:[%s848_s16 + $0x28] sm:$0xff]  ;;  %v640_v26 = vor.u32 %v717_v20, %v637_v21 }
  0x10   : > { %v736_v1 = vld [vmem:[%s848_s16 + $0x78] sm:$0xff]  ;;  %370 = vmatpush.bf16.msra.mxu0 %v728_v0  ;;  %737 = vmatpush.bf16.msra.mxu2 %v728_v0  ;;  %v735_v3 = vld [vmem:[%s848_s16 + $0x70] sm:$0xff]  ;;  %v734_v5 = vld [vmem:[%s848_s16 + $0x68] sm:$0xff] }
  0x11   : > { %389 = vmatpush.bf16.msra.mxu1 %v736_v1  ;;  %745 = vmatpush.bf16.msra.mxu3 %v736_v1  ;;  %v725_v6 = vld [vmem:[%s848_s16 + $0x20] sm:$0xff]  ;;  %v724_v8 = vld [vmem:[%s848_s16 + $0x18] sm:$0xff]  ;;  %v723_v10 = vld [vmem:[%s848_s16 + $0x10] sm:$0xff] }
  0x12   : > { %v733_v7 = vld [vmem:[%s848_s16 + $0x60] sm:$0xff]  ;;  %v732_v9 = vld [vmem:[%s848_s16 + $0x58] sm:$0xff]  ;;  %v731_v11 = vld [vmem:[%s848_s16 + $0x50] sm:$0xff] }
  0x13   : > { %v722_v12 = vld [vmem:[%s848_s16 + $0x8] sm:$0xff]  ;;  %v721_v15 = vld [vmem:[%s848_s16] sm:$0xff]  ;;  %v645_v23 = vld [vmem:[%s944_s1 + $0x18] sm:$0xf0] }
  0x14   : > { %371 = vmatpush.bf16.msra.mxu0 %v727_v2  ;;  %738 = vmatpush.bf16.msra.mxu2 %v727_v2  ;;  %v730_v13 = vld [vmem:[%s848_s16 + $0x48] sm:$0xff]  ;;  %v729_v18 = vld [vmem:[%s848_s16 + $0x40] sm:$0xff]  ;;  %v648_v27 = vor.u32 %v719_v22, %v645_v23 }
  0x15   : > { %390 = vmatpush.bf16.msra.mxu1 %v735_v3  ;;  %746 = vmatpush.bf16.msra.mxu3 %v735_v3 }
  0x18   : > { %372 = vmatpush.bf16.msra.mxu0 %v726_v4  ;;  %739 = vmatpush.bf16.msra.mxu2 %v726_v4 }
  0x19   : > { %391 = vmatpush.bf16.msra.mxu1 %v734_v5  ;;  %747 = vmatpush.bf16.msra.mxu3 %v734_v5 }
  0x1c   : > { %373 = vmatpush.bf16.msra.mxu0 %v725_v6  ;;  %740 = vmatpush.bf16.msra.mxu2 %v725_v6 }
  0x1d   : > { %392 = vmatpush.bf16.msra.mxu1 %v733_v7  ;;  %748 = vmatpush.bf16.msra.mxu3 %v733_v7 }
  0x20   : > { %374 = vmatpush.bf16.msra.mxu0 %v724_v8  ;;  %741 = vmatpush.bf16.msra.mxu2 %v724_v8 }
  0x21   : > { %393 = vmatpush.bf16.msra.mxu1 %v732_v9  ;;  %749 = vmatpush.bf16.msra.mxu3 %v732_v9 }
  0x24   : > { %375 = vmatpush.bf16.msra.mxu0 %v723_v10  ;;  %742 = vmatpush.bf16.msra.mxu2 %v723_v10 }
  0x25   : > { %394 = vmatpush.bf16.msra.mxu1 %v731_v11  ;;  %750 = vmatpush.bf16.msra.mxu3 %v731_v11 }
  0x28   : > { %376 = vmatpush.bf16.msra.mxu0 %v722_v12  ;;  %743 = vmatpush.bf16.msra.mxu2 %v722_v12 }
  0x29   : > { %395 = vmatpush.bf16.msra.mxu1 %v730_v13  ;;  %751 = vmatpush.bf16.msra.mxu3 %v730_v13 }
  0x2c   : > { %377 = vmatpush.bf16.msra.mxu0 %v721_v15  ;;  %744 = vmatpush.bf16.msra.mxu2 %v721_v15 }
  0x2d   : > { %396 = vmatpush.bf16.msra.mxu1 %v729_v18  ;;  %752 = vmatpush.bf16.msra.mxu3 %v729_v18 }
  0x2f   : > { %378 = vmatmul.bf16.vlgmr.msra.gmra.mxu0 %v636_v24  ;;  %383 = vmatmul.bf16.vlgmr.msra.gmra.mxu2 %v644_v25 }
  0x30   : > { %397 = vmatmul.bf16.vlgmr.msra.gmra.mxu1 %v640_v26  ;;  %402 = vmatmul.bf16.vlgmr.msra.gmra.mxu3 %v648_v27 }
  0xac   : > { %v379_v28 = vpop.f32.mrf.mxu0 }
  0xad   : > { %v398_v29 = vpop.f32.mrf.mxu1 }
  0xae   : > { %v890_v30 = vadd.f32 %v398_v29, %v379_v28 }
  0xb0   : > { %408 = vadd.xlane.f32.xlu0 %v890_v30  ;;  %v416_v31 = vmul.f32 %v890_v30, %v890_v30 }
  0xb2   : > { %420 = vadd.xlane.f32.xlu2 %v416_v31  ;;  %v384_v32 = vpop.f32.mrf.mxu2 }
  0xb3   : > { %v403_v33 = vpop.f32.mrf.mxu3 }
  0xb4   : > { %v895_v34 = vadd.f32 %v403_v33, %v384_v32  ;;  %v381_v35 = vpop.f32.mrf.mxu0 }
  0xb5   : > { %v400_v36 = vpop.f32.mrf.mxu1 }
  0xb6   : > { %v897_v37 = vadd.f32 %v400_v36, %v381_v35  ;;  %412 = vadd.xlane.f32.xlu1 %v895_v34  ;;  %v418_v42 = vmul.f32 %v895_v34, %v895_v34 }
  0xb8   : > { %410 = vadd.xlane.f32.xlu0 %v897_v37  ;;  %v417_v38 = vmul.f32 %v897_v37, %v897_v37 }
  0xba   : > { %422 = vadd.xlane.f32.xlu2 %v417_v38  ;;  %v386_v39 = vpop.f32.mrf.mxu2 }
  0xbb   : > { %v405_v40 = vpop.f32.mrf.mxu3 }
  0xbc   : > { %v903_v41 = vadd.f32 %v405_v40, %v386_v39 }
  0xbe   : > { %414 = vadd.xlane.f32.xlu1 %v903_v41  ;;  %v419_v43 = vmul.f32 %v903_v41, %v903_v41 }
  0xc0   : > { %424 = vadd.xlane.f32.xlu0 %v418_v42 }
  0xc6   : > { %426 = vadd.xlane.f32.xlu1 %v419_v43 }
 0x123   : > { %v409_v44 = vpop.xlane.xlu0 %408 }
 0x124   : > { %v428_v45 = vmul.f32 0.012345679, %v409_v44 }
 0x125   : > { %v421_v46 = vpop.xlane.xlu2 %420 }
 0x126   : > { %v436_v47 = vmul.f32 %v428_v45, %v428_v45  ;;  %v432_v48 = vmul.f32 0.012345679, %v421_v46  ;;  %v444_v13 = vsub.f32 %v890_v30, %v428_v45 }
 0x128   : > { %v440_v49 = vsub.f32 %v432_v48, %v436_v47 }
 0x129   : > { %v413_v50 = vpop.xlane.xlu1 %412 }
 0x12a   : > { %v448_v51 = vadd.f32 1e-05, %v440_v49  ;;  %v910_v57 = vmul.f32 0.012345679, %v413_v50 }
 0x12b   : > { %v411_v52 = vpop.xlane.xlu0 %410 }
 0x12c   : > { %777 = vrsqrt.f32 %v448_v51  ;;  %v429_v53 = vmul.f32 0.012345679, %v411_v52  ;;  %v438_v0 = vmul.f32 %v910_v57, %v910_v57  ;;  %vm458_vm0 = vweird.f32 %v448_v51 }
 0x12d   : > { %v423_v54 = vpop.xlane.xlu2 %422  ;;  %v446_v40 = vsub.f32 %v895_v34, %v910_v57 }
 0x12e   : > { %v433_v55 = vmul.f32 0.012345679, %v423_v54  ;;  %v437_v56 = vmul.f32 %v429_v53, %v429_v53  ;;  %v445_v28 = vsub.f32 %v897_v37, %v429_v53 }
 0x130   : > { %v441_v58 = vsub.f32 %v433_v55, %v437_v56 }
 0x131   : > { %v415_v59 = vpop.xlane.xlu1 %414 }
 0x132   : > { %v778_v60 = vpop.eup %777  ;;  %v449_v62 = vadd.f32 1e-05, %v441_v58  ;;  %v914_v3 = vmul.f32 0.012345679, %v415_v59 }
 0x133   : > { %v453_v61 = vmul.f32 %v778_v60, %v448_v51  ;;  %v425_v63 = vpop.xlane.xlu0 %424  ;;  %vm459_vm1 = vweird.f32 %v778_v60 }
 0x134   : > { %v434_v1 = vmul.f32 0.012345679, %v425_v63  ;;  %779 = vrsqrt.f32 %v449_v62  ;;  %v439_v9 = vmul.f32 %v914_v3, %v914_v3  ;;  %vm460_vm2 = vmor %vm458_vm0, %vm459_vm1  ;;  %vm468_vm4 = vweird.f32 %v449_v62 }
 0x135   : > { %v454_v2 = vmul.f32 %v778_v60, %v453_v61  ;;  %v447_v48 = vsub.f32 %v903_v41, %v914_v3 }
 0x136   : > { %v442_v4 = vsub.f32 %v434_v1, %v438_v0 }
 0x137   : > { %v455_v5 = vmul.f32 0.5, %v454_v2 }
 0x138   : > { %v450_v6 = vadd.f32 1e-05, %v442_v4 }
 0x139   : > { %v456_v7 = vsub.f32 1.5, %v455_v5  ;;  %v427_v8 = vpop.xlane.xlu1 %426 }
 0x13a   : > { %781 = vrsqrt.f32 %v450_v6  ;;  %v435_v10 = vmul.f32 0.012345679, %v427_v8  ;;  %v780_v11 = vpop.eup %779  ;;  %vm478_vm7 = vweird.f32 %v450_v6 }
 0x13b   : > { %v457_v12 = vmul.f32 %v778_v60, %v456_v7  ;;  %v463_v14 = vmul.f32 %v780_v11, %v449_v62  ;;  %vm469_vm3 = vweird.f32 %v780_v11 }
 0x13c   : > { %v443_v15 = vsub.f32 %v435_v10, %v439_v9  ;;  %vm470_vm5 = vmor %vm468_vm4, %vm469_vm3 }
 0x13d   : > { %v461_v16 = vsel %vm460_vm2, %v778_v60, %v457_v12  ;;  %v464_v18 = vmul.f32 %v780_v11, %v463_v14 }
 0x13e   : > { %v492_v17 = vmul.f32 %v461_v16, %v444_v13  ;;  %v451_v19 = vadd.f32 1e-05, %v443_v15 }
 0x13f   : > { %v465_v22 = vmul.f32 0.5, %v464_v18 }
 0x140   : > { %v782_v20 = vpop.eup %781  ;;  %v496_v21 = vmul.f32 0.2, %v492_v17  ;;  %783 = vrsqrt.f32 %v451_v19  ;;  %vm488_vm10 = vweird.f32 %v451_v19 }
 0x141   : > { %v473_v23 = vmul.f32 %v782_v20, %v450_v6  ;;  %v466_v25 = vsub.f32 1.5, %v465_v22  ;;  %vm479_vm6 = vweird.f32 %v782_v20 }
 0x142   : > { %v500_v24 = vmax.f32 %v492_v17, %v496_v21  ;;  %vm480_vm8 = vmor %vm478_vm7, %vm479_vm6 }
 0x143   : > { %v474_v26 = vmul.f32 %v782_v20, %v473_v23  ;;  %v467_v27 = vmul.f32 %v780_v11, %v466_v25 }
 0x144   : > { %504 = vst [vmem:[%s923_s8] sm:$0xff] %v500_v24 }
 0x145   : > { %v475_v29 = vmul.f32 0.5, %v474_v26  ;;  %v471_v31 = vsel %vm470_vm5, %v780_v11, %v467_v27 }
 0x146   : > { %v784_v30 = vpop.eup %783  ;;  %v493_v32 = vmul.f32 %v471_v31, %v445_v28 }
 0x147   : > { %v476_v33 = vsub.f32 1.5, %v475_v29  ;;  %v483_v35 = vmul.f32 %v784_v30, %v451_v19  ;;  %vm489_vm9 = vweird.f32 %v784_v30 }
 0x148   : > { %v497_v36 = vmul.f32 0.2, %v493_v32  ;;  %vm490_vm11 = vmor %vm488_vm10, %vm489_vm9 }
 0x149   : > { %v477_v38 = vmul.f32 %v782_v20, %v476_v33  ;;  %v484_v39 = vmul.f32 %v784_v30, %v483_v35 }
 0x14a   : > { %v501_v42 = vmax.f32 %v493_v32, %v497_v36 }
 0x14b   : > { %v481_v37 = vsel %vm480_vm8, %v782_v20, %v477_v38  ;;  %v485_v43 = vmul.f32 0.5, %v484_v39 }
 0x14c   : > { %v494_v44 = vmul.f32 %v481_v37, %v446_v40  ;;  %505 = vst [vmem:[%s923_s8 + $0x8] sm:$0xff] %v501_v42 }
 0x14d   : > { %v486_v45 = vsub.f32 1.5, %v485_v43 }
 0x14e   : > { %v498_v46 = vmul.f32 0.2, %v494_v44 }
 0x14f   : > { %v487_v47 = vmul.f32 %v784_v30, %v486_v45 }
 0x150   : > { %v502_v49 = vmax.f32 %v494_v44, %v498_v46 }
 0x151   : > { %v491_v50 = vsel %vm490_vm11, %v784_v30, %v487_v47 }
 0x152   : > { %506 = vst [vmem:[%s923_s8 + $0x10] sm:$0xff] %v502_v49  ;;  %v495_v34 = vmul.f32 %v491_v50, %v447_v48 }
 0x154   : > { %v499_v51 = vmul.f32 0.2, %v495_v34 }
 0x156   : > { %v503_v52 = vmax.f32 %v495_v34, %v499_v51 }
 0x158   : > { %507 = vst [vmem:[%s923_s8 + $0x18] sm:$0xff] %v503_v52 }
 0x159 PF: > { %s12_s11 = sadd.s32 1, %s807_s11   ;;  %s946_s9 = smov %s803_s10 }
 0x15a   : > { %p9_p5 = scmp.ge.s32.totalorder %s12_s11, 4   ;;  %s947_s10 = smov %s949_s12 }
 0x15c   :  { %11 = sbr.rel (!%p9_p5) target bundleno = 2 (0x2), region = 61 }

// kernel: _lambda_.7
= control target key start
LH: loop header
LB: loop body
LE: loop exit
PB: predicated region body
PF: predicated region fallthrough
CT: control target
= control target key end

     0   :  { %s1334_s9 = smov 0   ;;  %s1336_s10 = smov 0   ;;  %s1579_s0 = inlined_call_operand.vmem [shape: bf16[2,512,128], index: 0, kind: input, shape index: {}]   ;;  %s1580_s1 = inlined_call_operand.vmem [shape: bf16[64,512], index: 1, kind: input, shape index: {}]   ;;  %s1581_s2 = inlined_call_operand.vmem [shape: f32[2,64,128], index: 2, kind: output, shape index: {}]  }
   0x1   :  { %s1338_s11 = smov 0  }
   0x2 LB: > { %s31_s12 = sadd.s32 1, %s1313_s10  ;;  %p1006_p0 = scmp.ge.s32.totalorder %s1317_s11, 1  ;;  %s1317_s11 = sphi %s1338_s11, %s12_s11   ;;  %s1313_s10 = sphi %s1336_s10, %s1583_s10   ;;  %s1309_s9 = sphi %s1334_s9, %s1582_s9  }
   0x3   : > { %p33_p1 = scmp.ge.s32.totalorder %s31_s12, 2  ;;  %p152_p2 = scmp.lt.s32.totalorder %s1317_s11, 3 }
   0x5   : > { %s1585_s12 = smov (%p33_p1, %s31_s12), 0  ;;  %p153_p3 = pnand %p1006_p0, %p152_p2 }
   0x6   : > { %p190_p4 = scmp.lt.s32.totalorder (!%p153_p3), %s1309_s9, 1 }
   0x7   : > { %156 = sbr.rel (%p153_p3) target bundleno = 396 (0x18c), region = 28 }
   0xc   : > { %s1587_s9 = smov (!%p190_p4, %s1309_s9), 1  ;;  %v1013_v28 = vld [vmem:[%s1580_s1] sm:$0xf]  ;;  %v1209_v29 = vld [vmem:[%s1580_s1 + $0xc] sm:$0xf0] }
   0xd   : > { %s1205_s13 = sshll.u32 %s1587_s9, 8  ;;  %v1207_v30 = vld [vmem:[%s1580_s1 + $0x4] sm:$0xf]  ;;  %v1015_v35 = vld [vmem:[%s1580_s1 + $0x10] sm:$0xf0]  ;;  %v1014_v40 = vor.u32 %v1209_v29, %v1013_v28  ;;  %s1206_s5 = sshll.u32 %s1587_s9, 6 }
   0xe   : > { %s1358_s16 = scalar_lea.vmem %s1579_s0, %s1205_s13  ;;  %v1021_v36 = vld [vmem:[%s1580_s1 + $0x8] sm:$0xf]  ;;  %v1210_v37 = vld [vmem:[%s1580_s1 + $0x14] sm:$0xf0]  ;;  %v1208_v38 = vld [vmem:[%s1580_s1 + $0xc] sm:$0xf]  ;;  %v1018_v41 = vor.u32 %v1207_v30, %v1015_v35  ;;  %s1537_s8 = scalar_lea.vmem %s1581_s2, %s1206_s5 }
   0xf   : > { %v1230_v0 = vld [vmem:[%s1358_s16 + $0x38] sm:$0xff]  ;;  %v1229_v4 = vld [vmem:[%s1358_s16 + $0x30] sm:$0xff]  ;;  %v1228_v8 = vld [vmem:[%s1358_s16 + $0x28] sm:$0xff]  ;;  %v1022_v42 = vor.u32 %v1210_v37, %v1021_v36 }
  0x10   : > { %v1238_v1 = vld [vmem:[%s1358_s16 + $0x78] sm:$0xff]  ;;  %570 = vmatpush.bf16.msra.mxu0 %v1230_v0  ;;  %v1237_v5 = vld [vmem:[%s1358_s16 + $0x70] sm:$0xff]  ;;  %v1236_v9 = vld [vmem:[%s1358_s16 + $0x68] sm:$0xff] }
  0x11   : > { %v1246_v2 = vld [vmem:[%s1358_s16 + $0xb8] sm:$0xff]  ;;  %599 = vmatpush.bf16.msra.mxu1 %v1238_v1  ;;  %v1245_v6 = vld [vmem:[%s1358_s16 + $0xb0] sm:$0xff]  ;;  %v1244_v10 = vld [vmem:[%s1358_s16 + $0xa8] sm:$0xff] }
  0x12   : > { %v1254_v3 = vld [vmem:[%s1358_s16 + $0xf8] sm:$0xff]  ;;  %628 = vmatpush.bf16.msra.mxu2 %v1246_v2  ;;  %v1253_v7 = vld [vmem:[%s1358_s16 + $0xf0] sm:$0xff]  ;;  %v1252_v11 = vld [vmem:[%s1358_s16 + $0xe8] sm:$0xff] }
  0x13   : > { %657 = vmatpush.bf16.msra.mxu3 %v1254_v3  ;;  %v1227_v12 = vld [vmem:[%s1358_s16 + $0x20] sm:$0xff]  ;;  %v1226_v16 = vld [vmem:[%s1358_s16 + $0x18] sm:$0xff]  ;;  %v1225_v20 = vld [vmem:[%s1358_s16 + $0x10] sm:$0xff] }
  0x14   : > { %571 = vmatpush.bf16.msra.mxu0 %v1229_v4  ;;  %v1235_v13 = vld [vmem:[%s1358_s16 + $0x60] sm:$0xff]  ;;  %v1234_v17 = vld [vmem:[%s1358_s16 + $0x58] sm:$0xff]  ;;  %v1233_v21 = vld [vmem:[%s1358_s16 + $0x50] sm:$0xff] }
  0x15   : > { %600 = vmatpush.bf16.msra.mxu1 %v1237_v5  ;;  %v1243_v14 = vld [vmem:[%s1358_s16 + $0xa0] sm:$0xff]  ;;  %v1242_v18 = vld [vmem:[%s1358_s16 + $0x98] sm:$0xff]  ;;  %v1241_v22 = vld [vmem:[%s1358_s16 + $0x90] sm:$0xff] }
  0x16   : > { %629 = vmatpush.bf16.msra.mxu2 %v1245_v6  ;;  %v1251_v15 = vld [vmem:[%s1358_s16 + $0xe0] sm:$0xff]  ;;  %v1250_v19 = vld [vmem:[%s1358_s16 + $0xd8] sm:$0xff]  ;;  %v1249_v23 = vld [vmem:[%s1358_s16 + $0xd0] sm:$0xff] }
  0x17   : > { %658 = vmatpush.bf16.msra.mxu3 %v1253_v7  ;;  %v1224_v24 = vld [vmem:[%s1358_s16 + $0x8] sm:$0xff]  ;;  %v1223_v31 = vld [vmem:[%s1358_s16] sm:$0xff]  ;;  %v1023_v39 = vld [vmem:[%s1580_s1 + $0x18] sm:$0xf0] }
  0x18   : > { %572 = vmatpush.bf16.msra.mxu0 %v1228_v8  ;;  %v1232_v25 = vld [vmem:[%s1358_s16 + $0x48] sm:$0xff]  ;;  %v1231_v32 = vld [vmem:[%s1358_s16 + $0x40] sm:$0xff]  ;;  %v1026_v43 = vor.u32 %v1208_v38, %v1023_v39  ;;  %v1213_v45 = vld [vmem:[%s1580_s1 + $0x2c] sm:$0xf0] }
  0x19   : > { %601 = vmatpush.bf16.msra.mxu1 %v1236_v9  ;;  %v1240_v26 = vld [vmem:[%s1358_s16 + $0x88] sm:$0xff]  ;;  %v1239_v33 = vld [vmem:[%s1358_s16 + $0x80] sm:$0xff]  ;;  %v1031_v47 = vld [vmem:[%s1580_s1 + $0x30] sm:$0xf0] }
  0x1a   : > { %630 = vmatpush.bf16.msra.mxu2 %v1244_v10  ;;  %v1248_v27 = vld [vmem:[%s1358_s16 + $0xc8] sm:$0xff]  ;;  %v1247_v34 = vld [vmem:[%s1358_s16 + $0xc0] sm:$0xff]  ;;  %v1214_v49 = vld [vmem:[%s1580_s1 + $0x34] sm:$0xf0] }
  0x1b   : > { %659 = vmatpush.bf16.msra.mxu3 %v1252_v11  ;;  %v1029_v44 = vld [vmem:[%s1580_s1 + $0x20] sm:$0xf]  ;;  %v1211_v46 = vld [vmem:[%s1580_s1 + $0x24] sm:$0xf]  ;;  %v1037_v48 = vld [vmem:[%s1580_s1 + $0x28] sm:$0xf] }
  0x1c   : > { %573 = vmatpush.bf16.msra.mxu0 %v1227_v12  ;;  %v1212_v50 = vld [vmem:[%s1580_s1 + $0x2c] sm:$0xf]  ;;  %v1039_v51 = vld [vmem:[%s1580_s1 + $0x38] sm:$0xf0]  ;;  %v1030_v52 = vor.u32 %v1213_v45, %v1029_v44  ;;  %v1034_v53 = vor.u32 %v1211_v46, %v1031_v47  ;;  %v1038_v54 = vor.u32 %v1214_v49, %v1037_v48  ;;  %v1045_v56 = vld [vmem:[%s1580_s1 + $0x40] sm:$0xf] }
  0x1d   : > { %602 = vmatpush.bf16.msra.mxu1 %v1235_v13  ;;  %v1042_v55 = vor.u32 %v1212_v50, %v1039_v51  ;;  %v1217_v57 = vld [vmem:[%s1580_s1 + $0x4c] sm:$0xf0]  ;;  %v1215_v58 = vld [vmem:[%s1580_s1 + $0x44] sm:$0xf]  ;;  %v1047_v59 = vld [vmem:[%s1580_s1 + $0x50] sm:$0xf0] }
  0x1e   : > { %631 = vmatpush.bf16.msra.mxu2 %v1243_v14  ;;  %v1053_v60 = vld [vmem:[%s1580_s1 + $0x48] sm:$0xf]  ;;  %v1218_v61 = vld [vmem:[%s1580_s1 + $0x54] sm:$0xf0]  ;;  %v1216_v62 = vld [vmem:[%s1580_s1 + $0x4c] sm:$0xf]  ;;  %v1046_v0 = vor.u32 %v1217_v57, %v1045_v56  ;;  %v1050_v1 = vor.u32 %v1215_v58, %v1047_v59 }
  0x1f   : > { %660 = vmatpush.bf16.msra.mxu3 %v1251_v15  ;;  %v1055_v63 = vld [vmem:[%s1580_s1 + $0x58] sm:$0xf0]  ;;  %v1054_v2 = vor.u32 %v1218_v61, %v1053_v60  ;;  %v1061_v4 = vld [vmem:[%s1580_s1 + $0x60] sm:$0xf]  ;;  %v1221_v5 = vld [vmem:[%s1580_s1 + $0x6c] sm:$0xf0] }
  0x20   : > { %574 = vmatpush.bf16.msra.mxu0 %v1226_v16  ;;  %v1058_v3 = vor.u32 %v1216_v62, %v1055_v63  ;;  %v1219_v6 = vld [vmem:[%s1580_s1 + $0x64] sm:$0xf]  ;;  %v1063_v7 = vld [vmem:[%s1580_s1 + $0x70] sm:$0xf0]  ;;  %v1069_v8 = vld [vmem:[%s1580_s1 + $0x68] sm:$0xf]  ;;  %v1062_v12 = vor.u32 %v1221_v5, %v1061_v4 }
  0x21   : > { %603 = vmatpush.bf16.msra.mxu1 %v1234_v17  ;;  %v1222_v9 = vld [vmem:[%s1580_s1 + $0x74] sm:$0xf0]  ;;  %v1220_v10 = vld [vmem:[%s1580_s1 + $0x6c] sm:$0xf]  ;;  %v1071_v11 = vld [vmem:[%s1580_s1 + $0x78] sm:$0xf0]  ;;  %v1066_v13 = vor.u32 %v1219_v6, %v1063_v7 }
  0x22   : > { %632 = vmatpush.bf16.msra.mxu2 %v1242_v18  ;;  %v1070_v14 = vor.u32 %v1222_v9, %v1069_v8  ;;  %v1074_v15 = vor.u32 %v1220_v10, %v1071_v11 }
  0x23   : > { %661 = vmatpush.bf16.msra.mxu3 %v1250_v19 }
  0x24   : > { %575 = vmatpush.bf16.msra.mxu0 %v1225_v20 }
  0x25   : > { %604 = vmatpush.bf16.msra.mxu1 %v1233_v21 }
  0x26   : > { %633 = vmatpush.bf16.msra.mxu2 %v1241_v22 }
  0x27   : > { %662 = vmatpush.bf16.msra.mxu3 %v1249_v23 }
  0x28   : > { %576 = vmatpush.bf16.msra.mxu0 %v1224_v24 }
  0x29   : > { %605 = vmatpush.bf16.msra.mxu1 %v1232_v25 }
  0x2a   : > { %634 = vmatpush.bf16.msra.mxu2 %v1240_v26 }
  0x2b   : > { %663 = vmatpush.bf16.msra.mxu3 %v1248_v27 }
  0x2c   : > { %577 = vmatpush.bf16.msra.mxu0 %v1223_v31 }
  0x2d   : > { %606 = vmatpush.bf16.msra.mxu1 %v1231_v32 }
  0x2e   : > { %635 = vmatpush.bf16.msra.mxu2 %v1239_v33 }
  0x2f   : > { %664 = vmatpush.bf16.msra.mxu3 %v1247_v34  ;;  %578 = vmatmul.bf16.vlgmr.msra.gmra.mxu0 %v1014_v40 }
  0x30   : > { %607 = vmatmul.bf16.vlgmr.msra.gmra.mxu1 %v1018_v41 }
  0x31   : > { %636 = vmatmul.bf16.vlgmr.msra.gmra.mxu2 %v1022_v42 }
  0x32   : > { %665 = vmatmul.bf16.vlgmr.msra.gmra.mxu3 %v1026_v43 }
  0x3f   : > { %583 = vmatmul.bf16.gmra.mxu0 %v1030_v52 }
  0x40   : > { %612 = vmatmul.bf16.gmra.mxu1 %v1034_v53 }
  0x41   : > { %641 = vmatmul.bf16.gmra.mxu2 %v1038_v54 }
  0x42   : > { %670 = vmatmul.bf16.gmra.mxu3 %v1042_v55 }
  0x4f   : > { %588 = vmatmul.bf16.gmra.mxu0 %v1046_v0 }
  0x50   : > { %617 = vmatmul.bf16.gmra.mxu1 %v1050_v1 }
  0x51   : > { %646 = vmatmul.bf16.gmra.mxu2 %v1054_v2 }
  0x52   : > { %675 = vmatmul.bf16.gmra.mxu3 %v1058_v3 }
  0x5f   : > { %593 = vmatmul.bf16.gmra.mxu0 %v1062_v12 }
  0x60   : > { %622 = vmatmul.bf16.gmra.mxu1 %v1066_v13 }
  0x61   : > { %651 = vmatmul.bf16.gmra.mxu2 %v1070_v14 }
  0x62   : > { %680 = vmatmul.bf16.gmra.mxu3 %v1074_v15 }
  0xac   : > { %v579_v16 = vpop.f32.mrf.mxu0 }
  0xad   : > { %v608_v17 = vpop.f32.mrf.mxu1 }
  0xae   : > { %v609_v18 = vadd.f32 %v608_v17, %v579_v16 }
  0xb4   : > { %v637_v19 = vpop.f32.mrf.mxu2  ;;  %v581_v22 = vpop.f32.mrf.mxu0 }
  0xb5   : > { %v666_v20 = vpop.f32.mrf.mxu3  ;;  %v638_v21 = vadd.f32 %v637_v19, %v609_v18  ;;  %v610_v23 = vpop.f32.mrf.mxu1 }
  0xb6   : > { %v611_v26 = vadd.f32 %v610_v23, %v581_v22 }
  0xb7   : > { %v1488_v24 = vadd.f32 %v666_v20, %v638_v21 }
  0xb9   : > { %686 = vadd.xlane.f32.xlu0 %v1488_v24  ;;  %v702_v25 = vmul.f32 %v1488_v24, %v1488_v24 }
  0xbb   : > { %710 = vadd.xlane.f32.xlu2 %v702_v25 }
  0xbc   : > { %v639_v27 = vpop.f32.mrf.mxu2  ;;  %v584_v30 = vpop.f32.mrf.mxu0 }
  0xbd   : > { %v668_v28 = vpop.f32.mrf.mxu3  ;;  %v640_v29 = vadd.f32 %v639_v27, %v611_v26  ;;  %v613_v31 = vpop.f32.mrf.mxu1 }
  0xbe   : > { %v614_v33 = vadd.f32 %v613_v31, %v584_v30 }
  0xbf   : > { %v1493_v32 = vadd.f32 %v668_v28, %v640_v29 }
  0xc1   : > { %688 = vadd.xlane.f32.xlu0 %v1493_v32  ;;  %v703_v40 = vmul.f32 %v1493_v32, %v1493_v32 }
  0xc4   : > { %v642_v34 = vpop.f32.mrf.mxu2  ;;  %v586_v37 = vpop.f32.mrf.mxu0 }
  0xc5   : > { %v671_v35 = vpop.f32.mrf.mxu3  ;;  %v643_v36 = vadd.f32 %v642_v34, %v614_v33  ;;  %v615_v38 = vpop.f32.mrf.mxu1 }
  0xc6   : > { %v616_v41 = vadd.f32 %v615_v38, %v586_v37 }
  0xc7   : > { %v1496_v39 = vadd.f32 %v671_v35, %v643_v36 }
  0xc9   : > { %712 = vadd.xlane.f32.xlu0 %v703_v40  ;;  %690 = vadd.xlane.f32.xlu1 %v1496_v39  ;;  %v704_v48 = vmul.f32 %v1496_v39, %v1496_v39 }
  0xcc   : > { %v644_v42 = vpop.f32.mrf.mxu2  ;;  %v589_v45 = vpop.f32.mrf.mxu0 }
  0xcd   : > { %v673_v43 = vpop.f32.mrf.mxu3  ;;  %v645_v44 = vadd.f32 %v644_v42, %v616_v41  ;;  %v618_v46 = vpop.f32.mrf.mxu1 }
  0xce   : > { %v619_v49 = vadd.f32 %v618_v46, %v589_v45 }
  0xcf   : > { %v1501_v47 = vadd.f32 %v673_v43, %v645_v44 }
  0xd1   : > { %714 = vadd.xlane.f32.xlu1 %v704_v48  ;;  %v705_v50 = vmul.f32 %v1501_v47, %v1501_v47 }
  0xd3   : > { %716 = vadd.xlane.f32.xlu2 %v705_v50 }
  0xd4   : > { %v647_v51 = vpop.f32.mrf.mxu2  ;;  %v591_v54 = vpop.f32.mrf.mxu0 }
  0xd5   : > { %v676_v52 = vpop.f32.mrf.mxu3  ;;  %v648_v53 = vadd.f32 %v647_v51, %v619_v49  ;;  %v620_v55 = vpop.f32.mrf.mxu1 }
  0xd6   : > { %v621_v58 = vadd.f32 %v620_v55, %v591_v54 }
  0xd7   : > { %v1507_v56 = vadd.f32 %v676_v52, %v648_v53 }
  0xd9   : > { %692 = vadd.xlane.f32.xlu1 %v1501_v47  ;;  %v706_v57 = vmul.f32 %v1507_v56, %v1507_v56 }
  0xdb   : > { %694 = vadd.xlane.f32.xlu2 %v1507_v56  ;;  %718 = vadd.xlane.f32.xlu0 %v706_v57 }
  0xdc   : > { %v649_v59 = vpop.f32.mrf.mxu2  ;;  %v594_v62 = vpop.f32.mrf.mxu0 }
  0xdd   : > { %v678_v60 = vpop.f32.mrf.mxu3  ;;  %v650_v61 = vadd.f32 %v649_v59, %v621_v58  ;;  %v623_v63 = vpop.f32.mrf.mxu1 }
  0xde   : > { %v624_v1 = vadd.f32 %v623_v63, %v594_v62 }
  0xdf   : > { %v1513_v0 = vadd.f32 %v678_v60, %v650_v61 }
  0xe1   : > { %v707_v15 = vmul.f32 %v1513_v0, %v1513_v0 }
  0xe3   : > { %696 = vadd.xlane.f32.xlu2 %v1513_v0 }
  0xe4   : > { %v652_v2 = vpop.f32.mrf.mxu2  ;;  %v596_v6 = vpop.f32.mrf.mxu0 }
  0xe5   : > { %v681_v3 = vpop.f32.mrf.mxu3  ;;  %v653_v4 = vadd.f32 %v652_v2, %v624_v1  ;;  %v625_v7 = vpop.f32.mrf.mxu1 }
  0xe6   : > { %v626_v9 = vadd.f32 %v625_v7, %v596_v6 }
  0xe7   : > { %v1516_v5 = vadd.f32 %v681_v3, %v653_v4 }
  0xe9   : > { %698 = vadd.xlane.f32.xlu0 %v1516_v5  ;;  %v708_v8 = vmul.f32 %v1516_v5, %v1516_v5 }
  0xeb   : > { %722 = vadd.xlane.f32.xlu2 %v708_v8 }
  0xec   : > { %v654_v10 = vpop.f32.mrf.mxu2 }
  0xed   : > { %v655_v11 = vadd.f32 %v654_v10, %v626_v9  ;;  %v683_v12 = vpop.f32.mrf.mxu3 }
  0xef   : > { %v1521_v13 = vadd.f32 %v683_v12, %v655_v11 }
  0xf1   : > { %700 = vadd.xlane.f32.xlu1 %v1521_v13  ;;  %v709_v14 = vmul.f32 %v1521_v13, %v1521_v13 }
  0xf3   : > { %724 = vadd.xlane.f32.xlu0 %v709_v14 }
  0xf9   : > { %720 = vadd.xlane.f32.xlu1 %v707_v15 }
 0x12c   : > { %v687_v16 = vpop.xlane.xlu0 %686 }
 0x12d   : > { %v726_v17 = vmul.f32 0.04, %v687_v16 }
 0x12e   : > { %v711_v18 = vpop.xlane.xlu2 %710 }
 0x12f   : > { %v742_v19 = vmul.f32 %v726_v17, %v726_v17  ;;  %v734_v20 = vmul.f32 0.04, %v711_v18  ;;  %v758_v42 = vsub.f32 %v1488_v24, %v726_v17 }
 0x131   : > { %v750_v21 = vsub.f32 %v734_v20, %v742_v19 }
 0x133   : > { %v766_v22 = vadd.f32 1e-05, %v750_v21 }
 0x134   : > { %v689_v23 = vpop.xlane.xlu0 %688 }
 0x135   : > { %1279 = vrsqrt.f32 %v766_v22  ;;  %v727_v25 = vmul.f32 0.04, %v689_v23  ;;  %vm780_vm1 = vweird.f32 %v766_v22 }
 0x137   : > { %v743_v30 = vmul.f32 %v727_v25, %v727_v25  ;;  %v759_v9 = vsub.f32 %v1493_v32, %v727_v25 }
 0x13b   : > { %v1280_v26 = vpop.eup %1279 }
 0x13c   : > { %v775_v27 = vmul.f32 %v1280_v26, %v766_v22  ;;  %v713_v28 = vpop.xlane.xlu0 %712  ;;  %v691_v29 = vpop.xlane.xlu1 %690  ;;  %vm781_vm0 = vweird.f32 %v1280_v26 }
 0x13d   : > { %v735_v31 = vmul.f32 0.04, %v713_v28  ;;  %v1528_v37 = vmul.f32 0.04, %v691_v29  ;;  %vm782_vm2 = vmor %vm780_vm1, %vm781_vm0 }
 0x13e   : > { %v776_v33 = vmul.f32 %v1280_v26, %v775_v27 }
 0x13f   : > { %v751_v34 = vsub.f32 %v735_v31, %v743_v30  ;;  %v744_v43 = vmul.f32 %v1528_v37, %v1528_v37  ;;  %v760_v32 = vsub.f32 %v1496_v39, %v1528_v37 }
 0x140   : > { %v777_v35 = vmul.f32 0.5, %v776_v33 }
 0x141   : > { %v767_v36 = vadd.f32 1e-05, %v751_v34 }
 0x142   : > { %v778_v38 = vsub.f32 1.5, %v777_v35 }
 0x143   : > { %1281 = vrsqrt.f32 %v767_v36  ;;  %vm790_vm4 = vweird.f32 %v767_v36 }
 0x144   : > { %v779_v40 = vmul.f32 %v1280_v26, %v778_v38  ;;  %v715_v41 = vpop.xlane.xlu1 %714 }
 0x145   : > { %v736_v44 = vmul.f32 0.04, %v715_v41 }
 0x146   : > { %v783_v45 = vsel %vm782_vm2, %v1280_v26, %v779_v40  ;;  %v717_v46 = vpop.xlane.xlu2 %716 }
 0x147   : > { %v854_v48 = vmul.f32 %v783_v45, %v758_v42  ;;  %v752_v49 = vsub.f32 %v736_v44, %v744_v43  ;;  %v737_v61 = vmul.f32 0.04, %v717_v46 }
 0x149   : > { %v1282_v50 = vpop.eup %1281  ;;  %v862_v51 = vmul.f32 0.2, %v854_v48  ;;  %v768_v52 = vadd.f32 1e-05, %v752_v49 }
 0x14a   : > { %v785_v24 = vmul.f32 %v1282_v50, %v767_v36  ;;  %vm791_vm3 = vweird.f32 %v1282_v50 }
 0x14b   : > { %v870_v53 = vmax.f32 %v854_v48, %v862_v51  ;;  %1283 = vrsqrt.f32 %v768_v52  ;;  %vm792_vm5 = vmor %vm790_vm4, %vm791_vm3  ;;  %vm800_vm7 = vweird.f32 %v768_v52 }
 0x14c   : > { %v786_v54 = vmul.f32 %v1282_v50, %v785_v24  ;;  %v693_v55 = vpop.xlane.xlu1 %692 }
 0x14d   : > { %878 = vst [vmem:[%s1537_s8] sm:$0xff] %v870_v53  ;;  %v1540_v57 = vmul.f32 0.04, %v693_v55 }
 0x14e   : > { %v787_v58 = vmul.f32 0.5, %v786_v54  ;;  %v695_v59 = vpop.xlane.xlu2 %694  ;;  %v719_v60 = vpop.xlane.xlu0 %718 }
 0x14f   : > { %v745_v62 = vmul.f32 %v1540_v57, %v1540_v57  ;;  %v1544_v63 = vmul.f32 0.04, %v695_v59  ;;  %v738_v6 = vmul.f32 0.04, %v719_v60  ;;  %v761_v49 = vsub.f32 %v1501_v47, %v1540_v57 }
 0x150   : > { %v788_v1 = vsub.f32 1.5, %v787_v58 }
 0x151   : > { %v1284_v2 = vpop.eup %1283  ;;  %v753_v3 = vsub.f32 %v737_v61, %v745_v62  ;;  %v746_v4 = vmul.f32 %v1544_v63, %v1544_v63  ;;  %v762_v54 = vsub.f32 %v1507_v56, %v1544_v63 }
 0x152   : > { %v789_v7 = vmul.f32 %v1282_v50, %v788_v1  ;;  %v795_v8 = vmul.f32 %v1284_v2, %v768_v52  ;;  %vm801_vm6 = vweird.f32 %v1284_v2 }
 0x153   : > { %v769_v10 = vadd.f32 1e-05, %v753_v3  ;;  %v754_v11 = vsub.f32 %v738_v6, %v746_v4  ;;  %vm802_vm8 = vmor %vm800_vm7, %vm801_vm6 }
 0x154   : > { %v793_v12 = vsel %vm792_vm5, %v1282_v50, %v789_v7  ;;  %v796_v14 = vmul.f32 %v1284_v2, %v795_v8 }
 0x155   : > { %v855_v15 = vmul.f32 %v793_v12, %v759_v9  ;;  %1285 = vrsqrt.f32 %v769_v10  ;;  %v770_v16 = vadd.f32 1e-05, %v754_v11  ;;  %vm810_vm10 = vweird.f32 %v769_v10 }
 0x156   : > { %v797_v17 = vmul.f32 0.5, %v796_v14  ;;  %v697_v18 = vpop.xlane.xlu2 %696 }
 0x157   : > { %v863_v19 = vmul.f32 0.2, %v855_v15  ;;  %1287 = vrsqrt.f32 %v770_v16  ;;  %vm820_vm13 = vweird.f32 %v770_v16  ;;  %v731_v47 = vmul.f32 0.04, %v697_v18 }
 0x158   : > { %v798_v20 = vsub.f32 1.5, %v797_v17 }
 0x159   : > { %v871_v21 = vmax.f32 %v855_v15, %v863_v19  ;;  %v747_v8 = vmul.f32 %v731_v47, %v731_v47 }
 0x15a   : > { %v799_v22 = vmul.f32 %v1284_v2, %v798_v20 }
 0x15b   : > { %v1286_v23 = vpop.eup %1285  ;;  %879 = vst [vmem:[%s1537_s8 + $0x8] sm:$0xff] %v871_v21 }
 0x15c   : > { %v803_v25 = vsel %vm802_vm8, %v1284_v2, %v799_v22  ;;  %v805_v26 = vmul.f32 %v1286_v23, %v769_v10  ;;  %v699_v27 = vpop.xlane.xlu0 %698  ;;  %vm811_vm9 = vweird.f32 %v1286_v23 }
 0x15d   : > { %v1288_v28 = vpop.eup %1287  ;;  %v856_v29 = vmul.f32 %v803_v25, %v760_v32  ;;  %v1552_v30 = vmul.f32 0.04, %v699_v27  ;;  %vm812_vm12 = vmor %vm810_vm10, %vm811_vm9 }
 0x15e   : > { %v806_v31 = vmul.f32 %v1286_v23, %v805_v26  ;;  %v815_v33 = vmul.f32 %v1288_v28, %v770_v16  ;;  %v723_v34 = vpop.xlane.xlu2 %722  ;;  %vm821_vm11 = vweird.f32 %v1288_v28 }
 0x15f   : > { %v864_v35 = vmul.f32 0.2, %v856_v29  ;;  %v748_v36 = vmul.f32 %v1552_v30, %v1552_v30  ;;  %v740_v38 = vmul.f32 0.04, %v723_v34  ;;  %vm822_vm14 = vmor %vm820_vm13, %vm821_vm11  ;;  %v764_v17 = vsub.f32 %v1516_v5, %v1552_v30 }
 0x160   : > { %v807_v40 = vmul.f32 0.5, %v806_v31  ;;  %v816_v41 = vmul.f32 %v1288_v28, %v815_v33 }
 0x161   : > { %v872_v39 = vmax.f32 %v856_v29, %v864_v35  ;;  %v756_v37 = vsub.f32 %v740_v38, %v748_v36  ;;  %v763_v36 = vsub.f32 %v1513_v0, %v731_v47 }
 0x162   : > { %v808_v42 = vsub.f32 1.5, %v807_v40  ;;  %v817_v43 = vmul.f32 0.5, %v816_v41 }
 0x163   : > { %880 = vst [vmem:[%s1537_s8 + $0x10] sm:$0xff] %v872_v39  ;;  %v772_v44 = vadd.f32 1e-05, %v756_v37 }
 0x164   : > { %v809_v45 = vmul.f32 %v1286_v23, %v808_v42  ;;  %v818_v46 = vsub.f32 1.5, %v817_v43  ;;  %v701_v48 = vpop.xlane.xlu1 %700 }
 0x165   : > { %1289 = vrsqrt.f32 %v772_v44  ;;  %v733_v50 = vmul.f32 0.04, %v701_v48  ;;  %vm840_vm0 = vweird.f32 %v772_v44 }
 0x166   : > { %v813_v51 = vsel %vm812_vm12, %v1286_v23, %v809_v45  ;;  %v819_v52 = vmul.f32 %v1288_v28, %v818_v46  ;;  %v725_v24 = vpop.xlane.xlu0 %724 }
 0x167   : > { %v857_v53 = vmul.f32 %v813_v51, %v761_v49  ;;  %v749_v55 = vmul.f32 %v733_v50, %v733_v50  ;;  %v741_v58 = vmul.f32 0.04, %v725_v24  ;;  %v765_v29 = vsub.f32 %v1521_v13, %v733_v50 }
 0x168   : > { %v823_v59 = vsel %vm822_vm14, %v1288_v28, %v819_v52 }
 0x169   : > { %v865_v60 = vmul.f32 0.2, %v857_v53  ;;  %v858_v61 = vmul.f32 %v823_v59, %v762_v54  ;;  %v757_v57 = vsub.f32 %v741_v58, %v749_v55 }
 0x16b   : > { %v1290_v62 = vpop.eup %1289  ;;  %v873_v1 = vmax.f32 %v857_v53, %v865_v60  ;;  %v866_v2 = vmul.f32 0.2, %v858_v61  ;;  %v773_v3 = vadd.f32 1e-05, %v757_v57 }
 0x16c   : > { %v835_v4 = vmul.f32 %v1290_v62, %v772_v44  ;;  %v721_v6 = vpop.xlane.xlu1 %720  ;;  %vm841_vm15 = vweird.f32 %v1290_v62 }
 0x16d   : > { %881 = vst [vmem:[%s1537_s8 + $0x18] sm:$0xff] %v873_v1  ;;  %v874_v7 = vmax.f32 %v858_v61, %v866_v2  ;;  %1291 = vrsqrt.f32 %v773_v3  ;;  %v739_v56 = vmul.f32 0.04, %v721_v6  ;;  %vm842_vm1 = vmor %vm840_vm0, %vm841_vm15  ;;  %vm850_vm3 = vweird.f32 %v773_v3 }
 0x16e   : > { %v836_v63 = vmul.f32 %v1290_v62, %v835_v4 }
 0x16f   : > { %882 = vst [vmem:[%s1537_s8 + $0x20] sm:$0xff] %v874_v7  ;;  %v755_v9 = vsub.f32 %v739_v56, %v747_v8 }
 0x170   : > { %v837_v10 = vmul.f32 0.5, %v836_v63 }
 0x171   : > { %v771_v11 = vadd.f32 1e-05, %v755_v9 }
 0x172   : > { %v838_v12 = vsub.f32 1.5, %v837_v10 }
 0x173   : > { %v1292_v14 = vpop.eup %1291  ;;  %1293 = vrsqrt.f32 %v771_v11  ;;  %vm830_vm6 = vweird.f32 %v771_v11 }
 0x174   : > { %v839_v15 = vmul.f32 %v1290_v62, %v838_v12  ;;  %v845_v16 = vmul.f32 %v1292_v14, %v773_v3  ;;  %vm851_vm2 = vweird.f32 %v1292_v14 }
 0x175   : > { %vm852_vm4 = vmor %vm850_vm3, %vm851_vm2 }
 0x176   : > { %v843_v18 = vsel %vm842_vm1, %v1290_v62, %v839_v15  ;;  %v846_v19 = vmul.f32 %v1292_v14, %v845_v16 }
 0x177   : > { %v860_v20 = vmul.f32 %v843_v18, %v764_v17 }
 0x178   : > { %v847_v21 = vmul.f32 0.5, %v846_v19 }
 0x179   : > { %v1294_v22 = vpop.eup %1293  ;;  %v868_v23 = vmul.f32 0.2, %v860_v20 }
 0x17a   : > { %v848_v32 = vsub.f32 1.5, %v847_v21  ;;  %v825_v25 = vmul.f32 %v1294_v22, %v771_v11  ;;  %vm831_vm5 = vweird.f32 %v1294_v22 }
 0x17b   : > { %v876_v26 = vmax.f32 %v860_v20, %v868_v23  ;;  %vm832_vm7 = vmor %vm830_vm6, %vm831_vm5 }
 0x17c   : > { %v849_v27 = vmul.f32 %v1292_v14, %v848_v32  ;;  %v826_v28 = vmul.f32 %v1294_v22, %v825_v25 }
 0x17d   : > { %884 = vst [vmem:[%s1537_s8 + $0x30] sm:$0xff] %v876_v26 }
 0x17e   : > { %v853_v5 = vsel %vm852_vm4, %v1292_v14, %v849_v27  ;;  %v827_v30 = vmul.f32 0.5, %v826_v28 }
 0x17f   : > { %v861_v31 = vmul.f32 %v853_v5, %v765_v29 }
 0x180   : > { %v828_v33 = vsub.f32 1.5, %v827_v30 }
 0x181   : > { %v869_v34 = vmul.f32 0.2, %v861_v31 }
 0x182   : > { %v829_v35 = vmul.f32 %v1294_v22, %v828_v33 }
 0x183   : > { %v877_v38 = vmax.f32 %v861_v31, %v869_v34 }
 0x184   : > { %v833_v40 = vsel %vm832_vm7, %v1294_v22, %v829_v35 }
 0x185   : > { %885 = vst [vmem:[%s1537_s8 + $0x38] sm:$0xff] %v877_v38  ;;  %v859_v41 = vmul.f32 %v833_v40, %v763_v36 }
 0x187   : > { %v867_v39 = vmul.f32 0.2, %v859_v41 }
 0x189   : > { %v875_v37 = vmax.f32 %v859_v41, %v867_v39 }
 0x18b   : > { %883 = vst [vmem:[%s1537_s8 + $0x28] sm:$0xff] %v875_v37 }
 0x18c PF: > { %s12_s11 = sadd.s32 1, %s1317_s11   ;;  %s1582_s9 = smov %s1313_s10 }
 0x18d   : > { %p9_p5 = scmp.ge.s32.totalorder %s12_s11, 4   ;;  %s1583_s10 = smov %s1585_s12 }
 0x18f   :  { %11 = sbr.rel (!%p9_p5) target bundleno = 2 (0x2), region = 61 }

// kernel: _lambda_.8
= control target key start
LH: loop header
LB: loop body
LE: loop exit
PB: predicated region body
PF: predicated region fallthrough
CT: control target
= control target key end

     0   :  { %s2770_s9 = smov 0   ;;  %s2772_s10 = smov 0   ;;  %s3474_s0 = inlined_call_operand.vmem [shape: bf16[2,1024,128], index: 0, kind: input, shape index: {}]   ;;  %s3475_s1 = inlined_call_operand.vmem [shape: bf16[128,1024], index: 1, kind: input, shape index: {}]   ;;  %s3476_s2 = inlined_call_operand.vmem [shape: f32[2,128,128], index: 2, kind: output, shape index: {}]  }
   0x1   :  { %s2774_s11 = smov 0  }
   0x2 LB: > { %s31_s12 = sadd.s32 1, %s2749_s10  ;;  %p2026_p0 = scmp.ge.s32.totalorder %s2753_s11, 1  ;;  %s2753_s11 = sphi %s2774_s11, %s12_s11   ;;  %s2749_s10 = sphi %s2772_s10, %s3478_s10   ;;  %s2745_s9 = sphi %s2770_s9, %s3477_s9  }
   0x3   : > { %p33_p1 = scmp.ge.s32.totalorder %s31_s12, 2  ;;  %p152_p2 = scmp.lt.s32.totalorder %s2753_s11, 3 }
   0x5   : > { %s3480_s12 = smov (%p33_p1, %s31_s12), 0  ;;  %p153_p3 = pnand %p2026_p0, %p152_p2 }
   0x6   : > { %p190_p4 = scmp.lt.s32.totalorder (!%p153_p3), %s2745_s9, 1 }
   0x7   : > { %156 = sbr.rel (%p153_p3) target bundleno = 588 (0x24c), region = 28 }
   0xc   : > { %s3482_s9 = smov (!%p190_p4, %s2745_s9), 1  ;;  %v2033_v28 = vld [vmem:[%s3475_s1] sm:$0xf]  ;;  %v2547_v30 = vld [vmem:[%s3475_s1 + $0x4] sm:$0xf] }
   0xd   : > { %s2545_s13 = sshll.u32 %s3482_s9, 9  ;;  %v2551_v29 = vld [vmem:[%s3475_s1 + $0x1c] sm:$0xf0]  ;;  %v2035_v35 = vld [vmem:[%s3475_s1 + $0x20] sm:$0xf0]  ;;  %s2546_s8 = sshll.u32 %s3482_s9, 7 }
   0xe   : > { %s2794_s16 = scalar_lea.vmem %s3474_s0, %s2545_s13  ;;  %v2041_v36 = vld [vmem:[%s3475_s1 + $0x8] sm:$0xf]  ;;  %v2548_v38 = vld [vmem:[%s3475_s1 + $0xc] sm:$0xf]  ;;  %v2034_v42 = vor.u32 %v2551_v29, %v2033_v28  ;;  %v2038_v43 = vor.u32 %v2547_v30, %v2035_v35  ;;  %v2065_v56 = vld [vmem:[%s3475_s1 + $0x40] sm:$0xf]  ;;  %s3383_s15 = scalar_lea.vmem %s3476_s2, %s2546_s8 }
   0xf   : > { %v2618_v0 = vld [vmem:[%s2794_s16 + $0x38] sm:$0xff]  ;;  %v2617_v4 = vld [vmem:[%s2794_s16 + $0x30] sm:$0xff]  ;;  %v2616_v8 = vld [vmem:[%s2794_s16 + $0x28] sm:$0xff] }
  0x10   : > { %v2626_v1 = vld [vmem:[%s2794_s16 + $0x78] sm:$0xff]  ;;  %1114 = vmatpush.bf16.msra.mxu0 %v2618_v0  ;;  %v2625_v5 = vld [vmem:[%s2794_s16 + $0x70] sm:$0xff]  ;;  %v2624_v9 = vld [vmem:[%s2794_s16 + $0x68] sm:$0xff] }
  0x11   : > { %v2634_v2 = vld [vmem:[%s2794_s16 + $0xb8] sm:$0xff]  ;;  %1163 = vmatpush.bf16.msra.mxu1 %v2626_v1  ;;  %v2633_v6 = vld [vmem:[%s2794_s16 + $0xb0] sm:$0xff]  ;;  %v2632_v10 = vld [vmem:[%s2794_s16 + $0xa8] sm:$0xff] }
  0x12   : > { %v2642_v3 = vld [vmem:[%s2794_s16 + $0xf8] sm:$0xff]  ;;  %1212 = vmatpush.bf16.msra.mxu2 %v2634_v2  ;;  %v2641_v7 = vld [vmem:[%s2794_s16 + $0xf0] sm:$0xff]  ;;  %v2640_v11 = vld [vmem:[%s2794_s16 + $0xe8] sm:$0xff] }
  0x13   : > { %1261 = vmatpush.bf16.msra.mxu3 %v2642_v3  ;;  %v2615_v12 = vld [vmem:[%s2794_s16 + $0x20] sm:$0xff]  ;;  %v2614_v16 = vld [vmem:[%s2794_s16 + $0x18] sm:$0xff]  ;;  %v2613_v20 = vld [vmem:[%s2794_s16 + $0x10] sm:$0xff] }
  0x14   : > { %1115 = vmatpush.bf16.msra.mxu0 %v2617_v4  ;;  %v2623_v13 = vld [vmem:[%s2794_s16 + $0x60] sm:$0xff]  ;;  %v2622_v17 = vld [vmem:[%s2794_s16 + $0x58] sm:$0xff]  ;;  %v2621_v21 = vld [vmem:[%s2794_s16 + $0x50] sm:$0xff] }
  0x15   : > { %1164 = vmatpush.bf16.msra.mxu1 %v2625_v5  ;;  %v2631_v14 = vld [vmem:[%s2794_s16 + $0xa0] sm:$0xff]  ;;  %v2630_v18 = vld [vmem:[%s2794_s16 + $0x98] sm:$0xff]  ;;  %v2629_v22 = vld [vmem:[%s2794_s16 + $0x90] sm:$0xff] }
  0x16   : > { %1213 = vmatpush.bf16.msra.mxu2 %v2633_v6  ;;  %v2639_v15 = vld [vmem:[%s2794_s16 + $0xe0] sm:$0xff]  ;;  %v2638_v19 = vld [vmem:[%s2794_s16 + $0xd8] sm:$0xff]  ;;  %v2637_v23 = vld [vmem:[%s2794_s16 + $0xd0] sm:$0xff] }
  0x17   : > { %1262 = vmatpush.bf16.msra.mxu3 %v2641_v7  ;;  %v2612_v24 = vld [vmem:[%s2794_s16 + $0x8] sm:$0xff]  ;;  %v2611_v31 = vld [vmem:[%s2794_s16] sm:$0xff]  ;;  %v2666_v40 = vld [vmem:[%s2794_s16 + $0x1b8] sm:$0xff] }
  0x18   : > { %1116 = vmatpush.bf16.msra.mxu0 %v2616_v8  ;;  %v2620_v25 = vld [vmem:[%s2794_s16 + $0x48] sm:$0xff]  ;;  %v2619_v32 = vld [vmem:[%s2794_s16 + $0x40] sm:$0xff]  ;;  %v2650_v41 = vld [vmem:[%s2794_s16 + $0x138] sm:$0xff] }
  0x19   : > { %1165 = vmatpush.bf16.msra.mxu1 %v2624_v9  ;;  %v2628_v26 = vld [vmem:[%s2794_s16 + $0x88] sm:$0xff]  ;;  %v2627_v33 = vld [vmem:[%s2794_s16 + $0x80] sm:$0xff]  ;;  %v2674_v46 = vld [vmem:[%s2794_s16 + $0x1f8] sm:$0xff] }
  0x1a   : > { %1214 = vmatpush.bf16.msra.mxu2 %v2632_v10  ;;  %v2636_v27 = vld [vmem:[%s2794_s16 + $0xc8] sm:$0xff]  ;;  %v2635_v34 = vld [vmem:[%s2794_s16 + $0xc0] sm:$0xff]  ;;  %v2658_v47 = vld [vmem:[%s2794_s16 + $0x178] sm:$0xff] }
  0x1b   : > { %1263 = vmatpush.bf16.msra.mxu3 %v2640_v11  ;;  %v2552_v37 = vld [vmem:[%s3475_s1 + $0x24] sm:$0xf0]  ;;  %v2043_v39 = vld [vmem:[%s3475_s1 + $0x28] sm:$0xf0]  ;;  %v2665_v48 = vld [vmem:[%s2794_s16 + $0x1b0] sm:$0xff] }
  0x1c   : > { %1117 = vmatpush.bf16.msra.mxu0 %v2615_v12  ;;  %v2042_v44 = vor.u32 %v2552_v37, %v2041_v36  ;;  %v2046_v45 = vor.u32 %v2548_v38, %v2043_v39  ;;  %v2649_v49 = vld [vmem:[%s2794_s16 + $0x130] sm:$0xff]  ;;  %v2664_v52 = vld [vmem:[%s2794_s16 + $0x1a8] sm:$0xff]  ;;  %v2559_v57 = vld [vmem:[%s3475_s1 + $0x5c] sm:$0xf0] }
  0x1d   : > { %1166 = vmatpush.bf16.msra.mxu1 %v2623_v13  ;;  %v2673_v50 = vld [vmem:[%s2794_s16 + $0x1f0] sm:$0xff]  ;;  %v2648_v53 = vld [vmem:[%s2794_s16 + $0x128] sm:$0xff]  ;;  %v2555_v58 = vld [vmem:[%s3475_s1 + $0x44] sm:$0xf]  ;;  %v2066_v0 = vor.u32 %v2559_v57, %v2065_v56 }
  0x1e   : > { %1215 = vmatpush.bf16.msra.mxu2 %v2631_v14  ;;  %v2657_v51 = vld [vmem:[%s2794_s16 + $0x170] sm:$0xff]  ;;  %v2672_v54 = vld [vmem:[%s2794_s16 + $0x1e8] sm:$0xff]  ;;  %v2067_v59 = vld [vmem:[%s3475_s1 + $0x60] sm:$0xf0] }
  0x1f   : > { %1264 = vmatpush.bf16.msra.mxu3 %v2639_v15  ;;  %v2656_v55 = vld [vmem:[%s2794_s16 + $0x168] sm:$0xff]  ;;  %v2070_v1 = vor.u32 %v2555_v58, %v2067_v59  ;;  %v2663_v4 = vld [vmem:[%s2794_s16 + $0x1a0] sm:$0xff]  ;;  %v2661_v36 = vld [vmem:[%s2794_s16 + $0x190] sm:$0xff] }
  0x20   : > { %1118 = vmatpush.bf16.msra.mxu0 %v2614_v16  ;;  %v2073_v60 = vld [vmem:[%s3475_s1 + $0x48] sm:$0xf]  ;;  %v2556_v62 = vld [vmem:[%s3475_s1 + $0x4c] sm:$0xf]  ;;  %v2647_v5 = vld [vmem:[%s2794_s16 + $0x120] sm:$0xff] }
  0x21   : > { %1167 = vmatpush.bf16.msra.mxu1 %v2622_v17  ;;  %v2560_v61 = vld [vmem:[%s3475_s1 + $0x64] sm:$0xf0]  ;;  %v2075_v63 = vld [vmem:[%s3475_s1 + $0x68] sm:$0xf0]  ;;  %v2671_v6 = vld [vmem:[%s2794_s16 + $0x1e0] sm:$0xff] }
  0x22   : > { %1216 = vmatpush.bf16.msra.mxu2 %v2630_v18  ;;  %v2074_v2 = vor.u32 %v2560_v61, %v2073_v60  ;;  %v2078_v3 = vor.u32 %v2556_v62, %v2075_v63  ;;  %v2655_v7 = vld [vmem:[%s2794_s16 + $0x160] sm:$0xff]  ;;  %v2105_v12 = vld [vmem:[%s3475_s1 + $0x88] sm:$0xf]  ;;  %v2564_v14 = vld [vmem:[%s3475_s1 + $0x8c] sm:$0xf] }
  0x23   : > { %1265 = vmatpush.bf16.msra.mxu3 %v2638_v19  ;;  %v2097_v8 = vld [vmem:[%s3475_s1 + $0x80] sm:$0xf]  ;;  %v2563_v10 = vld [vmem:[%s3475_s1 + $0x84] sm:$0xf]  ;;  %v2568_v13 = vld [vmem:[%s3475_s1 + $0xa4] sm:$0xf0] }
  0x24   : > { %1119 = vmatpush.bf16.msra.mxu0 %v2613_v20  ;;  %v2567_v9 = vld [vmem:[%s3475_s1 + $0x9c] sm:$0xf0]  ;;  %v2099_v11 = vld [vmem:[%s3475_s1 + $0xa0] sm:$0xf0]  ;;  %v2107_v15 = vld [vmem:[%s3475_s1 + $0xa8] sm:$0xf0]  ;;  %v2106_v18 = vor.u32 %v2568_v13, %v2105_v12 }
  0x25   : > { %1168 = vmatpush.bf16.msra.mxu1 %v2621_v21  ;;  %v2098_v16 = vor.u32 %v2567_v9, %v2097_v8  ;;  %v2102_v17 = vor.u32 %v2563_v10, %v2099_v11  ;;  %v2110_v19 = vor.u32 %v2564_v14, %v2107_v15  ;;  %v2662_v20 = vld [vmem:[%s2794_s16 + $0x198] sm:$0xff]  ;;  %v2137_v28 = vld [vmem:[%s3475_s1 + $0xc8] sm:$0xf]  ;;  %v2572_v30 = vld [vmem:[%s3475_s1 + $0xcc] sm:$0xf] }
  0x26   : > { %1217 = vmatpush.bf16.msra.mxu2 %v2629_v22  ;;  %v2646_v21 = vld [vmem:[%s2794_s16 + $0x118] sm:$0xff]  ;;  %v2576_v29 = vld [vmem:[%s3475_s1 + $0xe4] sm:$0xf0]  ;;  %v2645_v37 = vld [vmem:[%s2794_s16 + $0x110] sm:$0xff] }
  0x27   : > { %1266 = vmatpush.bf16.msra.mxu3 %v2637_v23  ;;  %v2670_v22 = vld [vmem:[%s2794_s16 + $0x1d8] sm:$0xff]  ;;  %v2669_v38 = vld [vmem:[%s2794_s16 + $0x1d0] sm:$0xff]  ;;  %v2193_v56 = vld [vmem:[%s3475_s1 + $0x140] sm:$0xf] }
  0x28   : > { %1120 = vmatpush.bf16.msra.mxu0 %v2612_v24  ;;  %v2654_v23 = vld [vmem:[%s2794_s16 + $0x158] sm:$0xff]  ;;  %v2129_v24 = vld [vmem:[%s3475_s1 + $0xc0] sm:$0xf]  ;;  %v2653_v39 = vld [vmem:[%s2794_s16 + $0x150] sm:$0xff] }
  0x29   : > { %1169 = vmatpush.bf16.msra.mxu1 %v2620_v25  ;;  %v2575_v25 = vld [vmem:[%s3475_s1 + $0xdc] sm:$0xf0]  ;;  %v2587_v58 = vld [vmem:[%s3475_s1 + $0x144] sm:$0xf]  ;;  %v2201_v60 = vld [vmem:[%s3475_s1 + $0x148] sm:$0xf] }
  0x2a   : > { %1218 = vmatpush.bf16.msra.mxu2 %v2628_v26  ;;  %v2571_v26 = vld [vmem:[%s3475_s1 + $0xc4] sm:$0xf]  ;;  %v2591_v57 = vld [vmem:[%s3475_s1 + $0x15c] sm:$0xf0]  ;;  %v2592_v61 = vld [vmem:[%s3475_s1 + $0x164] sm:$0xf0] }
  0x2b   : > { %1267 = vmatpush.bf16.msra.mxu3 %v2636_v27  ;;  %v2131_v27 = vld [vmem:[%s3475_s1 + $0xe0] sm:$0xf0]  ;;  %v2588_v62 = vld [vmem:[%s3475_s1 + $0x14c] sm:$0xf]  ;;  %v2225_v8 = vld [vmem:[%s3475_s1 + $0x180] sm:$0xf] }
  0x2c   : > { %1121 = vmatpush.bf16.msra.mxu0 %v2611_v31  ;;  %v2139_v31 = vld [vmem:[%s3475_s1 + $0xe8] sm:$0xf0]  ;;  %v2195_v59 = vld [vmem:[%s3475_s1 + $0x160] sm:$0xf0]  ;;  %v2599_v9 = vld [vmem:[%s3475_s1 + $0x19c] sm:$0xf0] }
  0x2d   : > { %1170 = vmatpush.bf16.msra.mxu1 %v2619_v32  ;;  %v2130_v32 = vor.u32 %v2575_v25, %v2129_v24  ;;  %v2142_v35 = vor.u32 %v2572_v30, %v2139_v31  ;;  %v2203_v63 = vld [vmem:[%s3475_s1 + $0x168] sm:$0xf0]  ;;  %v2595_v10 = vld [vmem:[%s3475_s1 + $0x184] sm:$0xf]  ;;  %v2233_v12 = vld [vmem:[%s3475_s1 + $0x188] sm:$0xf] }
  0x2e   : > { %1219 = vmatpush.bf16.msra.mxu2 %v2627_v33  ;;  %v2134_v33 = vor.u32 %v2571_v26, %v2131_v27  ;;  %v2227_v11 = vld [vmem:[%s3475_s1 + $0x1a0] sm:$0xf0]  ;;  %v2600_v13 = vld [vmem:[%s3475_s1 + $0x1a4] sm:$0xf0]  ;;  %v2596_v14 = vld [vmem:[%s3475_s1 + $0x18c] sm:$0xf] }
  0x2f   : > { %1268 = vmatpush.bf16.msra.mxu3 %v2635_v34  ;;  %1122 = vmatmul.bf16.vlgmr.msra.gmra.mxu0 %v2034_v42  ;;  %v2138_v34 = vor.u32 %v2576_v29, %v2137_v28  ;;  %v2579_v42 = vld [vmem:[%s3475_s1 + $0x104] sm:$0xf]  ;;  %v2235_v15 = vld [vmem:[%s3475_s1 + $0x1a8] sm:$0xf0]  ;;  %v2265_v24 = vld [vmem:[%s3475_s1 + $0x1c8] sm:$0xf] }
  0x30   : > { %1310 = vmatpush.bf16.msrb.mxu0 %v2650_v41  ;;  %1171 = vmatmul.bf16.vlgmr.msra.gmra.mxu1 %v2038_v43  ;;  %v2583_v41 = vld [vmem:[%s3475_s1 + $0x11c] sm:$0xf0]  ;;  %v2163_v43 = vld [vmem:[%s3475_s1 + $0x120] sm:$0xf0]  ;;  %v2608_v25 = vld [vmem:[%s3475_s1 + $0x1e4] sm:$0xf0] }
  0x31   : > { %1220 = vmatmul.bf16.vlgmr.msra.gmra.mxu2 %v2042_v44  ;;  %1359 = vmatpush.bf16.msrb.mxu1 %v2658_v47  ;;  %v2169_v44 = vld [vmem:[%s3475_s1 + $0x108] sm:$0xf]  ;;  %v2171_v47 = vld [vmem:[%s3475_s1 + $0x128] sm:$0xf0]  ;;  %v2266_v30 = vor.u32 %v2608_v25, %v2265_v24 }
  0x32   : > { %1408 = vmatpush.bf16.msrb.mxu2 %v2666_v40  ;;  %1269 = vmatmul.bf16.vlgmr.msra.gmra.mxu3 %v2046_v45  ;;  %v2161_v40 = vld [vmem:[%s3475_s1 + $0x100] sm:$0xf]  ;;  %v2584_v45 = vld [vmem:[%s3475_s1 + $0x124] sm:$0xf0]  ;;  %v2604_v26 = vld [vmem:[%s3475_s1 + $0x1cc] sm:$0xf] }
  0x33   : > { %1457 = vmatpush.bf16.msrb.mxu3 %v2674_v46  ;;  %v2580_v46 = vld [vmem:[%s3475_s1 + $0x10c] sm:$0xf] }
  0x34   : > { %1311 = vmatpush.bf16.msrb.mxu0 %v2649_v49  ;;  %v2166_v49 = vor.u32 %v2579_v42, %v2163_v43  ;;  %v2267_v27 = vld [vmem:[%s3475_s1 + $0x1e8] sm:$0xf0] }
  0x35   : > { %1360 = vmatpush.bf16.msrb.mxu1 %v2657_v51  ;;  %v2174_v51 = vor.u32 %v2580_v46, %v2171_v47  ;;  %v2270_v31 = vor.u32 %v2604_v26, %v2267_v27 }
  0x36   : > { %1409 = vmatpush.bf16.msrb.mxu2 %v2665_v48  ;;  %v2162_v48 = vor.u32 %v2583_v41, %v2161_v40 }
  0x37   : > { %1458 = vmatpush.bf16.msrb.mxu3 %v2673_v50  ;;  %v2170_v50 = vor.u32 %v2584_v45, %v2169_v44 }
  0x38   : > { %1312 = vmatpush.bf16.msrb.mxu0 %v2648_v53  ;;  %v2644_v53 = vld [vmem:[%s2794_s16 + $0x108] sm:$0xff] }
  0x39   : > { %1361 = vmatpush.bf16.msrb.mxu1 %v2656_v55  ;;  %v2652_v55 = vld [vmem:[%s2794_s16 + $0x148] sm:$0xff] }
  0x3a   : > { %1410 = vmatpush.bf16.msrb.mxu2 %v2664_v52  ;;  %v2660_v52 = vld [vmem:[%s2794_s16 + $0x188] sm:$0xff] }
  0x3b   : > { %1459 = vmatpush.bf16.msrb.mxu3 %v2672_v54  ;;  %v2668_v54 = vld [vmem:[%s2794_s16 + $0x1c8] sm:$0xff] }
  0x3c   : > { %1313 = vmatpush.bf16.msrb.mxu0 %v2647_v5  ;;  %v2643_v5 = vld [vmem:[%s2794_s16 + $0x100] sm:$0xff] }
  0x3d   : > { %1362 = vmatpush.bf16.msrb.mxu1 %v2655_v7  ;;  %v2651_v7 = vld [vmem:[%s2794_s16 + $0x140] sm:$0xff] }
  0x3e   : > { %1411 = vmatpush.bf16.msrb.mxu2 %v2663_v4  ;;  %v2659_v4 = vld [vmem:[%s2794_s16 + $0x180] sm:$0xff] }
  0x3f   : > { %1127 = vmatmul.bf16.gmra.mxu0 %v2066_v0  ;;  %1460 = vmatpush.bf16.msrb.mxu3 %v2671_v6  ;;  %v2194_v0 = vor.u32 %v2591_v57, %v2193_v56  ;;  %v2667_v6 = vld [vmem:[%s2794_s16 + $0x1c0] sm:$0xff]  ;;  %v2557_v56 = vld [vmem:[%s3475_s1 + $0x54] sm:$0xf] }
  0x40   : > { %1176 = vmatmul.bf16.gmra.mxu1 %v2070_v1  ;;  %1314 = vmatpush.bf16.msrb.mxu0 %v2646_v21  ;;  %v2198_v1 = vor.u32 %v2587_v58, %v2195_v59  ;;  %v2607_v21 = vld [vmem:[%s3475_s1 + $0x1dc] sm:$0xf0]  ;;  %v2083_v57 = vld [vmem:[%s3475_s1 + $0x70] sm:$0xf0]  ;;  %v2089_v58 = vld [vmem:[%s3475_s1 + $0x58] sm:$0xf] }
  0x41   : > { %1225 = vmatmul.bf16.gmra.mxu2 %v2074_v2  ;;  %1363 = vmatpush.bf16.msrb.mxu1 %v2654_v23  ;;  %v2202_v2 = vor.u32 %v2592_v61, %v2201_v60  ;;  %v2259_v23 = vld [vmem:[%s3475_s1 + $0x1e0] sm:$0xf0]  ;;  %v2562_v59 = vld [vmem:[%s3475_s1 + $0x74] sm:$0xf0]  ;;  %v2558_v60 = vld [vmem:[%s3475_s1 + $0x5c] sm:$0xf] }
  0x42   : > { %1274 = vmatmul.bf16.gmra.mxu3 %v2078_v3  ;;  %1412 = vmatpush.bf16.msrb.mxu2 %v2662_v20  ;;  %v2206_v3 = vor.u32 %v2588_v62, %v2203_v63  ;;  %v2257_v20 = vld [vmem:[%s3475_s1 + $0x1c0] sm:$0xf]  ;;  %v2091_v61 = vld [vmem:[%s3475_s1 + $0x78] sm:$0xf0] }
  0x43   : > { %1461 = vmatpush.bf16.msrb.mxu3 %v2670_v22  ;;  %v2603_v22 = vld [vmem:[%s3475_s1 + $0x1c4] sm:$0xf]  ;;  %v2258_v28 = vor.u32 %v2607_v21, %v2257_v20  ;;  %v2121_v20 = vld [vmem:[%s3475_s1 + $0x98] sm:$0xf] }
  0x44   : > { %1315 = vmatpush.bf16.msrb.mxu0 %v2645_v37  ;;  %v2262_v29 = vor.u32 %v2603_v22, %v2259_v23  ;;  %v2554_v37 = vld [vmem:[%s3475_s1 + $0x34] sm:$0xf0]  ;;  %v2566_v22 = vld [vmem:[%s3475_s1 + $0x9c] sm:$0xf] }
  0x45   : > { %1364 = vmatpush.bf16.msrb.mxu1 %v2653_v39  ;;  %v2059_v39 = vld [vmem:[%s3475_s1 + $0x38] sm:$0xf0]  ;;  %v2570_v21 = vld [vmem:[%s3475_s1 + $0xb4] sm:$0xf0] }
  0x46   : > { %1413 = vmatpush.bf16.msrb.mxu2 %v2661_v36  ;;  %v2057_v36 = vld [vmem:[%s3475_s1 + $0x18] sm:$0xf]  ;;  %v2123_v23 = vld [vmem:[%s3475_s1 + $0xb8] sm:$0xf0] }
  0x47   : > { %1462 = vmatpush.bf16.msrb.mxu3 %v2669_v38  ;;  %v2550_v38 = vld [vmem:[%s3475_s1 + $0x1c] sm:$0xf]  ;;  %v2058_v44 = vor.u32 %v2554_v37, %v2057_v36 }
  0x48   : > { %1316 = vmatpush.bf16.msrb.mxu0 %v2644_v53  ;;  %v2062_v45 = vor.u32 %v2550_v38, %v2059_v39 }
  0x49   : > { %1365 = vmatpush.bf16.msrb.mxu1 %v2652_v55  ;;  %v2561_v55 = vld [vmem:[%s3475_s1 + $0x6c] sm:$0xf0] }
  0x4a   : > { %1414 = vmatpush.bf16.msrb.mxu2 %v2660_v52 }
  0x4b   : > { %1463 = vmatpush.bf16.msrb.mxu3 %v2668_v54  ;;  %v2081_v54 = vld [vmem:[%s3475_s1 + $0x50] sm:$0xf] }
  0x4c   : > { %1317 = vmatpush.bf16.msrb.mxu0 %v2643_v5  ;;  %v2090_v5 = vor.u32 %v2562_v59, %v2089_v58 }
  0x4d   : > { %1366 = vmatpush.bf16.msrb.mxu1 %v2651_v7 }
  0x4e   : > { %1415 = vmatpush.bf16.msrb.mxu2 %v2659_v4 }
  0x4f   : > { %1132 = vmatmul.bf16.gmra.mxu0 %v2098_v16  ;;  %1464 = vmatpush.bf16.msrb.mxu3 %v2667_v6  ;;  %v2226_v16 = vor.u32 %v2599_v9, %v2225_v8  ;;  %v2094_v6 = vor.u32 %v2558_v60, %v2091_v61 }
  0x50   : > { %1181 = vmatmul.bf16.gmra.mxu1 %v2102_v17  ;;  %v2230_v17 = vor.u32 %v2595_v10, %v2227_v11 }
  0x51   : > { %1230 = vmatmul.bf16.gmra.mxu2 %v2106_v18  ;;  %v2234_v18 = vor.u32 %v2600_v13, %v2233_v12 }
  0x52   : > { %1279 = vmatmul.bf16.gmra.mxu3 %v2110_v19  ;;  %v2238_v19 = vor.u32 %v2596_v14, %v2235_v15 }
  0x5f   : > { %1137 = vmatmul.bf16.gmra.mxu0 %v2130_v32  ;;  %v2049_v32 = vld [vmem:[%s3475_s1 + $0x10] sm:$0xf] }
  0x60   : > { %1186 = vmatmul.bf16.gmra.mxu1 %v2134_v33  ;;  %v2553_v33 = vld [vmem:[%s3475_s1 + $0x2c] sm:$0xf0] }
  0x61   : > { %1235 = vmatmul.bf16.gmra.mxu2 %v2138_v34  ;;  %v2549_v34 = vld [vmem:[%s3475_s1 + $0x14] sm:$0xf]  ;;  %v2050_v40 = vor.u32 %v2553_v33, %v2049_v32  ;;  %v2126_v32 = vor.u32 %v2566_v22, %v2123_v23 }
  0x62   : > { %1284 = vmatmul.bf16.gmra.mxu3 %v2142_v35  ;;  %v2051_v35 = vld [vmem:[%s3475_s1 + $0x30] sm:$0xf0] }
  0x63   : > { %v2054_v41 = vor.u32 %v2549_v34, %v2051_v35 }
  0x6f   : > { %1142 = vmatmul.bf16.gmra.mxu0 %v2162_v48 }
  0x70   : > { %1191 = vmatmul.bf16.gmra.mxu1 %v2166_v49 }
  0x71   : > { %1240 = vmatmul.bf16.gmra.mxu2 %v2170_v50 }
  0x72   : > { %1289 = vmatmul.bf16.gmra.mxu3 %v2174_v51 }
  0x7f   : > { %1147 = vmatmul.bf16.gmra.mxu0 %v2194_v0  ;;  %v2082_v0 = vor.u32 %v2561_v55, %v2081_v54 }
  0x80   : > { %1196 = vmatmul.bf16.gmra.mxu1 %v2198_v1  ;;  %v2086_v1 = vor.u32 %v2557_v56, %v2083_v57 }
  0x81   : > { %1245 = vmatmul.bf16.gmra.mxu2 %v2202_v2 }
  0x82   : > { %1294 = vmatmul.bf16.gmra.mxu3 %v2206_v3 }
  0x8f   : > { %1152 = vmatmul.bf16.gmra.mxu0 %v2226_v16  ;;  %v2113_v16 = vld [vmem:[%s3475_s1 + $0x90] sm:$0xf] }
  0x90   : > { %1201 = vmatmul.bf16.gmra.mxu1 %v2230_v17  ;;  %v2569_v17 = vld [vmem:[%s3475_s1 + $0xac] sm:$0xf0] }
  0x91   : > { %1250 = vmatmul.bf16.gmra.mxu2 %v2234_v18  ;;  %v2565_v18 = vld [vmem:[%s3475_s1 + $0x94] sm:$0xf]  ;;  %v2114_v26 = vor.u32 %v2569_v17, %v2113_v16 }
  0x92   : > { %1299 = vmatmul.bf16.gmra.mxu3 %v2238_v19  ;;  %v2115_v19 = vld [vmem:[%s3475_s1 + $0xb0] sm:$0xf0] }
  0x93   : > { %v2118_v27 = vor.u32 %v2565_v18, %v2115_v19 }
  0x9f   : > { %1157 = vmatmul.bf16.gmra.mxu0 %v2258_v28 }
  0xa0   : > { %1206 = vmatmul.bf16.gmra.mxu1 %v2262_v29 }
  0xa1   : > { %1255 = vmatmul.bf16.gmra.mxu2 %v2266_v30 }
  0xa2   : > { %1304 = vmatmul.bf16.gmra.mxu3 %v2270_v31  ;;  %v2122_v31 = vor.u32 %v2570_v21, %v2121_v20 }
  0xac   : > { %v1123_v42 = vpop.f32.mrf.mxu0 }
  0xad   : > { %v1172_v43 = vpop.f32.mrf.mxu1 }
  0xae   : > { %v1173_v46 = vadd.f32 %v1172_v43, %v1123_v42  ;;  %v2145_v42 = vld [vmem:[%s3475_s1 + $0xd0] sm:$0xf] }
  0xaf   : > { %1318 = vmatmul.bf16.vlgmr.msrb.gmra.mxu0 %v2050_v40  ;;  %v2577_v43 = vld [vmem:[%s3475_s1 + $0xec] sm:$0xf0] }
  0xb0   : > { %1367 = vmatmul.bf16.vlgmr.msrb.gmra.mxu1 %v2054_v41 }
  0xb1   : > { %1416 = vmatmul.bf16.vlgmr.msrb.gmra.mxu2 %v2058_v44  ;;  %v2573_v44 = vld [vmem:[%s3475_s1 + $0xd4] sm:$0xf] }
  0xb2   : > { %1465 = vmatmul.bf16.vlgmr.msrb.gmra.mxu3 %v2062_v45  ;;  %v2147_v45 = vld [vmem:[%s3475_s1 + $0xf0] sm:$0xf0] }
  0xb3   : > { %v2150_v54 = vor.u32 %v2573_v44, %v2147_v45 }
  0xb4   : > { %v1221_v47 = vpop.f32.mrf.mxu2  ;;  %v1125_v50 = vpop.f32.mrf.mxu0 }
  0xb5   : > { %v1270_v48 = vpop.f32.mrf.mxu3  ;;  %v1222_v49 = vadd.f32 %v1221_v47, %v1173_v46  ;;  %v1174_v51 = vpop.f32.mrf.mxu1  ;;  %v2153_v46 = vld [vmem:[%s3475_s1 + $0xd8] sm:$0xf] }
  0xb6   : > { %v1175_v52 = vadd.f32 %v1174_v51, %v1125_v50  ;;  %v2578_v47 = vld [vmem:[%s3475_s1 + $0xf4] sm:$0xf0] }
  0xb7   : > { %v3076_v53 = vadd.f32 %v1270_v48, %v1222_v49  ;;  %v2574_v48 = vld [vmem:[%s3475_s1 + $0xdc] sm:$0xf]  ;;  %v2154_v58 = vor.u32 %v2578_v47, %v2153_v46 }
  0xb8   : > { %v2155_v49 = vld [vmem:[%s3475_s1 + $0xf8] sm:$0xf0] }
  0xb9   : > { %v2158_v59 = vor.u32 %v2574_v48, %v2155_v49 }
  0xbc   : > { %v1223_v62 = vpop.f32.mrf.mxu2  ;;  %v1128_v3 = vpop.f32.mrf.mxu0 }
  0xbd   : > { %v1272_v63 = vpop.f32.mrf.mxu3  ;;  %v1224_v2 = vadd.f32 %v1223_v62, %v1175_v52  ;;  %v1177_v4 = vpop.f32.mrf.mxu1  ;;  %v2146_v52 = vor.u32 %v2577_v43, %v2145_v42  ;;  %v2219_v42 = vld [vmem:[%s3475_s1 + $0x178] sm:$0xf0] }
  0xbe   : > { %v1178_v7 = vadd.f32 %v1177_v4, %v1128_v3 }
  0xbf   : > { %v3102_v8 = vadd.f32 %v1272_v63, %v1224_v2  ;;  %1323 = vmatmul.bf16.gmra.mxu0 %v2082_v0 }
  0xc0   : > { %1372 = vmatmul.bf16.gmra.mxu1 %v2086_v1 }
  0xc1   : > { %1421 = vmatmul.bf16.gmra.mxu2 %v2090_v5  ;;  %v2177_v5 = vld [vmem:[%s3475_s1 + $0x110] sm:$0xf] }
  0xc2   : > { %1470 = vmatmul.bf16.gmra.mxu3 %v2094_v6  ;;  %v2585_v6 = vld [vmem:[%s3475_s1 + $0x12c] sm:$0xf0] }
  0xc3   : > { %v2178_v17 = vor.u32 %v2585_v6, %v2177_v5  ;;  %v2602_v5 = vld [vmem:[%s3475_s1 + $0x1b4] sm:$0xf0]  ;;  %v2598_v6 = vld [vmem:[%s3475_s1 + $0x19c] sm:$0xf] }
  0xc4   : > { %v1226_v9 = vpop.f32.mrf.mxu2  ;;  %v1130_v12 = vpop.f32.mrf.mxu0 }
  0xc5   : > { %v1275_v10 = vpop.f32.mrf.mxu3  ;;  %v1227_v11 = vadd.f32 %v1226_v9, %v1178_v7  ;;  %v1179_v13 = vpop.f32.mrf.mxu1  ;;  %v2581_v7 = vld [vmem:[%s3475_s1 + $0x114] sm:$0xf] }
  0xc6   : > { %v1180_v14 = vadd.f32 %v1179_v13, %v1130_v12  ;;  %v2179_v9 = vld [vmem:[%s3475_s1 + $0x130] sm:$0xf0]  ;;  %v2582_v12 = vld [vmem:[%s3475_s1 + $0x11c] sm:$0xf] }
  0xc7   : > { %v3104_v15 = vadd.f32 %v1275_v10, %v1227_v11  ;;  %v2185_v10 = vld [vmem:[%s3475_s1 + $0x118] sm:$0xf]  ;;  %v2187_v13 = vld [vmem:[%s3475_s1 + $0x138] sm:$0xf0]  ;;  %v2182_v18 = vor.u32 %v2581_v7, %v2179_v9 }
  0xc8   : > { %v2586_v11 = vld [vmem:[%s3475_s1 + $0x134] sm:$0xf0]  ;;  %v2190_v23 = vor.u32 %v2582_v12, %v2187_v13  ;;  %v2251_v7 = vld [vmem:[%s3475_s1 + $0x1b8] sm:$0xf0] }
  0xc9   : > { %v2186_v22 = vor.u32 %v2586_v11, %v2185_v10 }
  0xcc   : > { %v1228_v24 = vpop.f32.mrf.mxu2  ;;  %v1133_v29 = vpop.f32.mrf.mxu0 }
  0xcd   : > { %v1277_v25 = vpop.f32.mrf.mxu3  ;;  %v1229_v28 = vadd.f32 %v1228_v24, %v1180_v14  ;;  %v1182_v30 = vpop.f32.mrf.mxu1 }
  0xce   : > { %v1183_v33 = vadd.f32 %v1182_v30, %v1133_v29 }
  0xcf   : > { %v3130_v34 = vadd.f32 %v1277_v25, %v1229_v28  ;;  %1328 = vmatmul.bf16.gmra.mxu0 %v2114_v26 }
  0xd0   : > { %1377 = vmatmul.bf16.gmra.mxu1 %v2118_v27 }
  0xd1   : > { %1426 = vmatmul.bf16.gmra.mxu2 %v2122_v31 }
  0xd2   : > { %1475 = vmatmul.bf16.gmra.mxu3 %v2126_v32 }
  0xd4   : > { %v1231_v35 = vpop.f32.mrf.mxu2  ;;  %v1135_v38 = vpop.f32.mrf.mxu0 }
  0xd5   : > { %v1280_v36 = vpop.f32.mrf.mxu3  ;;  %v1232_v37 = vadd.f32 %v1231_v35, %v1183_v33  ;;  %v1184_v39 = vpop.f32.mrf.mxu1  ;;  %v2209_v33 = vld [vmem:[%s3475_s1 + $0x150] sm:$0xf] }
  0xd6   : > { %v1185_v40 = vadd.f32 %v1184_v39, %v1135_v38  ;;  %v2593_v35 = vld [vmem:[%s3475_s1 + $0x16c] sm:$0xf0]  ;;  %v2217_v38 = vld [vmem:[%s3475_s1 + $0x158] sm:$0xf] }
  0xd7   : > { %v3132_v41 = vadd.f32 %v1280_v36, %v1232_v37  ;;  %v2589_v36 = vld [vmem:[%s3475_s1 + $0x154] sm:$0xf]  ;;  %v2594_v39 = vld [vmem:[%s3475_s1 + $0x174] sm:$0xf0]  ;;  %v2210_v45 = vor.u32 %v2593_v35, %v2209_v33 }
  0xd8   : > { %v2211_v37 = vld [vmem:[%s3475_s1 + $0x170] sm:$0xf0]  ;;  %v2281_v35 = vld [vmem:[%s3475_s1 + $0x1d8] sm:$0xf] }
  0xd9   : > { %v2214_v46 = vor.u32 %v2589_v36, %v2211_v37  ;;  %v2275_v33 = vld [vmem:[%s3475_s1 + $0x1f0] sm:$0xf0]  ;;  %v2610_v36 = vld [vmem:[%s3475_s1 + $0x1f4] sm:$0xf0]  ;;  %v2606_v37 = vld [vmem:[%s3475_s1 + $0x1dc] sm:$0xf] }
  0xdc   : > { %v1233_v50 = vpop.f32.mrf.mxu2  ;;  %v1138_v56 = vpop.f32.mrf.mxu0 }
  0xdd   : > { %v1282_v51 = vpop.f32.mrf.mxu3  ;;  %v1234_v55 = vadd.f32 %v1233_v50, %v1185_v40  ;;  %v1187_v57 = vpop.f32.mrf.mxu1  ;;  %v2590_v40 = vld [vmem:[%s3475_s1 + $0x15c] sm:$0xf]  ;;  %v2218_v50 = vor.u32 %v2594_v39, %v2217_v38 }
  0xde   : > { %v1188_v60 = vadd.f32 %v1187_v57, %v1138_v56  ;;  %v2283_v38 = vld [vmem:[%s3475_s1 + $0x1f8] sm:$0xf0] }
  0xdf   : > { %v3158_v61 = vadd.f32 %v1282_v51, %v1234_v55  ;;  %1333 = vmatmul.bf16.gmra.mxu0 %v2146_v52  ;;  %v2222_v51 = vor.u32 %v2590_v40, %v2219_v42 }
  0xe0   : > { %1382 = vmatmul.bf16.gmra.mxu1 %v2150_v54 }
  0xe1   : > { %1431 = vmatmul.bf16.gmra.mxu2 %v2154_v58 }
  0xe2   : > { %1480 = vmatmul.bf16.gmra.mxu3 %v2158_v59 }
  0xe4   : > { %v1236_v62 = vpop.f32.mrf.mxu2  ;;  %v1140_v1 = vpop.f32.mrf.mxu0 }
  0xe5   : > { %v1285_v63 = vpop.f32.mrf.mxu3  ;;  %v1237_v0 = vadd.f32 %v1236_v62, %v1188_v60  ;;  %v1189_v2 = vpop.f32.mrf.mxu1 }
  0xe6   : > { %v1190_v3 = vadd.f32 %v1189_v2, %v1140_v1  ;;  %v2597_v1 = vld [vmem:[%s3475_s1 + $0x194] sm:$0xf] }
  0xe7   : > { %v3160_v4 = vadd.f32 %v1285_v63, %v1237_v0  ;;  %v2241_v63 = vld [vmem:[%s3475_s1 + $0x190] sm:$0xf]  ;;  %v2243_v2 = vld [vmem:[%s3475_s1 + $0x1b0] sm:$0xf0] }
  0xe8   : > { %v2601_v0 = vld [vmem:[%s3475_s1 + $0x1ac] sm:$0xf0]  ;;  %v2246_v12 = vor.u32 %v2597_v1, %v2243_v2 }
  0xe9   : > { %v2242_v11 = vor.u32 %v2601_v0, %v2241_v63 }
  0xec   : > { %v1238_v14 = vpop.f32.mrf.mxu2  ;;  %v1143_v20 = vpop.f32.mrf.mxu0 }
  0xed   : > { %v1287_v16 = vpop.f32.mrf.mxu3  ;;  %v1239_v19 = vadd.f32 %v1238_v14, %v1190_v3  ;;  %v1192_v21 = vpop.f32.mrf.mxu1  ;;  %v2249_v3 = vld [vmem:[%s3475_s1 + $0x198] sm:$0xf] }
  0xee   : > { %v1193_v24 = vadd.f32 %v1192_v21, %v1143_v20 }
  0xef   : > { %v3186_v25 = vadd.f32 %v1287_v16, %v1239_v19  ;;  %1338 = vmatmul.bf16.gmra.mxu0 %v2178_v17  ;;  %v2250_v17 = vor.u32 %v2602_v5, %v2249_v3 }
  0xf0   : > { %1387 = vmatmul.bf16.gmra.mxu1 %v2182_v18  ;;  %v2254_v18 = vor.u32 %v2598_v6, %v2251_v7 }
  0xf1   : > { %1436 = vmatmul.bf16.gmra.mxu2 %v2186_v22 }
  0xf2   : > { %1485 = vmatmul.bf16.gmra.mxu3 %v2190_v23 }
  0xf4   : > { %v1241_v26 = vpop.f32.mrf.mxu2  ;;  %v1145_v29 = vpop.f32.mrf.mxu0 }
  0xf5   : > { %v1290_v27 = vpop.f32.mrf.mxu3  ;;  %v1242_v28 = vadd.f32 %v1241_v26, %v1193_v24  ;;  %v1194_v30 = vpop.f32.mrf.mxu1 }
  0xf6   : > { %v1195_v31 = vadd.f32 %v1194_v30, %v1145_v29  ;;  %v2273_v29 = vld [vmem:[%s3475_s1 + $0x1d0] sm:$0xf] }
  0xf7   : > { %v3188_v32 = vadd.f32 %v1290_v27, %v1242_v28  ;;  %v2609_v30 = vld [vmem:[%s3475_s1 + $0x1ec] sm:$0xf0] }
  0xf8   : > { %v2274_v42 = vor.u32 %v2609_v30, %v2273_v29 }
  0xfc   : > { %v1243_v43 = vpop.f32.mrf.mxu2  ;;  %v1148_v48 = vpop.f32.mrf.mxu0 }
  0xfd   : > { %v1292_v44 = vpop.f32.mrf.mxu3  ;;  %v1244_v47 = vadd.f32 %v1243_v43, %v1195_v31  ;;  %v1197_v49 = vpop.f32.mrf.mxu1  ;;  %v2605_v31 = vld [vmem:[%s3475_s1 + $0x1d4] sm:$0xf] }
  0xfe   : > { %v1198_v52 = vadd.f32 %v1197_v49, %v1148_v48  ;;  %v2278_v43 = vor.u32 %v2605_v31, %v2275_v33  ;;  %v2286_v48 = vor.u32 %v2606_v37, %v2283_v38 }
  0xff   : > { %v3214_v54 = vadd.f32 %v1292_v44, %v1244_v47  ;;  %1343 = vmatmul.bf16.gmra.mxu0 %v2210_v45  ;;  %v2282_v47 = vor.u32 %v2610_v36, %v2281_v35 }
 0x100   : > { %1392 = vmatmul.bf16.gmra.mxu1 %v2214_v46 }
 0x101   : > { %1441 = vmatmul.bf16.gmra.mxu2 %v2218_v50 }
 0x102   : > { %1490 = vmatmul.bf16.gmra.mxu3 %v2222_v51 }
 0x104   : > { %v1246_v55 = vpop.f32.mrf.mxu2  ;;  %v1150_v58 = vpop.f32.mrf.mxu0 }
 0x105   : > { %v1295_v56 = vpop.f32.mrf.mxu3  ;;  %v1247_v57 = vadd.f32 %v1246_v55, %v1198_v52  ;;  %v1199_v59 = vpop.f32.mrf.mxu1 }
 0x106   : > { %v1200_v60 = vadd.f32 %v1199_v59, %v1150_v58 }
 0x107   : > { %v3216_v62 = vadd.f32 %v1295_v56, %v1247_v57 }
 0x10c   : > { %v1248_v9 = vpop.f32.mrf.mxu2  ;;  %v1153_v14 = vpop.f32.mrf.mxu0 }
 0x10d   : > { %v1297_v10 = vpop.f32.mrf.mxu3  ;;  %v1249_v13 = vadd.f32 %v1248_v9, %v1200_v60  ;;  %v1202_v16 = vpop.f32.mrf.mxu1 }
 0x10e   : > { %v1203_v19 = vadd.f32 %v1202_v16, %v1153_v14 }
 0x10f   : > { %v3242_v20 = vadd.f32 %v1297_v10, %v1249_v13  ;;  %1348 = vmatmul.bf16.gmra.mxu0 %v2242_v11 }
 0x110   : > { %1397 = vmatmul.bf16.gmra.mxu1 %v2246_v12 }
 0x111   : > { %1446 = vmatmul.bf16.gmra.mxu2 %v2250_v17 }
 0x112   : > { %1495 = vmatmul.bf16.gmra.mxu3 %v2254_v18 }
 0x114   : > { %v1251_v21 = vpop.f32.mrf.mxu2  ;;  %v1155_v24 = vpop.f32.mrf.mxu0 }
 0x115   : > { %v1300_v22 = vpop.f32.mrf.mxu3  ;;  %v1252_v23 = vadd.f32 %v1251_v21, %v1203_v19  ;;  %v1204_v26 = vpop.f32.mrf.mxu1 }
 0x116   : > { %v1205_v27 = vadd.f32 %v1204_v26, %v1155_v24 }
 0x117   : > { %v3244_v28 = vadd.f32 %v1300_v22, %v1252_v23 }
 0x11c   : > { %v1253_v39 = vpop.f32.mrf.mxu2  ;;  %v1158_v45 = vpop.f32.mrf.mxu0 }
 0x11d   : > { %v1302_v40 = vpop.f32.mrf.mxu3  ;;  %v1254_v44 = vadd.f32 %v1253_v39, %v1205_v27  ;;  %v1207_v46 = vpop.f32.mrf.mxu1 }
 0x11e   : > { %v1208_v49 = vadd.f32 %v1207_v46, %v1158_v45 }
 0x11f   : > { %v3270_v50 = vadd.f32 %v1302_v40, %v1254_v44  ;;  %1353 = vmatmul.bf16.gmra.mxu0 %v2274_v42 }
 0x120   : > { %1402 = vmatmul.bf16.gmra.mxu1 %v2278_v43 }
 0x121   : > { %1451 = vmatmul.bf16.gmra.mxu2 %v2282_v47 }
 0x122   : > { %1500 = vmatmul.bf16.gmra.mxu3 %v2286_v48 }
 0x124   : > { %v1256_v51 = vpop.f32.mrf.mxu2  ;;  %v1160_v56 = vpop.f32.mrf.mxu0 }
 0x125   : > { %v1305_v52 = vpop.f32.mrf.mxu3  ;;  %v1257_v55 = vadd.f32 %v1256_v51, %v1208_v49  ;;  %v1209_v57 = vpop.f32.mrf.mxu1 }
 0x126   : > { %v1210_v58 = vadd.f32 %v1209_v57, %v1160_v56 }
 0x127   : > { %v3272_v59 = vadd.f32 %v1305_v52, %v1257_v55 }
 0x12c   : > { %v1258_v60 = vpop.f32.mrf.mxu2  ;;  %v1319_v1 = vpop.f32.mrf.mxu0 }
 0x12d   : > { %v1307_v63 = vpop.f32.mrf.mxu3  ;;  %v1259_v0 = vadd.f32 %v1258_v60, %v1210_v58  ;;  %v1368_v2 = vpop.f32.mrf.mxu1  ;;  %v1320_v5 = vadd.f32 %v1319_v1, %v3076_v53 }
 0x12f   : > { %v3274_v3 = vadd.f32 %v1307_v63, %v1259_v0  ;;  %v1369_v6 = vadd.f32 %v1368_v2, %v1320_v5 }
 0x134   : > { %v1417_v7 = vpop.f32.mrf.mxu2  ;;  %v1321_v11 = vpop.f32.mrf.mxu0 }
 0x135   : > { %v1466_v9 = vpop.f32.mrf.mxu3  ;;  %v1418_v10 = vadd.f32 %v1417_v7, %v1369_v6  ;;  %v1370_v12 = vpop.f32.mrf.mxu1  ;;  %v1322_v14 = vadd.f32 %v1321_v11, %v3102_v8 }
 0x137   : > { %v3277_v13 = vadd.f32 %v1466_v9, %v1418_v10  ;;  %v1371_v17 = vadd.f32 %v1370_v12, %v1322_v14 }
 0x139   : > { %1506 = vadd.xlane.f32.xlu0 %v3277_v13  ;;  %v1538_v16 = vmul.f32 %v3277_v13, %v3277_v13 }
 0x13b   : > { %1554 = vadd.xlane.f32.xlu1 %v1538_v16 }
 0x13c   : > { %v1419_v18 = vpop.f32.mrf.mxu2  ;;  %v1324_v21 = vpop.f32.mrf.mxu0 }
 0x13d   : > { %v1468_v19 = vpop.f32.mrf.mxu3  ;;  %v1420_v53 = vadd.f32 %v1419_v18, %v1371_v17  ;;  %v1373_v22 = vpop.f32.mrf.mxu1  ;;  %v1325_v24 = vadd.f32 %v1324_v21, %v3104_v15 }
 0x13f   : > { %v3283_v23 = vadd.f32 %v1468_v19, %v1420_v53  ;;  %v1374_v26 = vadd.f32 %v1373_v22, %v1325_v24 }
 0x141   : > { %1508 = vadd.xlane.f32.xlu0 %v3283_v23  ;;  %v1539_v8 = vmul.f32 %v3283_v23, %v3283_v23 }
 0x143   : > { %1556 = vadd.xlane.f32.xlu2 %v1539_v8 }
 0x144   : > { %v1422_v27 = vpop.f32.mrf.mxu2  ;;  %v1326_v31 = vpop.f32.mrf.mxu0 }
 0x145   : > { %v1471_v29 = vpop.f32.mrf.mxu3  ;;  %v1423_v30 = vadd.f32 %v1422_v27, %v1374_v26  ;;  %v1375_v33 = vpop.f32.mrf.mxu1  ;;  %v1327_v36 = vadd.f32 %v1326_v31, %v3130_v34 }
 0x147   : > { %v3289_v35 = vadd.f32 %v1471_v29, %v1423_v30  ;;  %v1376_v37 = vadd.f32 %v1375_v33, %v1327_v36 }
 0x149   : > { %1510 = vadd.xlane.f32.xlu1 %v3289_v35  ;;  %v1540_v15 = vmul.f32 %v3289_v35, %v3289_v35 }
 0x14b   : > { %1558 = vadd.xlane.f32.xlu0 %v1540_v15 }
 0x14c   : > { %v1424_v38 = vpop.f32.mrf.mxu2  ;;  %v1329_v42 = vpop.f32.mrf.mxu0 }
 0x14d   : > { %v1473_v39 = vpop.f32.mrf.mxu3  ;;  %v1425_v40 = vadd.f32 %v1424_v38, %v1376_v37  ;;  %v1378_v43 = vpop.f32.mrf.mxu1  ;;  %v1330_v45 = vadd.f32 %v1329_v42, %v3132_v41 }
 0x14f   : > { %v3295_v44 = vadd.f32 %v1473_v39, %v1425_v40  ;;  %v1379_v46 = vadd.f32 %v1378_v43, %v1330_v45 }
 0x151   : > { %1512 = vadd.xlane.f32.xlu1 %v3295_v44  ;;  %v1541_v56 = vmul.f32 %v3295_v44, %v3295_v44 }
 0x154   : > { %v1427_v34 = vpop.f32.mrf.mxu2  ;;  %v1331_v49 = vpop.f32.mrf.mxu0 }
 0x155   : > { %v1476_v47 = vpop.f32.mrf.mxu3  ;;  %v1428_v48 = vadd.f32 %v1427_v34, %v1379_v46  ;;  %v1380_v51 = vpop.f32.mrf.mxu1  ;;  %v1332_v55 = vadd.f32 %v1331_v49, %v3158_v61 }
 0x157   : > { %v3299_v52 = vadd.f32 %v1476_v47, %v1428_v48  ;;  %v1381_v57 = vadd.f32 %v1380_v51, %v1332_v55 }
 0x159   : > { %1514 = vadd.xlane.f32.xlu2 %v3299_v52  ;;  %1560 = vadd.xlane.f32.xlu1 %v1541_v56  ;;  %v1542_v5 = vmul.f32 %v3299_v52, %v3299_v52 }
 0x15c   : > { %v1429_v41 = vpop.f32.mrf.mxu2  ;;  %v1334_v63 = vpop.f32.mrf.mxu0 }
 0x15d   : > { %v1478_v58 = vpop.f32.mrf.mxu3  ;;  %v1430_v60 = vadd.f32 %v1429_v41, %v1381_v57  ;;  %v1383_v0 = vpop.f32.mrf.mxu1  ;;  %v1335_v2 = vadd.f32 %v1334_v63, %v3160_v4 }
 0x15f   : > { %v3305_v1 = vadd.f32 %v1478_v58, %v1430_v60  ;;  %v1384_v6 = vadd.f32 %v1383_v0, %v1335_v2 }
 0x161   : > { %1562 = vadd.xlane.f32.xlu2 %v1542_v5  ;;  %v1543_v61 = vmul.f32 %v3305_v1, %v3305_v1 }
 0x163   : > { %1564 = vadd.xlane.f32.xlu0 %v1543_v61 }
 0x164   : > { %v1432_v7 = vpop.f32.mrf.mxu2  ;;  %v1336_v11 = vpop.f32.mrf.mxu0 }
 0x165   : > { %v1481_v9 = vpop.f32.mrf.mxu3  ;;  %v1433_v10 = vadd.f32 %v1432_v7, %v1384_v6  ;;  %v1385_v12 = vpop.f32.mrf.mxu1  ;;  %v1337_v16 = vadd.f32 %v1336_v11, %v3186_v25 }
 0x167   : > { %v3312_v14 = vadd.f32 %v1481_v9, %v1433_v10  ;;  %v1386_v17 = vadd.f32 %v1385_v12, %v1337_v16 }
 0x169   : > { %1516 = vadd.xlane.f32.xlu2 %v3305_v1  ;;  %v1544_v4 = vmul.f32 %v3312_v14, %v3312_v14 }
 0x16b   : > { %1518 = vadd.xlane.f32.xlu0 %v3312_v14  ;;  %1566 = vadd.xlane.f32.xlu1 %v1544_v4 }
 0x16c   : > { %v1434_v18 = vpop.f32.mrf.mxu2  ;;  %v1339_v21 = vpop.f32.mrf.mxu0 }
 0x16d   : > { %v1483_v19 = vpop.f32.mrf.mxu3  ;;  %v1435_v53 = vadd.f32 %v1434_v18, %v1386_v17  ;;  %v1388_v22 = vpop.f32.mrf.mxu1  ;;  %v1340_v8 = vadd.f32 %v1339_v21, %v3188_v32 }
 0x16f   : > { %v3319_v24 = vadd.f32 %v1483_v19, %v1435_v53  ;;  %v1389_v26 = vadd.f32 %v1388_v22, %v1340_v8 }
 0x171   : > { %v1545_v25 = vmul.f32 %v3319_v24, %v3319_v24 }
 0x173   : > { %1568 = vadd.xlane.f32.xlu2 %v1545_v25  ;;  %1520 = vadd.xlane.f32.xlu1 %v3319_v24 }
 0x174   : > { %v1437_v27 = vpop.f32.mrf.mxu2  ;;  %v1341_v31 = vpop.f32.mrf.mxu0 }
 0x175   : > { %v1486_v29 = vpop.f32.mrf.mxu3  ;;  %v1438_v30 = vadd.f32 %v1437_v27, %v1389_v26  ;;  %v1390_v33 = vpop.f32.mrf.mxu1  ;;  %v1342_v15 = vadd.f32 %v1341_v31, %v3214_v54 }
 0x177   : > { %v3325_v36 = vadd.f32 %v1486_v29, %v1438_v30  ;;  %v1391_v32 = vadd.f32 %v1390_v33, %v1342_v15 }
 0x179   : > { %v1546_v37 = vmul.f32 %v3325_v36, %v3325_v36 }
 0x17b   : > { %1522 = vadd.xlane.f32.xlu2 %v3325_v36  ;;  %1570 = vadd.xlane.f32.xlu0 %v1546_v37 }
 0x17c   : > { %v1439_v38 = vpop.f32.mrf.mxu2  ;;  %v1344_v42 = vpop.f32.mrf.mxu0 }
 0x17d   : > { %v1488_v39 = vpop.f32.mrf.mxu3  ;;  %v1440_v40 = vadd.f32 %v1439_v38, %v1391_v32  ;;  %v1393_v43 = vpop.f32.mrf.mxu1  ;;  %v1345_v46 = vadd.f32 %v1344_v42, %v3216_v62 }
 0x17f   : > { %v3331_v45 = vadd.f32 %v1488_v39, %v1440_v40  ;;  %v1394_v54 = vadd.f32 %v1393_v43, %v1345_v46 }
 0x181   : > { %v1547_v34 = vmul.f32 %v3331_v45, %v3331_v45 }
 0x183   : > { %1524 = vadd.xlane.f32.xlu0 %v3331_v45  ;;  %1572 = vadd.xlane.f32.xlu1 %v1547_v34 }
 0x184   : > { %v1442_v47 = vpop.f32.mrf.mxu2  ;;  %v1346_v51 = vpop.f32.mrf.mxu0 }
 0x185   : > { %v1491_v48 = vpop.f32.mrf.mxu3  ;;  %v1443_v49 = vadd.f32 %v1442_v47, %v1394_v54  ;;  %v1395_v55 = vpop.f32.mrf.mxu1  ;;  %v1347_v57 = vadd.f32 %v1346_v51, %v3242_v20 }
 0x187   : > { %v3337_v56 = vadd.f32 %v1491_v48, %v1443_v49  ;;  %v1396_v62 = vadd.f32 %v1395_v55, %v1347_v57 }
 0x189   : > { %v1548_v41 = vmul.f32 %v3337_v56, %v3337_v56 }
 0x18b   : > { %1574 = vadd.xlane.f32.xlu2 %v1548_v41  ;;  %1526 = vadd.xlane.f32.xlu1 %v3337_v56 }
 0x18c   : > { %v1444_v58 = vpop.f32.mrf.mxu2  ;;  %v1349_v0 = vpop.f32.mrf.mxu0 }
 0x18d   : > { %v1493_v60 = vpop.f32.mrf.mxu3  ;;  %v1445_v63 = vadd.f32 %v1444_v58, %v1396_v62  ;;  %v1398_v2 = vpop.f32.mrf.mxu1  ;;  %v1350_v61 = vadd.f32 %v1349_v0, %v3244_v28 }
 0x18f   : > { %v3343_v5 = vadd.f32 %v1493_v60, %v1445_v63  ;;  %v1399_v20 = vadd.f32 %v1398_v2, %v1350_v61 }
 0x191   : > { %v1549_v6 = vmul.f32 %v3343_v5, %v3343_v5 }
 0x193   : > { %1528 = vadd.xlane.f32.xlu2 %v3343_v5  ;;  %1576 = vadd.xlane.f32.xlu0 %v1549_v6 }
 0x194   : > { %v1447_v7 = vpop.f32.mrf.mxu2  ;;  %v1351_v11 = vpop.f32.mrf.mxu0 }
 0x195   : > { %v1496_v9 = vpop.f32.mrf.mxu3  ;;  %v1448_v10 = vadd.f32 %v1447_v7, %v1399_v20  ;;  %v1400_v12 = vpop.f32.mrf.mxu1  ;;  %v1352_v4 = vadd.f32 %v1351_v11, %v3270_v50 }
 0x197   : > { %v3349_v16 = vadd.f32 %v1496_v9, %v1448_v10  ;;  %v1401_v28 = vadd.f32 %v1400_v12, %v1352_v4 }
 0x199   : > { %v1550_v17 = vmul.f32 %v3349_v16, %v3349_v16 }
 0x19b   : > { %1530 = vadd.xlane.f32.xlu0 %v3349_v16  ;;  %1578 = vadd.xlane.f32.xlu1 %v1550_v17 }
 0x19c   : > { %v1449_v18 = vpop.f32.mrf.mxu2  ;;  %v1354_v21 = vpop.f32.mrf.mxu0 }
 0x19d   : > { %v1498_v19 = vpop.f32.mrf.mxu3  ;;  %v1450_v53 = vadd.f32 %v1449_v18, %v1401_v28  ;;  %v1355_v22 = vadd.f32 %v1354_v21, %v3272_v59  ;;  %v1403_v8 = vpop.f32.mrf.mxu1 }
 0x19f   : > { %v3356_v25 = vadd.f32 %v1498_v19, %v1450_v53  ;;  %v1404_v26 = vadd.f32 %v1403_v8, %v1355_v22 }
 0x1a1   : > { %v1551_v34 = vmul.f32 %v3356_v25, %v3356_v25 }
 0x1a3   : > { %1532 = vadd.xlane.f32.xlu1 %v3356_v25 }
 0x1a4   : > { %v1452_v50 = vpop.f32.mrf.mxu2  ;;  %v1356_v30 = vpop.f32.mrf.mxu0 }
 0x1a5   : > { %v1501_v27 = vpop.f32.mrf.mxu3  ;;  %v1453_v29 = vadd.f32 %v1452_v50, %v1404_v26  ;;  %v1357_v33 = vadd.f32 %v1356_v30, %v3274_v3  ;;  %v1405_v15 = vpop.f32.mrf.mxu1 }
 0x1a7   : > { %v3359_v31 = vadd.f32 %v1501_v27, %v1453_v29  ;;  %v1406_v37 = vadd.f32 %v1405_v15, %v1357_v33 }
 0x1a9   : > { %1534 = vadd.xlane.f32.xlu2 %v3359_v31  ;;  %v1552_v41 = vmul.f32 %v3359_v31, %v3359_v31 }
 0x1ac   : > { %v1454_v32 = vpop.f32.mrf.mxu2  ;;  %v1507_v38 = vpop.xlane.xlu0 %1506 }
 0x1ad   : > { %v1455_v59 = vadd.f32 %v1454_v32, %v1406_v37  ;;  %v1503_v39 = vpop.f32.mrf.mxu3  ;;  %v1586_v40 = vmul.f32 0.027777778, %v1507_v38 }
 0x1ae   : > { %v1555_v42 = vpop.xlane.xlu1 %1554 }
 0x1af   : > { %v3363_v43 = vadd.f32 %v1503_v39, %v1455_v59  ;;  %v1602_v46 = vmul.f32 0.027777778, %v1555_v42  ;;  %v1618_v54 = vmul.f32 %v1586_v40, %v1586_v40  ;;  %v1650_v53 = vsub.f32 %v3277_v13, %v1586_v40 }
 0x1b1   : > { %1580 = vadd.xlane.f32.xlu2 %v1551_v34  ;;  %1536 = vadd.xlane.f32.xlu0 %v3363_v43  ;;  %v1553_v3 = vmul.f32 %v3363_v43, %v3363_v43  ;;  %v1634_v47 = vsub.f32 %v1602_v46, %v1618_v54 }
 0x1b3   : > { %1584 = vadd.xlane.f32.xlu1 %v1553_v3  ;;  %v1666_v48 = vadd.f32 1e-05, %v1634_v47 }
 0x1b4   : > { %v1509_v49 = vpop.xlane.xlu0 %1508 }
 0x1b5   : > { %2699 = vrsqrt.f32 %v1666_v48  ;;  %v1587_v51 = vmul.f32 0.027777778, %v1509_v49  ;;  %vm1688_vm1 = vweird.f32 %v1666_v48 }
 0x1b6   : > { %v1557_v55 = vpop.xlane.xlu2 %1556 }
 0x1b7   : > { %v1603_v57 = vmul.f32 0.027777778, %v1557_v55  ;;  %v1619_v62 = vmul.f32 %v1587_v51, %v1587_v51  ;;  %v1651_v39 = vsub.f32 %v3283_v23, %v1587_v51 }
 0x1b9   : > { %1582 = vadd.xlane.f32.xlu0 %v1552_v41  ;;  %v1635_v58 = vsub.f32 %v1603_v57, %v1619_v62 }
 0x1bb   : > { %v2700_v60 = vpop.eup %2699  ;;  %v1667_v63 = vadd.f32 1e-05, %v1635_v58 }
 0x1bc   : > { %v1511_v0 = vpop.xlane.xlu1 %1510  ;;  %v1683_v2 = vmul.f32 %v2700_v60, %v1666_v48  ;;  %vm1689_vm0 = vweird.f32 %v2700_v60 }
 0x1bd   : > { %v3372_v61 = vmul.f32 0.027777778, %v1511_v0  ;;  %2701 = vrsqrt.f32 %v1667_v63  ;;  %vm1690_vm2 = vmor %vm1688_vm1, %vm1689_vm0  ;;  %vm1698_vm4 = vweird.f32 %v1667_v63 }
 0x1be   : > { %v1559_v6 = vpop.xlane.xlu0 %1558  ;;  %v1684_v20 = vmul.f32 %v2700_v60, %v1683_v2 }
 0x1bf   : > { %v1620_v7 = vmul.f32 %v3372_v61, %v3372_v61  ;;  %v1604_v9 = vmul.f32 0.027777778, %v1559_v6  ;;  %v1652_v23 = vsub.f32 %v3289_v35, %v3372_v61 }
 0x1c0   : > { %v1685_v10 = vmul.f32 0.5, %v1684_v20 }
 0x1c1   : > { %v1636_v11 = vsub.f32 %v1604_v9, %v1620_v7 }
 0x1c2   : > { %v1686_v12 = vsub.f32 1.5, %v1685_v10 }
 0x1c3   : > { %v1668_v4 = vadd.f32 1e-05, %v1636_v11  ;;  %v2702_v17 = vpop.eup %2701 }
 0x1c4   : > { %v1513_v28 = vpop.xlane.xlu1 %1512  ;;  %v1687_v18 = vmul.f32 %v2700_v60, %v1686_v12  ;;  %v1693_v19 = vmul.f32 %v2702_v17, %v1667_v63  ;;  %vm1699_vm3 = vweird.f32 %v2702_v17 }
 0x1c5   : > { %2703 = vrsqrt.f32 %v1668_v4  ;;  %v3378_v50 = vmul.f32 0.027777778, %v1513_v28  ;;  %vm1700_vm5 = vmor %vm1698_vm4, %vm1699_vm3  ;;  %vm1708_vm7 = vweird.f32 %v1668_v4 }
 0x1c6   : > { %v1691_v21 = vsel %vm1690_vm2, %v2700_v60, %v1687_v18  ;;  %v1694_v22 = vmul.f32 %v2702_v17, %v1693_v19 }
 0x1c7   : > { %v1842_v8 = vmul.f32 %v1691_v21, %v1650_v53  ;;  %v1621_v59 = vmul.f32 %v3378_v50, %v3378_v50 }
 0x1c8   : > { %v1695_v26 = vmul.f32 0.5, %v1694_v22 }
 0x1c9   : > { %v1858_v27 = vmul.f32 0.2, %v1842_v8 }
 0x1ca   : > { %v1696_v30 = vsub.f32 1.5, %v1695_v26 }
 0x1cb   : > { %v2704_v29 = vpop.eup %2703  ;;  %v1874_v33 = vmax.f32 %v1842_v8, %v1858_v27 }
 0x1cc   : > { %v1703_v13 = vmul.f32 %v2704_v29, %v1668_v4  ;;  %v1515_v15 = vpop.xlane.xlu2 %1514  ;;  %v1561_v37 = vpop.xlane.xlu1 %1560  ;;  %v1697_v32 = vmul.f32 %v2702_v17, %v1696_v30  ;;  %vm1709_vm6 = vweird.f32 %v2704_v29 }
 0x1cd   : > { %v1605_v38 = vmul.f32 0.027777778, %v1561_v37  ;;  %1890 = vst [vmem:[%s3383_s15] sm:$0xff] %v1874_v33  ;;  %v3389_v3 = vmul.f32 0.027777778, %v1515_v15  ;;  %vm1710_vm8 = vmor %vm1708_vm7, %vm1709_vm6 }
 0x1ce   : > { %v1704_v40 = vmul.f32 %v2704_v29, %v1703_v13  ;;  %v1701_v42 = vsel %vm1700_vm5, %v2702_v17, %v1697_v32 }
 0x1cf   : > { %v1637_v46 = vsub.f32 %v1605_v38, %v1621_v59  ;;  %v1843_v34 = vmul.f32 %v1701_v42, %v1651_v39  ;;  %v1622_v51 = vmul.f32 %v3389_v3, %v3389_v3 }
 0x1d0   : > { %v1705_v54 = vmul.f32 0.5, %v1704_v40 }
 0x1d1   : > { %v1669_v47 = vadd.f32 1e-05, %v1637_v46  ;;  %v1859_v48 = vmul.f32 0.2, %v1843_v34 }
 0x1d2   : > { %v1706_v49 = vsub.f32 1.5, %v1705_v54 }
 0x1d3   : > { %2705 = vrsqrt.f32 %v1669_v47  ;;  %v1875_v55 = vmax.f32 %v1843_v34, %v1859_v48  ;;  %vm1718_vm10 = vweird.f32 %v1669_v47  ;;  %v1654_v48 = vsub.f32 %v3299_v52, %v3389_v3 }
 0x1d4   : > { %v1707_v57 = vmul.f32 %v2704_v29, %v1706_v49  ;;  %v1563_v41 = vpop.xlane.xlu2 %1562 }
 0x1d5   : > { %v1606_v62 = vmul.f32 0.027777778, %v1563_v41  ;;  %1891 = vst [vmem:[%s3383_s15 + $0x8] sm:$0xff] %v1875_v55 }
 0x1d6   : > { %v1711_v58 = vsel %vm1710_vm8, %v2704_v29, %v1707_v57  ;;  %v1565_v60 = vpop.xlane.xlu0 %1564  ;;  %v1653_v29 = vsub.f32 %v3295_v44, %v3378_v50 }
 0x1d7   : > { %v1844_v63 = vmul.f32 %v1711_v58, %v1652_v23  ;;  %v1638_v0 = vsub.f32 %v1606_v62, %v1622_v51  ;;  %v1607_v17 = vmul.f32 0.027777778, %v1565_v60 }
 0x1d9   : > { %v2706_v2 = vpop.eup %2705  ;;  %v1860_v6 = vmul.f32 0.2, %v1844_v63  ;;  %v1670_v20 = vadd.f32 1e-05, %v1638_v0 }
 0x1da   : > { %v1713_v7 = vmul.f32 %v2706_v2, %v1669_v47  ;;  %vm1719_vm9 = vweird.f32 %v2706_v2 }
 0x1db   : > { %v1876_v9 = vmax.f32 %v1844_v63, %v1860_v6  ;;  %2707 = vrsqrt.f32 %v1670_v20  ;;  %vm1720_vm11 = vmor %vm1718_vm10, %vm1719_vm9  ;;  %vm1728_vm13 = vweird.f32 %v1670_v20 }
 0x1dc   : > { %v1714_v10 = vmul.f32 %v2706_v2, %v1713_v7  ;;  %v1517_v11 = vpop.xlane.xlu2 %1516 }
 0x1dd   : > { %1892 = vst [vmem:[%s3383_s15 + $0x10] sm:$0xff] %v1876_v9  ;;  %v3397_v35 = vmul.f32 0.027777778, %v1517_v11 }
 0x1de   : > { %v1715_v61 = vmul.f32 0.5, %v1714_v10  ;;  %v1519_v12 = vpop.xlane.xlu0 %1518  ;;  %v1567_v4 = vpop.xlane.xlu1 %1566 }
 0x1df   : > { %v1623_v28 = vmul.f32 %v3397_v35, %v3397_v35  ;;  %v3401_v18 = vmul.f32 0.027777778, %v1519_v12  ;;  %v1608_v8 = vmul.f32 0.027777778, %v1567_v4  ;;  %v1655_v4 = vsub.f32 %v3305_v1, %v3397_v35 }
 0x1e0   : > { %v1716_v19 = vsub.f32 1.5, %v1715_v61 }
 0x1e1   : > { %v2708_v53 = vpop.eup %2707  ;;  %v1639_v21 = vsub.f32 %v1607_v17, %v1623_v28  ;;  %v1624_v22 = vmul.f32 %v3401_v18, %v3401_v18 }
 0x1e2   : > { %v1717_v26 = vmul.f32 %v2706_v2, %v1716_v19  ;;  %v1723_v27 = vmul.f32 %v2708_v53, %v1670_v20  ;;  %vm1729_vm12 = vweird.f32 %v2708_v53 }
 0x1e3   : > { %v1671_v30 = vadd.f32 1e-05, %v1639_v21  ;;  %v1640_v33 = vsub.f32 %v1608_v8, %v1624_v22  ;;  %vm1730_vm14 = vmor %vm1728_vm13, %vm1729_vm12 }
 0x1e4   : > { %v1721_v13 = vsel %vm1720_vm11, %v2706_v2, %v1717_v26  ;;  %v1724_v15 = vmul.f32 %v2708_v53, %v1723_v27  ;;  %v1656_v26 = vsub.f32 %v3312_v14, %v3401_v18 }
 0x1e5   : > { %v1845_v37 = vmul.f32 %v1721_v13, %v1653_v29  ;;  %2709 = vrsqrt.f32 %v1671_v30  ;;  %v1672_v32 = vadd.f32 1e-05, %v1640_v33  ;;  %vm1738_vm0 = vweird.f32 %v1671_v30 }
 0x1e6   : > { %v1725_v59 = vmul.f32 0.5, %v1724_v15  ;;  %v1569_v38 = vpop.xlane.xlu2 %1568  ;;  %v1521_v39 = vpop.xlane.xlu1 %1520 }
 0x1e7   : > { %v1861_v40 = vmul.f32 0.2, %v1845_v37  ;;  %2711 = vrsqrt.f32 %v1672_v32  ;;  %v3407_v46 = vmul.f32 0.027777778, %v1521_v39  ;;  %v1609_v50 = vmul.f32 0.027777778, %v1569_v38 }
 0x1e8   : > { %v1726_v42 = vsub.f32 1.5, %v1725_v59  ;;  %vm1748_vm3 = vweird.f32 %v1672_v32 }
 0x1e9   : > { %v1877_v34 = vmax.f32 %v1845_v37, %v1861_v40  ;;  %v1625_v54 = vmul.f32 %v3407_v46, %v3407_v46 }
 0x1ea   : > { %v1727_v44 = vmul.f32 %v2708_v53, %v1726_v42 }
 0x1eb   : > { %v2710_v47 = vpop.eup %2709  ;;  %1893 = vst [vmem:[%s3383_s15 + $0x18] sm:$0xff] %v1877_v34  ;;  %v1641_v57 = vsub.f32 %v1609_v50, %v1625_v54 }
 0x1ec   : > { %v1731_v49 = vsel %vm1730_vm14, %v2708_v53, %v1727_v44  ;;  %v1733_v55 = vmul.f32 %v2710_v47, %v1671_v30  ;;  %vm1739_vm15 = vweird.f32 %v2710_v47 }
 0x1ed   : > { %v2712_v41 = vpop.eup %2711  ;;  %v1846_v23 = vmul.f32 %v1731_v49, %v1654_v48  ;;  %v1673_v58 = vadd.f32 1e-05, %v1641_v57  ;;  %vm1740_vm2 = vmor %vm1738_vm0, %vm1739_vm15 }
 0x1ee   : > { %v1734_v51 = vmul.f32 %v2710_v47, %v1733_v55  ;;  %v1743_v62 = vmul.f32 %v2712_v41, %v1672_v32  ;;  %v1523_v60 = vpop.xlane.xlu2 %1522  ;;  %v1571_v63 = vpop.xlane.xlu0 %1570  ;;  %vm1749_vm1 = vweird.f32 %v2712_v41 }
 0x1ef   : > { %v1862_v0 = vmul.f32 0.2, %v1846_v23  ;;  %v3414_v2 = vmul.f32 0.027777778, %v1523_v60  ;;  %2713 = vrsqrt.f32 %v1673_v58  ;;  %v1610_v7 = vmul.f32 0.027777778, %v1571_v63  ;;  %vm1750_vm4 = vmor %vm1748_vm3, %vm1749_vm1 }
 0x1f0   : > { %v1735_v6 = vmul.f32 0.5, %v1734_v51  ;;  %v1744_v20 = vmul.f32 %v2712_v41, %v1743_v62  ;;  %vm1758_vm6 = vweird.f32 %v1673_v58 }
 0x1f1   : > { %v1878_v52 = vmax.f32 %v1846_v23, %v1862_v0  ;;  %v1626_v3 = vmul.f32 %v3414_v2, %v3414_v2 }
 0x1f2   : > { %v1736_v9 = vsub.f32 1.5, %v1735_v6  ;;  %v1745_v10 = vmul.f32 0.5, %v1744_v20  ;;  %v1658_v20 = vsub.f32 %v3325_v36, %v3414_v2 }
 0x1f3   : > { %1894 = vst [vmem:[%s3383_s15 + $0x20] sm:$0xff] %v1878_v52  ;;  %v1642_v11 = vsub.f32 %v1610_v7, %v1626_v3 }
 0x1f4   : > { %v1737_v61 = vmul.f32 %v2710_v47, %v1736_v9  ;;  %v1746_v12 = vsub.f32 1.5, %v1745_v10 }
 0x1f5   : > { %v1674_v17 = vadd.f32 1e-05, %v1642_v11  ;;  %v2714_v28 = vpop.eup %2713 }
 0x1f6   : > { %v1741_v19 = vsel %vm1740_vm2, %v2710_v47, %v1737_v61  ;;  %v1747_v53 = vmul.f32 %v2712_v41, %v1746_v12  ;;  %v1525_v21 = vpop.xlane.xlu0 %1524  ;;  %v1573_v22 = vpop.xlane.xlu1 %1572  ;;  %v1753_v27 = vmul.f32 %v2714_v28, %v1673_v58  ;;  %vm1759_vm5 = vweird.f32 %v2714_v28 }
 0x1f7   : > { %v1847_v8 = vmul.f32 %v1741_v19, %v1655_v4  ;;  %2715 = vrsqrt.f32 %v1674_v17  ;;  %v3423_v30 = vmul.f32 0.027777778, %v1525_v21  ;;  %v1611_v15 = vmul.f32 0.027777778, %v1573_v22  ;;  %vm1760_vm7 = vmor %vm1758_vm6, %vm1759_vm5 }
 0x1f8   : > { %v1751_v29 = vsel %vm1750_vm4, %v2712_v41, %v1747_v53  ;;  %v1754_v33 = vmul.f32 %v2714_v28, %v1753_v27  ;;  %v1657_v47 = vsub.f32 %v3319_v24, %v3407_v46  ;;  %vm1768_vm9 = vweird.f32 %v1674_v17 }
 0x1f9   : > { %v1863_v1 = vmul.f32 0.2, %v1847_v8  ;;  %v1848_v35 = vmul.f32 %v1751_v29, %v1656_v26  ;;  %v1627_v13 = vmul.f32 %v3423_v30, %v3423_v30  ;;  %v1659_v27 = vsub.f32 %v3331_v45, %v3423_v30 }
 0x1fa   : > { %v1755_v59 = vmul.f32 0.5, %v1754_v33 }
 0x1fb   : > { %v1879_v37 = vmax.f32 %v1847_v8, %v1863_v1  ;;  %v1864_v32 = vmul.f32 0.2, %v1848_v35  ;;  %v1643_v38 = vsub.f32 %v1611_v15, %v1627_v13 }
 0x1fc   : > { %v1756_v39 = vsub.f32 1.5, %v1755_v59 }
 0x1fd   : > { %v2716_v14 = vpop.eup %2715  ;;  %1895 = vst [vmem:[%s3383_s15 + $0x28] sm:$0xff] %v1879_v37  ;;  %v1880_v18 = vmax.f32 %v1848_v35, %v1864_v32  ;;  %v1675_v42 = vadd.f32 1e-05, %v1643_v38 }
 0x1fe   : > { %v1763_v40 = vmul.f32 %v2716_v14, %v1674_v17  ;;  %v1575_v34 = vpop.xlane.xlu2 %1574  ;;  %v1527_v44 = vpop.xlane.xlu1 %1526  ;;  %v1757_v50 = vmul.f32 %v2714_v28, %v1756_v39  ;;  %vm1769_vm8 = vweird.f32 %v2716_v14 }
 0x1ff   : > { %1896 = vst [vmem:[%s3383_s15 + $0x30] sm:$0xff] %v1880_v18  ;;  %v3429_v54 = vmul.f32 0.027777778, %v1527_v44  ;;  %2717 = vrsqrt.f32 %v1675_v42  ;;  %v1612_v55 = vmul.f32 0.027777778, %v1575_v34  ;;  %vm1770_vm10 = vmor %vm1768_vm9, %vm1769_vm8  ;;  %vm1778_vm12 = vweird.f32 %v1675_v42 }
 0x200   : > { %v1764_v48 = vmul.f32 %v2716_v14, %v1763_v40  ;;  %v1761_v49 = vsel %vm1760_vm7, %v2714_v28, %v1757_v50 }
 0x201   : > { %v1628_v57 = vmul.f32 %v3429_v54, %v3429_v54  ;;  %v1849_v41 = vmul.f32 %v1761_v49, %v1657_v47  ;;  %v1660_v45 = vsub.f32 %v3337_v56, %v3429_v54 }
 0x202   : > { %v1765_v23 = vmul.f32 0.5, %v1764_v48 }
 0x203   : > { %v1644_v51 = vsub.f32 %v1612_v55, %v1628_v57  ;;  %v1865_v62 = vmul.f32 0.2, %v1849_v41 }
 0x204   : > { %v1766_v60 = vsub.f32 1.5, %v1765_v23 }
 0x205   : > { %v1676_v58 = vadd.f32 1e-05, %v1644_v51  ;;  %v2718_v63 = vpop.eup %2717  ;;  %v1881_v0 = vmax.f32 %v1849_v41, %v1865_v62 }
 0x206   : > { %v1767_v6 = vmul.f32 %v2716_v14, %v1766_v60  ;;  %v1529_v24 = vpop.xlane.xlu2 %1528  ;;  %v1577_v46 = vpop.xlane.xlu0 %1576  ;;  %v1773_v52 = vmul.f32 %v2718_v63, %v1675_v42  ;;  %vm1779_vm11 = vweird.f32 %v2718_v63 }
 0x207   : > { %2719 = vrsqrt.f32 %v1676_v58  ;;  %1897 = vst [vmem:[%s3383_s15 + $0x38] sm:$0xff] %v1881_v0  ;;  %v3438_v7 = vmul.f32 0.027777778, %v1529_v24  ;;  %v1613_v61 = vmul.f32 0.027777778, %v1577_v46  ;;  %vm1780_vm13 = vmor %vm1778_vm12, %vm1779_vm11  ;;  %vm1788_vm15 = vweird.f32 %v1676_v58 }
 0x208   : > { %v1771_v3 = vsel %vm1770_vm10, %v2716_v14, %v1767_v6  ;;  %v1774_v10 = vmul.f32 %v2718_v63, %v1773_v52 }
 0x209   : > { %v1850_v9 = vmul.f32 %v1771_v3, %v1658_v20  ;;  %v1629_v11 = vmul.f32 %v3438_v7, %v3438_v7  ;;  %v1661_v56 = vsub.f32 %v3343_v5, %v3438_v7 }
 0x20a   : > { %v1775_v4 = vmul.f32 0.5, %v1774_v10 }
 0x20b   : > { %v1866_v12 = vmul.f32 0.2, %v1850_v9  ;;  %v1645_v17 = vsub.f32 %v1613_v61, %v1629_v11 }
 0x20c   : > { %v1776_v36 = vsub.f32 1.5, %v1775_v4 }
 0x20d   : > { %v2720_v28 = vpop.eup %2719  ;;  %v1882_v19 = vmax.f32 %v1850_v9, %v1866_v12  ;;  %v1677_v53 = vadd.f32 1e-05, %v1645_v17 }
 0x20e   : > { %v1783_v2 = vmul.f32 %v2720_v28, %v1676_v58  ;;  %v1531_v21 = vpop.xlane.xlu0 %1530  ;;  %v1579_v22 = vpop.xlane.xlu1 %1578  ;;  %v1777_v8 = vmul.f32 %v2718_v63, %v1776_v36  ;;  %vm1789_vm14 = vweird.f32 %v2720_v28 }
 0x20f   : > { %1898 = vst [vmem:[%s3383_s15 + $0x40] sm:$0xff] %v1882_v19  ;;  %v3443_v26 = vmul.f32 0.027777778, %v1531_v21  ;;  %2721 = vrsqrt.f32 %v1677_v53  ;;  %v1614_v33 = vmul.f32 0.027777778, %v1579_v22  ;;  %vm1790_vm0 = vmor %vm1788_vm15, %vm1789_vm14  ;;  %vm1798_vm2 = vweird.f32 %v1677_v53 }
 0x210   : > { %v1784_v29 = vmul.f32 %v2720_v28, %v1783_v2  ;;  %v1781_v1 = vsel %vm1780_vm13, %v2718_v63, %v1777_v8 }
 0x211   : > { %v1630_v35 = vmul.f32 %v3443_v26, %v3443_v26  ;;  %v1851_v13 = vmul.f32 %v1781_v1, %v1659_v27  ;;  %v1662_v5 = vsub.f32 %v3349_v16, %v3443_v26 }
 0x212   : > { %v1785_v15 = vmul.f32 0.5, %v1784_v29 }
 0x213   : > { %v1646_v37 = vsub.f32 %v1614_v33, %v1630_v35  ;;  %v1867_v32 = vmul.f32 0.2, %v1851_v13 }
 0x214   : > { %v1786_v59 = vsub.f32 1.5, %v1785_v15 }
 0x215   : > { %v1678_v38 = vadd.f32 1e-05, %v1646_v37  ;;  %v2722_v14 = vpop.eup %2721  ;;  %v1883_v18 = vmax.f32 %v1851_v13, %v1867_v32 }
 0x216   : > { %v1787_v39 = vmul.f32 %v2720_v28, %v1786_v59  ;;  %v1793_v30 = vmul.f32 %v2722_v14, %v1677_v53  ;;  %vm1799_vm1 = vweird.f32 %v2722_v14  ;;  %v1533_v41 = vpop.xlane.xlu1 %1532 }
 0x217   : > { %2723 = vrsqrt.f32 %v1678_v38  ;;  %1899 = vst [vmem:[%s3383_s15 + $0x48] sm:$0xff] %v1883_v18  ;;  %vm1800_vm3 = vmor %vm1798_vm2, %vm1799_vm1  ;;  %v1599_v62 = vmul.f32 0.027777778, %v1533_v41  ;;  %vm1808_vm5 = vweird.f32 %v1678_v38 }
 0x218   : > { %v1791_v40 = vsel %vm1790_vm0, %v2720_v28, %v1787_v39  ;;  %v1794_v34 = vmul.f32 %v2722_v14, %v1793_v30 }
 0x219   : > { %v1852_v42 = vmul.f32 %v1791_v40, %v1660_v45  ;;  %v1631_v46 = vmul.f32 %v1599_v62, %v1599_v62  ;;  %v1663_v39 = vsub.f32 %v3356_v25, %v1599_v62 }
 0x21a   : > { %v1795_v50 = vmul.f32 0.5, %v1794_v34 }
 0x21b   : > { %v1868_v44 = vmul.f32 0.2, %v1852_v42 }
 0x21c   : > { %v1535_v47 = vpop.xlane.xlu2 %1534  ;;  %v1796_v55 = vsub.f32 1.5, %v1795_v50 }
 0x21d   : > { %v2724_v48 = vpop.eup %2723  ;;  %v1884_v49 = vmax.f32 %v1852_v42, %v1868_v44  ;;  %v1600_v17 = vmul.f32 0.027777778, %v1535_v47 }
 0x21e   : > { %v1803_v57 = vmul.f32 %v2724_v48, %v1678_v38  ;;  %v1797_v23 = vmul.f32 %v2722_v14, %v1796_v55  ;;  %vm1809_vm4 = vweird.f32 %v2724_v48 }
 0x21f   : > { %1900 = vst [vmem:[%s3383_s15 + $0x50] sm:$0xff] %v1884_v49  ;;  %vm1810_vm6 = vmor %vm1808_vm5, %vm1809_vm4  ;;  %v1632_v22 = vmul.f32 %v1600_v17, %v1600_v17  ;;  %v1664_v41 = vsub.f32 %v3359_v31, %v1600_v17 }
 0x220   : > { %v1804_v54 = vmul.f32 %v2724_v48, %v1803_v57  ;;  %v1801_v51 = vsel %vm1800_vm3, %v2722_v14, %v1797_v23 }
 0x221   : > { %v1853_v60 = vmul.f32 %v1801_v51, %v1661_v56 }
 0x222   : > { %v1805_v58 = vmul.f32 0.5, %v1804_v54 }
 0x223   : > { %v1869_v63 = vmul.f32 0.2, %v1853_v60 }
 0x224   : > { %v1806_v0 = vsub.f32 1.5, %v1805_v58  ;;  %v1581_v6 = vpop.xlane.xlu2 %1580  ;;  %v1537_v24 = vpop.xlane.xlu0 %1536 }
 0x225   : > { %v1615_v20 = vmul.f32 0.027777778, %v1581_v6  ;;  %v1601_v52 = vmul.f32 0.027777778, %v1537_v24  ;;  %v1885_v3 = vmax.f32 %v1853_v60, %v1869_v63 }
 0x226   : > { %v1807_v9 = vmul.f32 %v2724_v48, %v1806_v0  ;;  %v1585_v10 = vpop.xlane.xlu1 %1584 }
 0x227   : > { %v1647_v7 = vsub.f32 %v1615_v20, %v1631_v46  ;;  %v1633_v11 = vmul.f32 %v1601_v52, %v1601_v52  ;;  %v1617_v61 = vmul.f32 0.027777778, %v1585_v10  ;;  %1901 = vst [vmem:[%s3383_s15 + $0x58] sm:$0xff] %v1885_v3  ;;  %v1665_v34 = vsub.f32 %v3363_v43, %v1601_v52 }
 0x228   : > { %v1811_v12 = vsel %vm1810_vm6, %v2724_v48, %v1807_v9 }
 0x229   : > { %v1854_v4 = vmul.f32 %v1811_v12, %v1662_v5  ;;  %v1679_v28 = vadd.f32 1e-05, %v1647_v7  ;;  %v1649_v19 = vsub.f32 %v1617_v61, %v1633_v11 }
 0x22b   : > { %v1870_v36 = vmul.f32 0.2, %v1854_v4  ;;  %2725 = vrsqrt.f32 %v1679_v28  ;;  %v1681_v2 = vadd.f32 1e-05, %v1649_v19  ;;  %vm1818_vm8 = vweird.f32 %v1679_v28 }
 0x22c   : > { %v1583_v53 = vpop.xlane.xlu0 %1582 }
 0x22d   : > { %v1886_v21 = vmax.f32 %v1854_v4, %v1870_v36  ;;  %2727 = vrsqrt.f32 %v1681_v2  ;;  %v1616_v8 = vmul.f32 0.027777778, %v1583_v53  ;;  %vm1838_vm11 = vweird.f32 %v1681_v2 }
 0x22f   : > { %1902 = vst [vmem:[%s3383_s15 + $0x60] sm:$0xff] %v1886_v21  ;;  %v1648_v16 = vsub.f32 %v1616_v8, %v1632_v22 }
 0x231   : > { %v2726_v26 = vpop.eup %2725  ;;  %v1680_v27 = vadd.f32 1e-05, %v1648_v16 }
 0x232   : > { %v1813_v29 = vmul.f32 %v2726_v26, %v1679_v28  ;;  %vm1819_vm7 = vweird.f32 %v2726_v26 }
 0x233   : > { %v2728_v1 = vpop.eup %2727  ;;  %2729 = vrsqrt.f32 %v1680_v27  ;;  %vm1820_vm10 = vmor %vm1818_vm8, %vm1819_vm7  ;;  %vm1828_vm14 = vweird.f32 %v1680_v27 }
 0x234   : > { %v1814_v35 = vmul.f32 %v2726_v26, %v1813_v29  ;;  %v1833_v33 = vmul.f32 %v2728_v1, %v1681_v2  ;;  %vm1839_vm9 = vweird.f32 %v2728_v1 }
 0x235   : > { %vm1840_vm12 = vmor %vm1838_vm11, %vm1839_vm9 }
 0x236   : > { %v1815_v13 = vmul.f32 0.5, %v1814_v35  ;;  %v1834_v15 = vmul.f32 %v2728_v1, %v1833_v33 }
 0x238   : > { %v1816_v37 = vsub.f32 1.5, %v1815_v13  ;;  %v1835_v32 = vmul.f32 0.5, %v1834_v15 }
 0x239   : > { %v2730_v59 = vpop.eup %2729 }
 0x23a   : > { %v1817_v38 = vmul.f32 %v2726_v26, %v1816_v37  ;;  %v1836_v14 = vsub.f32 1.5, %v1835_v32  ;;  %v1823_v18 = vmul.f32 %v2730_v59, %v1680_v27  ;;  %vm1829_vm13 = vweird.f32 %v2730_v59 }
 0x23b   : > { %vm1830_vm15 = vmor %vm1828_vm14, %vm1829_vm13 }
 0x23c   : > { %v1821_v45 = vsel %vm1820_vm10, %v2726_v26, %v1817_v38  ;;  %v1837_v30 = vmul.f32 %v2728_v1, %v1836_v14  ;;  %v1824_v40 = vmul.f32 %v2730_v59, %v1823_v18 }
 0x23d   : > { %v1855_v42 = vmul.f32 %v1821_v45, %v1663_v39 }
 0x23e   : > { %v1841_v44 = vsel %vm1840_vm12, %v2728_v1, %v1837_v30  ;;  %v1825_v50 = vmul.f32 0.5, %v1824_v40 }
 0x23f   : > { %v1871_v47 = vmul.f32 0.2, %v1855_v42  ;;  %v1857_v48 = vmul.f32 %v1841_v44, %v1665_v34 }
 0x240   : > { %v1826_v49 = vsub.f32 1.5, %v1825_v50 }
 0x241   : > { %v1887_v55 = vmax.f32 %v1855_v42, %v1871_v47  ;;  %v1873_v25 = vmul.f32 0.2, %v1857_v48 }
 0x242   : > { %v1827_v57 = vmul.f32 %v2730_v59, %v1826_v49 }
 0x243   : > { %1903 = vst [vmem:[%s3383_s15 + $0x68] sm:$0xff] %v1887_v55  ;;  %v1889_v23 = vmax.f32 %v1857_v48, %v1873_v25 }
 0x244   : > { %v1831_v56 = vsel %vm1830_vm15, %v2730_v59, %v1827_v57 }
 0x245   : > { %1905 = vst [vmem:[%s3383_s15 + $0x78] sm:$0xff] %v1889_v23  ;;  %v1856_v43 = vmul.f32 %v1831_v56, %v1664_v41 }
 0x247   : > { %v1872_v54 = vmul.f32 0.2, %v1856_v43 }
 0x249   : > { %v1888_v51 = vmax.f32 %v1856_v43, %v1872_v54 }
 0x24b   : > { %1904 = vst [vmem:[%s3383_s15 + $0x70] sm:$0xff] %v1888_v51 }
 0x24c PF: > { %s12_s11 = sadd.s32 1, %s2753_s11   ;;  %s3477_s9 = smov %s2749_s10 }
 0x24d   : > { %p9_p5 = scmp.ge.s32.totalorder %s12_s11, 4   ;;  %s3478_s10 = smov %s3480_s12 }
 0x24f   :  { %11 = sbr.rel (!%p9_p5) target bundleno = 2 (0x2), region = 61 }

// kernel: _lambda_.9
= control target key start
LH: loop header
LB: loop body
LE: loop exit
PB: predicated region body
PF: predicated region fallthrough
CT: control target
= control target key end

     0   :  { %s3570_s14 = smov 0   ;;  %s3572_s15 = smov 0   ;;  %s4719_s0 = inlined_call_operand.vmem [shape: bf16[2,2048,128], index: 0, kind: input, shape index: {}]   ;;  %s4720_s1 = inlined_call_operand.vmem [shape: f32[2048,1], index: 1, kind: input, shape index: {}]   ;;  %s4721_s2 = inlined_call_operand.<no memory space> [shape: f32[1,1], index: 2, kind: input, shape index: {}]   ;;  %s4722_s3 = inlined_call_operand.vmem [shape: f32[2,1,128], index: 3, kind: output, shape index: {}]  }
   0x1   :  { %v8_v0 = vstv %s4721_s2  ;;  %s3574_s16 = smov 0  }
   0x2   :  { %9 = vst [vmem:[#allocation2] sm:$0x1] %v8_v0 }
   0x3 LB: > { %s27_s2 = sadd.s32 1, %s3540_s15  ;;  %p2849_p0 = scmp.ge.s32.totalorder %s3544_s16, 1  ;;  %s3544_s16 = sphi %s3574_s16, %s15_s16   ;;  %s3540_s15 = sphi %s3572_s15, %s4724_s15   ;;  %s3536_s14 = sphi %s3570_s14, %s4723_s14  }
   0x4   : > { %p29_p1 = scmp.ge.s32.totalorder %s27_s2, 2  ;;  %p158_p2 = scmp.lt.s32.totalorder %s3544_s16, 3 }
   0x6   : > { %s4726_s2 = smov (%p29_p1, %s27_s2), 0  ;;  %p159_p3 = pnand %p2849_p0, %p158_p2 }
   0x7   : > { %p186_p4 = scmp.lt.s32.totalorder (!%p159_p3), %s3536_s14, 1 }
   0x8   : > { %162 = sbr.rel (%p159_p3) target bundleno = 830 (0x33e), region = 32 }
   0xd   : > { %v716_v1 = vld [vmem:[%s4720_s1 + $0x20] sm:$0xff]  ;;  %v714_v2 = vld [vmem:[%s4720_s1 + $0x10] sm:$0xff]  ;;  %v3546_v4 = vmov 0   ;;  %v717_v5 = vld [vmem:[%s4720_s1 + $0x28] sm:$0xff]  ;;  %s4728_s14 = smov (!%p186_p4, %s3536_s14), 1 }
   0xe   : > { %v712_v3 = vld [vmem:[%s4720_s1] sm:$0xff]  ;;  %3521 = vset.pattern.permute.xlu2 %v3546_v4  ;;  %3520 = vset.pattern.permute.xlu1 %v3546_v4  ;;  %v715_v6 = vld [vmem:[%s4720_s1 + $0x18] sm:$0xff]  ;;  %v713_v7 = vld [vmem:[%s4720_s1 + $0x8] sm:$0xff]  ;;  %s2854_s8 = sshll.u32 %s4728_s14, 10  ;;  %s199_s24 = scalar_lea.vmem %s4722_s3, %s4728_s14 }
   0xf   : > { %3519 = vset.pattern.permute.xlu0 %v3546_v4  ;;  %990 = vperm.xlu2 %3521, %v716_v1   ;;  %v720_v8 = vld [vmem:[%s4720_s1 + $0x40] sm:$0xff]  ;;  %v719_v9 = vld [vmem:[%s4720_s1 + $0x38] sm:$0xff]  ;;  %v718_v10 = vld [vmem:[%s4720_s1 + $0x30] sm:$0xff]  ;;  %s3735_s11 = scalar_lea.vmem %s4719_s0, %s2854_s8 }
  0x10   : > { %980 = vperm.xlu1 %3520, %v714_v2   ;;  %970 = vperm.xlu0 %3519, %v712_v3   ;;  %v723_v11 = vld [vmem:[%s4720_s1 + $0x58] sm:$0xff]  ;;  %v722_v12 = vld [vmem:[%s4720_s1 + $0x50] sm:$0xff]  ;;  %v721_v13 = vld [vmem:[%s4720_s1 + $0x48] sm:$0xff] }
  0x11   : > { %v726_v14 = vld [vmem:[%s4720_s1 + $0x70] sm:$0xff]  ;;  %v725_v15 = vld [vmem:[%s4720_s1 + $0x68] sm:$0xff]  ;;  %v724_v16 = vld [vmem:[%s4720_s1 + $0x60] sm:$0xff] }
  0x12   : > { %v729_v17 = vld [vmem:[%s4720_s1 + $0x88] sm:$0xff]  ;;  %v728_v18 = vld [vmem:[%s4720_s1 + $0x80] sm:$0xff]  ;;  %v727_v19 = vld [vmem:[%s4720_s1 + $0x78] sm:$0xff] }
  0x13   : > { %v732_v20 = vld [vmem:[%s4720_s1 + $0xa0] sm:$0xff]  ;;  %v731_v21 = vld [vmem:[%s4720_s1 + $0x98] sm:$0xff]  ;;  %v730_v22 = vld [vmem:[%s4720_s1 + $0x90] sm:$0xff] }
  0x14   : > { %v735_v23 = vld [vmem:[%s4720_s1 + $0xb8] sm:$0xff]  ;;  %v734_v24 = vld [vmem:[%s4720_s1 + $0xb0] sm:$0xff]  ;;  %v733_v25 = vld [vmem:[%s4720_s1 + $0xa8] sm:$0xff] }
  0x15   : > { %v738_v26 = vld [vmem:[%s4720_s1 + $0xd0] sm:$0xff]  ;;  %v737_v27 = vld [vmem:[%s4720_s1 + $0xc8] sm:$0xff]  ;;  %v736_v28 = vld [vmem:[%s4720_s1 + $0xc0] sm:$0xff] }
  0x16   : > { %v741_v29 = vld [vmem:[%s4720_s1 + $0xe8] sm:$0xff]  ;;  %v740_v30 = vld [vmem:[%s4720_s1 + $0xe0] sm:$0xff]  ;;  %v739_v31 = vld [vmem:[%s4720_s1 + $0xd8] sm:$0xff] }
  0x17   : > { %995 = vperm.xlu2 %3521, %v717_v5   ;;  %v744_v32 = vld [vmem:[%s4720_s1 + $0x100] sm:$0xff]  ;;  %v743_v33 = vld [vmem:[%s4720_s1 + $0xf8] sm:$0xff]  ;;  %v742_v34 = vld [vmem:[%s4720_s1 + $0xf0] sm:$0xff] }
  0x18   : > { %985 = vperm.xlu1 %3520, %v715_v6   ;;  %975 = vperm.xlu0 %3519, %v713_v7   ;;  %v747_v35 = vld [vmem:[%s4720_s1 + $0x118] sm:$0xff]  ;;  %v746_v36 = vld [vmem:[%s4720_s1 + $0x110] sm:$0xff]  ;;  %v745_v37 = vld [vmem:[%s4720_s1 + $0x108] sm:$0xff] }
  0x19   : > { %v750_v39 = vld [vmem:[%s4720_s1 + $0x130] sm:$0xff]  ;;  %v749_v40 = vld [vmem:[%s4720_s1 + $0x128] sm:$0xff]  ;;  %v748_v41 = vld [vmem:[%s4720_s1 + $0x120] sm:$0xff] }
  0x1a   : > { %v753_v43 = vld [vmem:[%s4720_s1 + $0x148] sm:$0xff]  ;;  %v752_v44 = vld [vmem:[%s4720_s1 + $0x140] sm:$0xff]  ;;  %v751_v45 = vld [vmem:[%s4720_s1 + $0x138] sm:$0xff] }
  0x1b   : > { %v756_v47 = vld [vmem:[%s4720_s1 + $0x160] sm:$0xff]  ;;  %v755_v48 = vld [vmem:[%s4720_s1 + $0x158] sm:$0xff]  ;;  %v754_v49 = vld [vmem:[%s4720_s1 + $0x150] sm:$0xff] }
  0x1c   : > { %v2856_v53 = vld [vmem:[%s3735_s11] sm:$0xff]   ;;  %v759_v54 = vld [vmem:[%s4720_s1 + $0x178] sm:$0xff]  ;;  %v758_v55 = vld [vmem:[%s4720_s1 + $0x170] sm:$0xff] }
  0x1d   : > { %v757_v56 = vld [vmem:[%s4720_s1 + $0x168] sm:$0xff]  ;;  %v2857_v58 = vunpack.c.l.bf16 %v2856_v53  ;;  %v2858_v59 = vunpack.c.h.bf16 %v2856_v53  ;;  %v3368_v62 = vld [vmem:[%s3735_s11 + $0x10] sm:$0xff]  }
  0x1e   : > { %v3367_v57 = vld [vmem:[%s3735_s11 + $0x8] sm:$0xff]   ;;  %v762_v4 = vld [vmem:[%s4720_s1 + $0x190] sm:$0xff]  ;;  %v2865_v5 = vunpack.c.l.bf16 %v3368_v62 }
  0x1f   : > { %1010 = vperm.xlu2 %3521, %v720_v8   ;;  %v2861_v60 = vunpack.c.l.bf16 %v3367_v57  ;;  %v2862_v2 = vunpack.c.h.bf16 %v3367_v57  ;;  %v761_v8 = vld [vmem:[%s4720_s1 + $0x188] sm:$0xff] }
  0x20   : > { %1005 = vperm.xlu1 %3520, %v719_v9   ;;  %1000 = vperm.xlu0 %3519, %v718_v10   ;;  %v760_v9 = vld [vmem:[%s4720_s1 + $0x180] sm:$0xff]  ;;  %v3369_v10 = vld [vmem:[%s3735_s11 + $0x18] sm:$0xff]  }
  0x27   : > { %1025 = vperm.xlu2 %3521, %v723_v11   ;;  %v2866_v11 = vunpack.c.h.bf16 %v3368_v62 }
  0x28   : > { %1020 = vperm.xlu1 %3520, %v722_v12   ;;  %1015 = vperm.xlu0 %3519, %v721_v13  }
  0x2f   : > { %1040 = vperm.xlu2 %3521, %v726_v14  }
  0x30   : > { %1035 = vperm.xlu1 %3520, %v725_v15   ;;  %1030 = vperm.xlu0 %3519, %v724_v16  }
  0x37   : > { %1055 = vperm.xlu2 %3521, %v729_v17   ;;  %v2869_v17 = vunpack.c.l.bf16 %v3369_v10 }
  0x38   : > { %1050 = vperm.xlu1 %3520, %v728_v18   ;;  %1045 = vperm.xlu0 %3519, %v727_v19   ;;  %v3370_v18 = vld [vmem:[%s3735_s11 + $0x20] sm:$0xff]  }
  0x3f   : > { %1070 = vperm.xlu2 %3521, %v732_v20  }
  0x40   : > { %1065 = vperm.xlu1 %3520, %v731_v21   ;;  %1060 = vperm.xlu0 %3519, %v730_v22  }
  0x47   : > { %1085 = vperm.xlu2 %3521, %v735_v23   ;;  %v2870_v23 = vunpack.c.h.bf16 %v3369_v10 }
  0x48   : > { %1080 = vperm.xlu1 %3520, %v734_v24   ;;  %1075 = vperm.xlu0 %3519, %v733_v25   ;;  %v765_v24 = vld [vmem:[%s4720_s1 + $0x1a8] sm:$0xff]  ;;  %v2873_v25 = vunpack.c.l.bf16 %v3370_v18 }
  0x4f   : > { %1100 = vperm.xlu2 %3521, %v738_v26  }
  0x50   : > { %1095 = vperm.xlu1 %3520, %v737_v27   ;;  %1090 = vperm.xlu0 %3519, %v736_v28   ;;  %v764_v28 = vld [vmem:[%s4720_s1 + $0x1a0] sm:$0xff] }
  0x57   : > { %1115 = vperm.xlu2 %3521, %v741_v29   ;;  %v763_v29 = vld [vmem:[%s4720_s1 + $0x198] sm:$0xff] }
  0x58   : > { %1110 = vperm.xlu1 %3520, %v740_v30   ;;  %1105 = vperm.xlu0 %3519, %v739_v31  }
  0x5f   : > { %1130 = vperm.xlu2 %3521, %v744_v32   ;;  %v2874_v32 = vunpack.c.h.bf16 %v3370_v18  ;;  %v772_v18 = vld [vmem:[%s4720_s1 + $0x1e0] sm:$0xff] }
  0x60   : > { %1125 = vperm.xlu1 %3520, %v743_v33   ;;  %1120 = vperm.xlu0 %3519, %v742_v34   ;;  %v3371_v33 = vld [vmem:[%s3735_s11 + $0x28] sm:$0xff]  }
  0x67   : > { %1145 = vperm.xlu2 %3521, %v747_v35  }
  0x68   : > { %1140 = vperm.xlu1 %3520, %v746_v36   ;;  %1135 = vperm.xlu0 %3519, %v745_v37   ;;  %v2877_v37 = vunpack.c.l.bf16 %v3371_v33 }
  0x69   : > { %v991_v38 = vpop.permute.xlu2 %990 }
  0x6a   : > { %v2252_v14 = vmul.f32 %v2865_v5, %v991_v38 }
  0x6f   : > { %1160 = vperm.xlu2 %3521, %v750_v39  }
  0x70   : > { %1155 = vperm.xlu1 %3520, %v749_v40   ;;  %1150 = vperm.xlu0 %3519, %v748_v41  }
  0x71   : > { %v996_v42 = vpop.permute.xlu2 %995 }
  0x72   : > { %v2253_v21 = vmul.f32 %v2866_v11, %v996_v42  ;;  %v768_v42 = vld [vmem:[%s4720_s1 + $0x1c0] sm:$0xff] }
  0x77   : > { %1175 = vperm.xlu2 %3521, %v753_v43   ;;  %v3372_v43 = vld [vmem:[%s3735_s11 + $0x30] sm:$0xff]  }
  0x78   : > { %1170 = vperm.xlu1 %3520, %v752_v44   ;;  %1165 = vperm.xlu0 %3519, %v751_v45   ;;  %v2878_v44 = vunpack.c.h.bf16 %v3371_v33  ;;  %v775_v33 = vld [vmem:[%s4720_s1 + $0x1f8] sm:$0xff] }
  0x79   : > { %v3717_v46 = vpop.permute.xlu2 %1010 }
  0x7a   : > { %v2256_v34 = vmul.f32 %v2873_v25, %v3717_v46  ;;  %v767_v46 = vld [vmem:[%s4720_s1 + $0x1b8] sm:$0xff] }
  0x7f   : > { %1190 = vperm.xlu2 %3521, %v756_v47  }
  0x80   : > { %1185 = vperm.xlu1 %3520, %v755_v48   ;;  %1180 = vperm.xlu0 %3519, %v754_v49   ;;  %v766_v48 = vld [vmem:[%s4720_s1 + $0x1b0] sm:$0xff] }
  0x81   : > { %v3737_v50 = vpop.permute.xlu2 %1025 }
  0x82   : > { %v981_v51 = vpop.permute.xlu1 %980  ;;  %v971_v52 = vpop.permute.xlu0 %970 }
  0x83   : > { %v2248_v1 = vmul.f32 %v2857_v58, %v971_v52  ;;  %v2250_v6 = vmul.f32 %v2861_v60, %v981_v51  ;;  %v2881_v51 = vunpack.c.l.bf16 %v3372_v43  ;;  %v2259_v52 = vmul.f32 %v2878_v44, %v3737_v50  ;;  %v771_v60 = vld [vmem:[%s4720_s1 + $0x1d8] sm:$0xff]  ;;  %v770_v50 = vld [vmem:[%s4720_s1 + $0x1d0] sm:$0xff] }
  0x87   : > { %1205 = vperm.xlu2 %3521, %v759_v54   ;;  %v2882_v54 = vunpack.c.h.bf16 %v3372_v43 }
  0x88   : > { %1200 = vperm.xlu1 %3520, %v758_v55   ;;  %1195 = vperm.xlu0 %3519, %v757_v56   ;;  %v3373_v55 = vld [vmem:[%s3735_s11 + $0x38] sm:$0xff]  }
  0x89   : > { %v3750_v61 = vpop.permute.xlu2 %1040  ;;  %v2885_v62 = vunpack.c.l.bf16 %v3373_v55 }
  0x8a   : > { %v986_v63 = vpop.permute.xlu1 %985  ;;  %v976_v0 = vpop.permute.xlu0 %975 }
  0x8b   : > { %v2249_v3 = vmul.f32 %v2858_v59, %v976_v0  ;;  %v2251_v12 = vmul.f32 %v2862_v2, %v986_v63  ;;  %v2262_v5 = vmul.f32 %v2885_v62, %v3750_v61  ;;  %v773_v61 = vld [vmem:[%s4720_s1 + $0x1e8] sm:$0xff] }
  0x8d   : > { %v2504_v7 = vadd.f32 %v2249_v3, %v2248_v1  ;;  %v769_v1 = vld [vmem:[%s4720_s1 + $0x1c8] sm:$0xff]  ;;  %v2886_v3 = vunpack.c.h.bf16 %v3373_v55 }
  0x8f   : > { %v2505_v13 = vadd.f32 %v2504_v7, %v2250_v6  ;;  %1220 = vperm.xlu2 %3521, %v762_v4   ;;  %v3374_v4 = vld [vmem:[%s3735_s11 + $0x40] sm:$0xff]  }
  0x90   : > { %1215 = vperm.xlu1 %3520, %v761_v8   ;;  %1210 = vperm.xlu0 %3519, %v760_v9   ;;  %v2889_v7 = vunpack.c.l.bf16 %v3374_v4 }
  0x91   : > { %v2506_v15 = vadd.f32 %v2505_v13, %v2251_v12  ;;  %v3763_v16 = vpop.permute.xlu2 %1055  ;;  %v774_v12 = vld [vmem:[%s4720_s1 + $0x1f0] sm:$0xff]  ;;  %v3375_v13 = vld [vmem:[%s3735_s11 + $0x48] sm:$0xff]  }
  0x92   : > { %v1006_v19 = vpop.permute.xlu1 %1005  ;;  %v1001_v20 = vpop.permute.xlu0 %1000 }
  0x93   : > { %v2507_v22 = vadd.f32 %v2506_v15, %v2252_v14  ;;  %v2254_v27 = vmul.f32 %v2869_v17, %v1001_v20  ;;  %v2255_v30 = vmul.f32 %v2870_v23, %v1006_v19  ;;  %v2890_v14 = vunpack.c.h.bf16 %v3374_v4 }
  0x94   : > { %v2893_v20 = vunpack.c.l.bf16 %v3375_v13  ;;  %v2894_v23 = vunpack.c.h.bf16 %v3375_v13 }
  0x95   : > { %v2508_v26 = vadd.f32 %v2507_v22, %v2253_v21  ;;  %v2265_v21 = vmul.f32 %v2890_v14, %v3763_v16  ;;  %v776_v16 = vld [vmem:[%s4720_s1 + $0x200] sm:$0xff] }
  0x97   : > { %v2509_v31 = vadd.f32 %v2508_v26, %v2254_v27  ;;  %1235 = vperm.xlu2 %3521, %v765_v24   ;;  %v3376_v24 = vld [vmem:[%s3735_s11 + $0x50] sm:$0xff]  }
  0x98   : > { %1230 = vperm.xlu1 %3520, %v764_v28   ;;  %1225 = vperm.xlu0 %3519, %v763_v29   ;;  %v777_v29 = vld [vmem:[%s4720_s1 + $0x208] sm:$0xff] }
  0x99   : > { %v2510_v35 = vadd.f32 %v2509_v31, %v2255_v30  ;;  %v3777_v36 = vpop.permute.xlu2 %1070  ;;  %v2897_v30 = vunpack.c.l.bf16 %v3376_v24 }
  0x9a   : > { %v1021_v38 = vpop.permute.xlu1 %1020  ;;  %v1016_v39 = vpop.permute.xlu0 %1015 }
  0x9b   : > { %v2511_v40 = vadd.f32 %v2510_v35, %v2256_v34  ;;  %v2257_v41 = vmul.f32 %v2874_v32, %v1016_v39  ;;  %v2258_v45 = vmul.f32 %v2877_v37, %v1021_v38  ;;  %v2898_v35 = vunpack.c.h.bf16 %v3376_v24  ;;  %v3377_v37 = vld [vmem:[%s3735_s11 + $0x58] sm:$0xff]  }
  0x9c   : > { %v2268_v38 = vmul.f32 %v2897_v30, %v3777_v36  ;;  %v779_v36 = vld [vmem:[%s4720_s1 + $0x218] sm:$0xff] }
  0x9d   : > { %v2512_v47 = vadd.f32 %v2511_v40, %v2257_v41  ;;  %v2901_v40 = vunpack.c.l.bf16 %v3377_v37 }
  0x9f   : > { %v2513_v49 = vadd.f32 %v2512_v47, %v2258_v45  ;;  %1250 = vperm.xlu2 %3521, %v768_v42   ;;  %v780_v45 = vld [vmem:[%s4720_s1 + $0x220] sm:$0xff] }
  0xa0   : > { %1245 = vperm.xlu1 %3520, %v767_v46   ;;  %1240 = vperm.xlu0 %3519, %v766_v48   ;;  %v3378_v47 = vld [vmem:[%s3735_s11 + $0x60] sm:$0xff]   ;;  %v2902_v46 = vunpack.c.h.bf16 %v3377_v37 }
  0xa1   : > { %v3790_v53 = vpop.permute.xlu2 %1085  ;;  %v2514_v58 = vadd.f32 %v2513_v49, %v2259_v52 }
  0xa2   : > { %v1036_v56 = vpop.permute.xlu1 %1035  ;;  %v1031_v57 = vpop.permute.xlu0 %1030  ;;  %v2271_v55 = vmul.f32 %v2902_v46, %v3790_v53  ;;  %v782_v53 = vld [vmem:[%s4720_s1 + $0x230] sm:$0xff] }
  0xa3   : > { %v2260_v59 = vmul.f32 %v2881_v51, %v1031_v57  ;;  %v2261_v63 = vmul.f32 %v2882_v54, %v1036_v56  ;;  %v778_v51 = vld [vmem:[%s4720_s1 + $0x210] sm:$0xff]  ;;  %v2905_v54 = vunpack.c.l.bf16 %v3378_v47  ;;  %v2906_v57 = vunpack.c.h.bf16 %v3378_v47 }
  0xa5   : > { %v2515_v0 = vadd.f32 %v2514_v58, %v2260_v59  ;;  %v3379_v58 = vld [vmem:[%s3735_s11 + $0x68] sm:$0xff]  }
  0xa7   : > { %v2516_v2 = vadd.f32 %v2515_v0, %v2261_v63  ;;  %1265 = vperm.xlu2 %3521, %v771_v60   ;;  %v783_v0 = vld [vmem:[%s4720_s1 + $0x238] sm:$0xff] }
  0xa8   : > { %1260 = vperm.xlu1 %3520, %v770_v50   ;;  %1255 = vperm.xlu0 %3519, %v769_v1   ;;  %v2909_v50 = vunpack.c.l.bf16 %v3379_v58 }
  0xa9   : > { %v3804_v6 = vpop.permute.xlu2 %1100  ;;  %v2517_v10 = vadd.f32 %v2516_v2, %v2262_v5  ;;  %v2910_v5 = vunpack.c.h.bf16 %v3379_v58 }
  0xaa   : > { %v1051_v8 = vpop.permute.xlu1 %1050  ;;  %v1046_v9 = vpop.permute.xlu0 %1045 }
  0xab   : > { %v2263_v11 = vmul.f32 %v2886_v3, %v1046_v9  ;;  %v2264_v15 = vmul.f32 %v2889_v7, %v1051_v8  ;;  %v781_v3 = vld [vmem:[%s4720_s1 + $0x228] sm:$0xff]  ;;  %v3380_v7 = vld [vmem:[%s3735_s11 + $0x70] sm:$0xff]   ;;  %v2274_v8 = vmul.f32 %v2909_v50, %v3804_v6 }
  0xac   : > { %v785_v6 = vld [vmem:[%s4720_s1 + $0x248] sm:$0xff] }
  0xad   : > { %v2518_v17 = vadd.f32 %v2517_v10, %v2263_v11  ;;  %v2913_v10 = vunpack.c.l.bf16 %v3380_v7 }
  0xaf   : > { %v2519_v19 = vadd.f32 %v2518_v17, %v2264_v15  ;;  %1280 = vperm.xlu2 %3521, %v774_v12   ;;  %v786_v15 = vld [vmem:[%s4720_s1 + $0x250] sm:$0xff]  ;;  %v3381_v17 = vld [vmem:[%s3735_s11 + $0x78] sm:$0xff]  }
  0xb0   : > { %1275 = vperm.xlu1 %3520, %v773_v61   ;;  %1270 = vperm.xlu0 %3519, %v772_v18   ;;  %v2914_v61 = vunpack.c.h.bf16 %v3380_v7 }
  0xb1   : > { %v3817_v22 = vpop.permute.xlu2 %1115  ;;  %v2520_v27 = vadd.f32 %v2519_v19, %v2265_v21 }
  0xb2   : > { %v1066_v25 = vpop.permute.xlu1 %1065  ;;  %v1061_v26 = vpop.permute.xlu0 %1060  ;;  %v2277_v24 = vmul.f32 %v2914_v61, %v3817_v22  ;;  %v788_v22 = vld [vmem:[%s4720_s1 + $0x260] sm:$0xff] }
  0xb3   : > { %v2266_v28 = vmul.f32 %v2893_v20, %v1061_v26  ;;  %v2267_v31 = vmul.f32 %v2894_v23, %v1066_v25  ;;  %v784_v20 = vld [vmem:[%s4720_s1 + $0x240] sm:$0xff]  ;;  %v2917_v23 = vunpack.c.l.bf16 %v3381_v17  ;;  %v2918_v26 = vunpack.c.h.bf16 %v3381_v17 }
  0xb5   : > { %v2521_v32 = vadd.f32 %v2520_v27, %v2266_v28  ;;  %v3382_v27 = vld [vmem:[%s3735_s11 + $0x80] sm:$0xff]  }
  0xb7   : > { %v2522_v34 = vadd.f32 %v2521_v32, %v2267_v31  ;;  %1295 = vperm.xlu2 %3521, %v777_v29   ;;  %v789_v32 = vld [vmem:[%s4720_s1 + $0x268] sm:$0xff] }
  0xb8   : > { %1290 = vperm.xlu1 %3520, %v776_v16   ;;  %1285 = vperm.xlu0 %3519, %v775_v33   ;;  %v2921_v16 = vunpack.c.l.bf16 %v3382_v27 }
  0xb9   : > { %v3831_v39 = vpop.permute.xlu2 %1130  ;;  %v2523_v43 = vadd.f32 %v2522_v34, %v2268_v38  ;;  %v2922_v38 = vunpack.c.h.bf16 %v3382_v27 }
  0xba   : > { %v1081_v41 = vpop.permute.xlu1 %1080  ;;  %v1076_v42 = vpop.permute.xlu0 %1075 }
  0xbb   : > { %v2269_v44 = vmul.f32 %v2898_v35, %v1076_v42  ;;  %v2270_v48 = vmul.f32 %v2901_v40, %v1081_v41  ;;  %v787_v35 = vld [vmem:[%s4720_s1 + $0x258] sm:$0xff]  ;;  %v3383_v40 = vld [vmem:[%s3735_s11 + $0x88] sm:$0xff]   ;;  %v2280_v41 = vmul.f32 %v2921_v16, %v3831_v39 }
  0xbc   : > { %v791_v39 = vld [vmem:[%s4720_s1 + $0x278] sm:$0xff] }
  0xbd   : > { %v2524_v49 = vadd.f32 %v2523_v43, %v2269_v44  ;;  %v2925_v43 = vunpack.c.l.bf16 %v3383_v40 }
  0xbf   : > { %v2525_v52 = vadd.f32 %v2524_v49, %v2270_v48  ;;  %1310 = vperm.xlu2 %3521, %v780_v45   ;;  %v792_v48 = vld [vmem:[%s4720_s1 + $0x280] sm:$0xff]  ;;  %v3384_v49 = vld [vmem:[%s3735_s11 + $0x90] sm:$0xff]  }
  0xc0   : > { %1305 = vperm.xlu1 %3520, %v779_v36   ;;  %1300 = vperm.xlu0 %3519, %v778_v51   ;;  %v2926_v36 = vunpack.c.h.bf16 %v3383_v40 }
  0xc1   : > { %v3844_v56 = vpop.permute.xlu2 %1145  ;;  %v2526_v62 = vadd.f32 %v2525_v52, %v2271_v55 }
  0xc2   : > { %v1096_v59 = vpop.permute.xlu1 %1095  ;;  %v1091_v60 = vpop.permute.xlu0 %1090  ;;  %v2283_v58 = vmul.f32 %v2926_v36, %v3844_v56  ;;  %v794_v56 = vld [vmem:[%s4720_s1 + $0x290] sm:$0xff] }
  0xc3   : > { %v2272_v63 = vmul.f32 %v2905_v54, %v1091_v60  ;;  %v2273_v1 = vmul.f32 %v2906_v57, %v1096_v59  ;;  %v790_v54 = vld [vmem:[%s4720_s1 + $0x270] sm:$0xff]  ;;  %v2929_v57 = vunpack.c.l.bf16 %v3384_v49  ;;  %v2930_v60 = vunpack.c.h.bf16 %v3384_v49 }
  0xc5   : > { %v2527_v2 = vadd.f32 %v2526_v62, %v2272_v63  ;;  %v3385_v62 = vld [vmem:[%s3735_s11 + $0x98] sm:$0xff]  }
  0xc7   : > { %v2528_v4 = vadd.f32 %v2527_v2, %v2273_v1  ;;  %1325 = vperm.xlu2 %3521, %v783_v0   ;;  %v795_v2 = vld [vmem:[%s4720_s1 + $0x298] sm:$0xff] }
  0xc8   : > { %1320 = vperm.xlu1 %3520, %v782_v53   ;;  %1315 = vperm.xlu0 %3519, %v781_v3   ;;  %v2933_v53 = vunpack.c.l.bf16 %v3385_v62 }
  0xc9   : > { %v3858_v9 = vpop.permute.xlu2 %1160  ;;  %v2529_v13 = vadd.f32 %v2528_v4, %v2274_v8  ;;  %v2934_v8 = vunpack.c.h.bf16 %v3385_v62 }
  0xca   : > { %v1111_v11 = vpop.permute.xlu1 %1110  ;;  %v1106_v12 = vpop.permute.xlu0 %1105 }
  0xcb   : > { %v2275_v14 = vmul.f32 %v2910_v5, %v1106_v12  ;;  %v2276_v18 = vmul.f32 %v2913_v10, %v1111_v11  ;;  %v793_v5 = vld [vmem:[%s4720_s1 + $0x288] sm:$0xff]  ;;  %v3386_v10 = vld [vmem:[%s3735_s11 + $0xa0] sm:$0xff]   ;;  %v2286_v11 = vmul.f32 %v2933_v53, %v3858_v9 }
  0xcc   : > { %v797_v9 = vld [vmem:[%s4720_s1 + $0x2a8] sm:$0xff] }
  0xcd   : > { %v2530_v19 = vadd.f32 %v2529_v13, %v2275_v14  ;;  %v2937_v13 = vunpack.c.l.bf16 %v3386_v10 }
  0xcf   : > { %v2531_v21 = vadd.f32 %v2530_v19, %v2276_v18  ;;  %1340 = vperm.xlu2 %3521, %v786_v15   ;;  %v798_v18 = vld [vmem:[%s4720_s1 + $0x2b0] sm:$0xff]  ;;  %v3387_v19 = vld [vmem:[%s3735_s11 + $0xa8] sm:$0xff]  }
  0xd0   : > { %1335 = vperm.xlu1 %3520, %v785_v6   ;;  %1330 = vperm.xlu0 %3519, %v784_v20   ;;  %v2938_v6 = vunpack.c.h.bf16 %v3386_v10 }
  0xd1   : > { %v3871_v25 = vpop.permute.xlu2 %1175  ;;  %v2532_v30 = vadd.f32 %v2531_v21, %v2277_v24 }
  0xd2   : > { %v1126_v28 = vpop.permute.xlu1 %1125  ;;  %v1121_v29 = vpop.permute.xlu0 %1120  ;;  %v2289_v27 = vmul.f32 %v2938_v6, %v3871_v25  ;;  %v800_v25 = vld [vmem:[%s4720_s1 + $0x2c0] sm:$0xff] }
  0xd3   : > { %v2278_v31 = vmul.f32 %v2917_v23, %v1121_v29  ;;  %v2279_v33 = vmul.f32 %v2918_v26, %v1126_v28  ;;  %v796_v23 = vld [vmem:[%s4720_s1 + $0x2a0] sm:$0xff]  ;;  %v2941_v26 = vunpack.c.l.bf16 %v3387_v19  ;;  %v2942_v29 = vunpack.c.h.bf16 %v3387_v19 }
  0xd5   : > { %v2533_v34 = vadd.f32 %v2532_v30, %v2278_v31  ;;  %v3388_v30 = vld [vmem:[%s3735_s11 + $0xb0] sm:$0xff]  }
  0xd7   : > { %v2534_v37 = vadd.f32 %v2533_v34, %v2279_v33  ;;  %1355 = vperm.xlu2 %3521, %v789_v32   ;;  %v801_v34 = vld [vmem:[%s4720_s1 + $0x2c8] sm:$0xff] }
  0xd8   : > { %1350 = vperm.xlu1 %3520, %v788_v22   ;;  %1345 = vperm.xlu0 %3519, %v787_v35   ;;  %v2945_v22 = vunpack.c.l.bf16 %v3388_v30 }
  0xd9   : > { %v3885_v42 = vpop.permute.xlu2 %1190  ;;  %v2535_v47 = vadd.f32 %v2534_v37, %v2280_v41  ;;  %v2946_v41 = vunpack.c.h.bf16 %v3388_v30 }
  0xda   : > { %v1141_v44 = vpop.permute.xlu1 %1140  ;;  %v1136_v45 = vpop.permute.xlu0 %1135 }
  0xdb   : > { %v2281_v46 = vmul.f32 %v2922_v38, %v1136_v45  ;;  %v2282_v51 = vmul.f32 %v2925_v43, %v1141_v44  ;;  %v799_v38 = vld [vmem:[%s4720_s1 + $0x2b8] sm:$0xff]  ;;  %v2292_v44 = vmul.f32 %v2945_v22, %v3885_v42 }
  0xdc   : > { %v3389_v43 = vld [vmem:[%s3735_s11 + $0xb8] sm:$0xff]  }
  0xdd   : > { %v2536_v52 = vadd.f32 %v2535_v47, %v2281_v46  ;;  %v2949_v47 = vunpack.c.l.bf16 %v3389_v43  ;;  %v803_v42 = vld [vmem:[%s4720_s1 + $0x2d8] sm:$0xff] }
  0xdf   : > { %v2537_v55 = vadd.f32 %v2536_v52, %v2282_v51  ;;  %1370 = vperm.xlu2 %3521, %v792_v48   ;;  %v804_v51 = vld [vmem:[%s4720_s1 + $0x2e0] sm:$0xff] }
  0xe0   : > { %1365 = vperm.xlu1 %3520, %v791_v39   ;;  %1360 = vperm.xlu0 %3519, %v790_v54   ;;  %v3390_v52 = vld [vmem:[%s3735_s11 + $0xc0] sm:$0xff]   ;;  %v2950_v39 = vunpack.c.h.bf16 %v3389_v43 }
  0xe1   : > { %v3898_v59 = vpop.permute.xlu2 %1205  ;;  %v2538_v50 = vadd.f32 %v2537_v55, %v2283_v58 }
  0xe2   : > { %v1156_v63 = vpop.permute.xlu1 %1155  ;;  %v1151_v0 = vpop.permute.xlu0 %1150  ;;  %v2295_v62 = vmul.f32 %v2950_v39, %v3898_v59  ;;  %v806_v59 = vld [vmem:[%s4720_s1 + $0x2f0] sm:$0xff] }
  0xe3   : > { %v2284_v1 = vmul.f32 %v2929_v57, %v1151_v0  ;;  %v2285_v3 = vmul.f32 %v2930_v60, %v1156_v63  ;;  %v802_v57 = vld [vmem:[%s4720_s1 + $0x2d0] sm:$0xff]  ;;  %v2953_v60 = vunpack.c.l.bf16 %v3390_v52  ;;  %v2954_v0 = vunpack.c.h.bf16 %v3390_v52 }
  0xe5   : > { %v2539_v4 = vadd.f32 %v2538_v50, %v2284_v1  ;;  %v3391_v50 = vld [vmem:[%s3735_s11 + $0xc8] sm:$0xff]  }
  0xe7   : > { %v2540_v7 = vadd.f32 %v2539_v4, %v2285_v3  ;;  %1385 = vperm.xlu2 %3521, %v795_v2   ;;  %v807_v4 = vld [vmem:[%s4720_s1 + $0x2f8] sm:$0xff] }
  0xe8   : > { %1380 = vperm.xlu1 %3520, %v794_v56   ;;  %1375 = vperm.xlu0 %3519, %v793_v5   ;;  %v2957_v56 = vunpack.c.l.bf16 %v3391_v50 }
  0xe9   : > { %v3912_v12 = vpop.permute.xlu2 %1220  ;;  %v2541_v17 = vadd.f32 %v2540_v7, %v2286_v11  ;;  %v2958_v11 = vunpack.c.h.bf16 %v3391_v50 }
  0xea   : > { %v1171_v14 = vpop.permute.xlu1 %1170  ;;  %v1166_v15 = vpop.permute.xlu0 %1165 }
  0xeb   : > { %v2287_v61 = vmul.f32 %v2934_v8, %v1166_v15  ;;  %v2288_v20 = vmul.f32 %v2937_v13, %v1171_v14  ;;  %v805_v8 = vld [vmem:[%s4720_s1 + $0x2e8] sm:$0xff]  ;;  %v3392_v13 = vld [vmem:[%s3735_s11 + $0xd0] sm:$0xff]   ;;  %v2298_v14 = vmul.f32 %v2957_v56, %v3912_v12 }
  0xec   : > { %v809_v12 = vld [vmem:[%s4720_s1 + $0x308] sm:$0xff] }
  0xed   : > { %v2542_v21 = vadd.f32 %v2541_v17, %v2287_v61  ;;  %v2961_v17 = vunpack.c.l.bf16 %v3392_v13 }
  0xef   : > { %v2543_v24 = vadd.f32 %v2542_v21, %v2288_v20  ;;  %1400 = vperm.xlu2 %3521, %v798_v18   ;;  %v810_v20 = vld [vmem:[%s4720_s1 + $0x310] sm:$0xff]  ;;  %v3393_v21 = vld [vmem:[%s3735_s11 + $0xd8] sm:$0xff]  }
  0xf0   : > { %1395 = vperm.xlu1 %3520, %v797_v9   ;;  %1390 = vperm.xlu0 %3519, %v796_v23   ;;  %v2962_v9 = vunpack.c.h.bf16 %v3392_v13 }
  0xf1   : > { %v3925_v28 = vpop.permute.xlu2 %1235  ;;  %v2544_v16 = vadd.f32 %v2543_v24, %v2289_v27 }
  0xf2   : > { %v1186_v31 = vpop.permute.xlu1 %1185  ;;  %v1181_v32 = vpop.permute.xlu0 %1180  ;;  %v2301_v30 = vmul.f32 %v2962_v9, %v3925_v28  ;;  %v812_v28 = vld [vmem:[%s4720_s1 + $0x320] sm:$0xff] }
  0xf3   : > { %v2290_v33 = vmul.f32 %v2941_v26, %v1181_v32  ;;  %v2291_v35 = vmul.f32 %v2942_v29, %v1186_v31  ;;  %v808_v26 = vld [vmem:[%s4720_s1 + $0x300] sm:$0xff]  ;;  %v2965_v29 = vunpack.c.l.bf16 %v3393_v21  ;;  %v2966_v32 = vunpack.c.h.bf16 %v3393_v21 }
  0xf5   : > { %v2545_v37 = vadd.f32 %v2544_v16, %v2290_v33  ;;  %v3394_v16 = vld [vmem:[%s3735_s11 + $0xe0] sm:$0xff]  }
  0xf7   : > { %v2546_v40 = vadd.f32 %v2545_v37, %v2291_v35  ;;  %1415 = vperm.xlu2 %3521, %v801_v34   ;;  %v813_v37 = vld [vmem:[%s4720_s1 + $0x328] sm:$0xff] }
  0xf8   : > { %1410 = vperm.xlu1 %3520, %v800_v25   ;;  %1405 = vperm.xlu0 %3519, %v799_v38   ;;  %v2969_v25 = vunpack.c.l.bf16 %v3394_v16 }
  0xf9   : > { %v3939_v45 = vpop.permute.xlu2 %1250  ;;  %v2547_v49 = vadd.f32 %v2546_v40, %v2292_v44  ;;  %v2970_v44 = vunpack.c.h.bf16 %v3394_v16 }
  0xfa   : > { %v1201_v46 = vpop.permute.xlu1 %1200  ;;  %v1196_v48 = vpop.permute.xlu0 %1195 }
  0xfb   : > { %v2293_v36 = vmul.f32 %v2946_v41, %v1196_v48  ;;  %v2294_v54 = vmul.f32 %v2949_v47, %v1201_v46  ;;  %v811_v41 = vld [vmem:[%s4720_s1 + $0x318] sm:$0xff]  ;;  %v3395_v47 = vld [vmem:[%s3735_s11 + $0xe8] sm:$0xff]   ;;  %v2304_v46 = vmul.f32 %v2969_v25, %v3939_v45 }
  0xfc   : > { %v815_v45 = vld [vmem:[%s4720_s1 + $0x338] sm:$0xff] }
  0xfd   : > { %v2548_v55 = vadd.f32 %v2547_v49, %v2293_v36  ;;  %v2973_v49 = vunpack.c.l.bf16 %v3395_v47 }
  0xff   : > { %v2549_v58 = vadd.f32 %v2548_v55, %v2294_v54  ;;  %1430 = vperm.xlu2 %3521, %v804_v51   ;;  %v816_v54 = vld [vmem:[%s4720_s1 + $0x340] sm:$0xff]  ;;  %v3396_v55 = vld [vmem:[%s3735_s11 + $0xf0] sm:$0xff]  }
 0x100   : > { %1425 = vperm.xlu1 %3520, %v803_v42   ;;  %1420 = vperm.xlu0 %3519, %v802_v57   ;;  %v2974_v42 = vunpack.c.h.bf16 %v3395_v47 }
 0x101   : > { %v3952_v63 = vpop.permute.xlu2 %1265  ;;  %v2550_v53 = vadd.f32 %v2549_v58, %v2295_v62 }
 0x102   : > { %v1216_v1 = vpop.permute.xlu1 %1215  ;;  %v1211_v2 = vpop.permute.xlu0 %1210  ;;  %v2307_v50 = vmul.f32 %v2974_v42, %v3952_v63  ;;  %v818_v63 = vld [vmem:[%s4720_s1 + $0x350] sm:$0xff] }
 0x103   : > { %v2296_v3 = vmul.f32 %v2953_v60, %v1211_v2  ;;  %v2297_v5 = vmul.f32 %v2954_v0, %v1216_v1  ;;  %v814_v60 = vld [vmem:[%s4720_s1 + $0x330] sm:$0xff]  ;;  %v2977_v0 = vunpack.c.l.bf16 %v3396_v55  ;;  %v2978_v2 = vunpack.c.h.bf16 %v3396_v55 }
 0x105   : > { %v2551_v7 = vadd.f32 %v2550_v53, %v2296_v3  ;;  %v3397_v53 = vld [vmem:[%s3735_s11 + $0xf8] sm:$0xff]  }
 0x107   : > { %v2552_v10 = vadd.f32 %v2551_v7, %v2297_v5  ;;  %1445 = vperm.xlu2 %3521, %v807_v4   ;;  %v819_v7 = vld [vmem:[%s4720_s1 + $0x358] sm:$0xff] }
 0x108   : > { %1440 = vperm.xlu1 %3520, %v806_v59   ;;  %1435 = vperm.xlu0 %3519, %v805_v8   ;;  %v2981_v59 = vunpack.c.l.bf16 %v3397_v53 }
 0x109   : > { %v3966_v15 = vpop.permute.xlu2 %1280  ;;  %v2553_v19 = vadd.f32 %v2552_v10, %v2298_v14  ;;  %v2982_v14 = vunpack.c.h.bf16 %v3397_v53 }
 0x10a   : > { %v1231_v61 = vpop.permute.xlu1 %1230  ;;  %v1226_v18 = vpop.permute.xlu0 %1225 }
 0x10b   : > { %v2299_v6 = vmul.f32 %v2958_v11, %v1226_v18  ;;  %v2300_v23 = vmul.f32 %v2961_v17, %v1231_v61  ;;  %v817_v11 = vld [vmem:[%s4720_s1 + $0x348] sm:$0xff]  ;;  %v3398_v17 = vld [vmem:[%s3735_s11 + $0x100] sm:$0xff]   ;;  %v2310_v61 = vmul.f32 %v2981_v59, %v3966_v15 }
 0x10c   : > { %v821_v15 = vld [vmem:[%s4720_s1 + $0x368] sm:$0xff] }
 0x10d   : > { %v2554_v24 = vadd.f32 %v2553_v19, %v2299_v6  ;;  %v2985_v19 = vunpack.c.l.bf16 %v3398_v17 }
 0x10f   : > { %v2555_v27 = vadd.f32 %v2554_v24, %v2300_v23  ;;  %1460 = vperm.xlu2 %3521, %v810_v20   ;;  %v822_v23 = vld [vmem:[%s4720_s1 + $0x370] sm:$0xff]  ;;  %v3399_v24 = vld [vmem:[%s3735_s11 + $0x108] sm:$0xff]  }
 0x110   : > { %1455 = vperm.xlu1 %3520, %v809_v12   ;;  %1450 = vperm.xlu0 %3519, %v808_v26   ;;  %v2986_v12 = vunpack.c.h.bf16 %v3398_v17 }
 0x111   : > { %v3979_v31 = vpop.permute.xlu2 %1295  ;;  %v2556_v22 = vadd.f32 %v2555_v27, %v2301_v30 }
 0x112   : > { %v1246_v33 = vpop.permute.xlu1 %1245  ;;  %v1241_v34 = vpop.permute.xlu0 %1240  ;;  %v2313_v16 = vmul.f32 %v2986_v12, %v3979_v31  ;;  %v824_v31 = vld [vmem:[%s4720_s1 + $0x380] sm:$0xff] }
 0x113   : > { %v2302_v35 = vmul.f32 %v2965_v29, %v1241_v34  ;;  %v2303_v38 = vmul.f32 %v2966_v32, %v1246_v33  ;;  %v820_v29 = vld [vmem:[%s4720_s1 + $0x360] sm:$0xff]  ;;  %v2989_v32 = vunpack.c.l.bf16 %v3399_v24  ;;  %v2990_v34 = vunpack.c.h.bf16 %v3399_v24 }
 0x115   : > { %v2557_v40 = vadd.f32 %v2556_v22, %v2302_v35  ;;  %v3400_v22 = vld [vmem:[%s3735_s11 + $0x110] sm:$0xff]  }
 0x117   : > { %v2558_v43 = vadd.f32 %v2557_v40, %v2303_v38  ;;  %1475 = vperm.xlu2 %3521, %v813_v37   ;;  %v825_v40 = vld [vmem:[%s4720_s1 + $0x388] sm:$0xff] }
 0x118   : > { %1470 = vperm.xlu1 %3520, %v812_v28   ;;  %1465 = vperm.xlu0 %3519, %v811_v41   ;;  %v2993_v28 = vunpack.c.l.bf16 %v3400_v22 }
 0x119   : > { %v3993_v48 = vpop.permute.xlu2 %1310  ;;  %v2559_v52 = vadd.f32 %v2558_v43, %v2304_v46  ;;  %v2994_v46 = vunpack.c.h.bf16 %v3400_v22 }
 0x11a   : > { %v1261_v36 = vpop.permute.xlu1 %1260  ;;  %v1256_v51 = vpop.permute.xlu0 %1255 }
 0x11b   : > { %v2305_v39 = vmul.f32 %v2970_v44, %v1256_v51  ;;  %v2306_v57 = vmul.f32 %v2973_v49, %v1261_v36  ;;  %v823_v44 = vld [vmem:[%s4720_s1 + $0x378] sm:$0xff]  ;;  %v2316_v36 = vmul.f32 %v2993_v28, %v3993_v48 }
 0x11c   : > { %v3401_v49 = vld [vmem:[%s3735_s11 + $0x118] sm:$0xff]  }
 0x11d   : > { %v2560_v58 = vadd.f32 %v2559_v52, %v2305_v39  ;;  %v2997_v52 = vunpack.c.l.bf16 %v3401_v49  ;;  %v827_v48 = vld [vmem:[%s4720_s1 + $0x398] sm:$0xff] }
 0x11f   : > { %v2561_v62 = vadd.f32 %v2560_v58, %v2306_v57  ;;  %1490 = vperm.xlu2 %3521, %v816_v54   ;;  %v828_v57 = vld [vmem:[%s4720_s1 + $0x3a0] sm:$0xff] }
 0x120   : > { %1485 = vperm.xlu1 %3520, %v815_v45   ;;  %1480 = vperm.xlu0 %3519, %v814_v60   ;;  %v3402_v58 = vld [vmem:[%s3735_s11 + $0x120] sm:$0xff]   ;;  %v2998_v45 = vunpack.c.h.bf16 %v3401_v49 }
 0x121   : > { %v4006_v1 = vpop.permute.xlu2 %1325  ;;  %v2562_v56 = vadd.f32 %v2561_v62, %v2307_v50 }
 0x122   : > { %v1276_v3 = vpop.permute.xlu1 %1275  ;;  %v1271_v4 = vpop.permute.xlu0 %1270  ;;  %v2319_v53 = vmul.f32 %v2998_v45, %v4006_v1  ;;  %v830_v1 = vld [vmem:[%s4720_s1 + $0x3b0] sm:$0xff] }
 0x123   : > { %v2308_v5 = vmul.f32 %v2977_v0, %v1271_v4  ;;  %v2309_v8 = vmul.f32 %v2978_v2, %v1276_v3  ;;  %v826_v0 = vld [vmem:[%s4720_s1 + $0x390] sm:$0xff]  ;;  %v3001_v2 = vunpack.c.l.bf16 %v3402_v58  ;;  %v3002_v4 = vunpack.c.h.bf16 %v3402_v58 }
 0x125   : > { %v2563_v10 = vadd.f32 %v2562_v56, %v2308_v5  ;;  %v3403_v56 = vld [vmem:[%s3735_s11 + $0x128] sm:$0xff]  }
 0x127   : > { %v2564_v13 = vadd.f32 %v2563_v10, %v2309_v8  ;;  %1505 = vperm.xlu2 %3521, %v819_v7   ;;  %v831_v10 = vld [vmem:[%s4720_s1 + $0x3b8] sm:$0xff] }
 0x128   : > { %1500 = vperm.xlu1 %3520, %v818_v63   ;;  %1495 = vperm.xlu0 %3519, %v817_v11   ;;  %v3005_v63 = vunpack.c.l.bf16 %v3403_v56 }
 0x129   : > { %v4020_v18 = vpop.permute.xlu2 %1340  ;;  %v2565_v21 = vadd.f32 %v2564_v13, %v2310_v61  ;;  %v3006_v61 = vunpack.c.h.bf16 %v3403_v56 }
 0x12a   : > { %v1291_v6 = vpop.permute.xlu1 %1290  ;;  %v1286_v20 = vpop.permute.xlu0 %1285 }
 0x12b   : > { %v2311_v9 = vmul.f32 %v2982_v14, %v1286_v20  ;;  %v2312_v26 = vmul.f32 %v2985_v19, %v1291_v6  ;;  %v829_v14 = vld [vmem:[%s4720_s1 + $0x3a8] sm:$0xff]  ;;  %v3404_v19 = vld [vmem:[%s3735_s11 + $0x130] sm:$0xff]   ;;  %v2322_v6 = vmul.f32 %v3005_v63, %v4020_v18 }
 0x12c   : > { %v833_v18 = vld [vmem:[%s4720_s1 + $0x3c8] sm:$0xff] }
 0x12d   : > { %v2566_v27 = vadd.f32 %v2565_v21, %v2311_v9  ;;  %v3009_v21 = vunpack.c.l.bf16 %v3404_v19 }
 0x12f   : > { %v2567_v30 = vadd.f32 %v2566_v27, %v2312_v26  ;;  %1520 = vperm.xlu2 %3521, %v822_v23   ;;  %v834_v26 = vld [vmem:[%s4720_s1 + $0x3d0] sm:$0xff]  ;;  %v3405_v27 = vld [vmem:[%s3735_s11 + $0x138] sm:$0xff]  }
 0x130   : > { %1515 = vperm.xlu1 %3520, %v821_v15   ;;  %1510 = vperm.xlu0 %3519, %v820_v29   ;;  %v3010_v15 = vunpack.c.h.bf16 %v3404_v19 }
 0x131   : > { %v4033_v33 = vpop.permute.xlu2 %1355  ;;  %v2568_v25 = vadd.f32 %v2567_v30, %v2313_v16 }
 0x132   : > { %v1306_v35 = vpop.permute.xlu1 %1305  ;;  %v1301_v37 = vpop.permute.xlu0 %1300  ;;  %v2325_v22 = vmul.f32 %v3010_v15, %v4033_v33  ;;  %v836_v33 = vld [vmem:[%s4720_s1 + $0x3e0] sm:$0xff] }
 0x133   : > { %v2314_v38 = vmul.f32 %v2989_v32, %v1301_v37  ;;  %v2315_v41 = vmul.f32 %v2990_v34, %v1306_v35  ;;  %v832_v32 = vld [vmem:[%s4720_s1 + $0x3c0] sm:$0xff]  ;;  %v3013_v34 = vunpack.c.l.bf16 %v3405_v27  ;;  %v3014_v37 = vunpack.c.h.bf16 %v3405_v27 }
 0x135   : > { %v2569_v43 = vadd.f32 %v2568_v25, %v2314_v38  ;;  %v3406_v25 = vld [vmem:[%s3735_s11 + $0x140] sm:$0xff]  }
 0x137   : > { %v2570_v47 = vadd.f32 %v2569_v43, %v2315_v41  ;;  %1535 = vperm.xlu2 %3521, %v825_v40   ;;  %v837_v43 = vld [vmem:[%s4720_s1 + $0x3e8] sm:$0xff] }
 0x138   : > { %1530 = vperm.xlu1 %3520, %v824_v31   ;;  %1525 = vperm.xlu0 %3519, %v823_v44   ;;  %v3017_v31 = vunpack.c.l.bf16 %v3406_v25 }
 0x139   : > { %v4047_v51 = vpop.permute.xlu2 %1370  ;;  %v2571_v55 = vadd.f32 %v2570_v47, %v2316_v36  ;;  %v3018_v36 = vunpack.c.h.bf16 %v3406_v25 }
 0x13a   : > { %v1321_v39 = vpop.permute.xlu1 %1320  ;;  %v1316_v54 = vpop.permute.xlu0 %1315 }
 0x13b   : > { %v2317_v42 = vmul.f32 %v2994_v46, %v1316_v54  ;;  %v2318_v60 = vmul.f32 %v2997_v52, %v1321_v39  ;;  %v835_v46 = vld [vmem:[%s4720_s1 + $0x3d8] sm:$0xff]  ;;  %v3407_v52 = vld [vmem:[%s3735_s11 + $0x148] sm:$0xff]   ;;  %v2328_v39 = vmul.f32 %v3017_v31, %v4047_v51 }
 0x13c   : > { %v839_v51 = vld [vmem:[%s4720_s1 + $0x3f8] sm:$0xff] }
 0x13d   : > { %v2572_v62 = vadd.f32 %v2571_v55, %v2317_v42  ;;  %v3021_v55 = vunpack.c.l.bf16 %v3407_v52 }
 0x13f   : > { %v2573_v50 = vadd.f32 %v2572_v62, %v2318_v60  ;;  %1550 = vperm.xlu2 %3521, %v828_v57   ;;  %v840_v60 = vld [vmem:[%s4720_s1 + $0x400] sm:$0xff]  ;;  %v3408_v62 = vld [vmem:[%s3735_s11 + $0x150] sm:$0xff]  }
 0x140   : > { %1545 = vperm.xlu1 %3520, %v827_v48   ;;  %1540 = vperm.xlu0 %3519, %v826_v0   ;;  %v3022_v48 = vunpack.c.h.bf16 %v3407_v52 }
 0x141   : > { %v4060_v3 = vpop.permute.xlu2 %1385  ;;  %v2574_v59 = vadd.f32 %v2573_v50, %v2319_v53 }
 0x142   : > { %v1336_v5 = vpop.permute.xlu1 %1335  ;;  %v1331_v7 = vpop.permute.xlu0 %1330  ;;  %v2331_v56 = vmul.f32 %v3022_v48, %v4060_v3  ;;  %v842_v3 = vld [vmem:[%s4720_s1 + $0x410] sm:$0xff] }
 0x143   : > { %v2320_v8 = vmul.f32 %v3001_v2, %v1331_v7  ;;  %v2321_v11 = vmul.f32 %v3002_v4, %v1336_v5  ;;  %v838_v2 = vld [vmem:[%s4720_s1 + $0x3f0] sm:$0xff]  ;;  %v3025_v4 = vunpack.c.l.bf16 %v3408_v62  ;;  %v3026_v7 = vunpack.c.h.bf16 %v3408_v62 }
 0x145   : > { %v2575_v13 = vadd.f32 %v2574_v59, %v2320_v8  ;;  %v3409_v59 = vld [vmem:[%s3735_s11 + $0x158] sm:$0xff]  }
 0x147   : > { %v2576_v17 = vadd.f32 %v2575_v13, %v2321_v11  ;;  %1565 = vperm.xlu2 %3521, %v831_v10   ;;  %v843_v13 = vld [vmem:[%s4720_s1 + $0x418] sm:$0xff] }
 0x148   : > { %1560 = vperm.xlu1 %3520, %v830_v1   ;;  %1555 = vperm.xlu0 %3519, %v829_v14   ;;  %v3029_v1 = vunpack.c.l.bf16 %v3409_v59 }
 0x149   : > { %v4074_v20 = vpop.permute.xlu2 %1400  ;;  %v2577_v24 = vadd.f32 %v2576_v17, %v2322_v6  ;;  %v3030_v6 = vunpack.c.h.bf16 %v3409_v59 }
 0x14a   : > { %v1351_v9 = vpop.permute.xlu1 %1350  ;;  %v1346_v23 = vpop.permute.xlu0 %1345 }
 0x14b   : > { %v2323_v12 = vmul.f32 %v3006_v61, %v1346_v23  ;;  %v2324_v29 = vmul.f32 %v3009_v21, %v1351_v9  ;;  %v841_v61 = vld [vmem:[%s4720_s1 + $0x408] sm:$0xff]  ;;  %v3410_v21 = vld [vmem:[%s3735_s11 + $0x160] sm:$0xff]   ;;  %v2334_v9 = vmul.f32 %v3029_v1, %v4074_v20 }
 0x14c   : > { %v845_v20 = vld [vmem:[%s4720_s1 + $0x428] sm:$0xff] }
 0x14d   : > { %v2578_v30 = vadd.f32 %v2577_v24, %v2323_v12  ;;  %v3033_v24 = vunpack.c.l.bf16 %v3410_v21 }
 0x14f   : > { %v2579_v16 = vadd.f32 %v2578_v30, %v2324_v29  ;;  %1580 = vperm.xlu2 %3521, %v834_v26   ;;  %v846_v29 = vld [vmem:[%s4720_s1 + $0x430] sm:$0xff]  ;;  %v3411_v30 = vld [vmem:[%s3735_s11 + $0x168] sm:$0xff]  }
 0x150   : > { %1575 = vperm.xlu1 %3520, %v833_v18   ;;  %1570 = vperm.xlu0 %3519, %v832_v32   ;;  %v3034_v18 = vunpack.c.h.bf16 %v3410_v21 }
 0x151   : > { %v4087_v35 = vpop.permute.xlu2 %1415  ;;  %v2580_v28 = vadd.f32 %v2579_v16, %v2325_v22 }
 0x152   : > { %v1366_v38 = vpop.permute.xlu1 %1365  ;;  %v1361_v40 = vpop.permute.xlu0 %1360  ;;  %v2337_v25 = vmul.f32 %v3034_v18, %v4087_v35  ;;  %v848_v35 = vld [vmem:[%s4720_s1 + $0x440] sm:$0xff] }
 0x153   : > { %v2326_v41 = vmul.f32 %v3013_v34, %v1361_v40  ;;  %v2327_v44 = vmul.f32 %v3014_v37, %v1366_v38  ;;  %v844_v34 = vld [vmem:[%s4720_s1 + $0x420] sm:$0xff]  ;;  %v3037_v37 = vunpack.c.l.bf16 %v3411_v30  ;;  %v3038_v40 = vunpack.c.h.bf16 %v3411_v30 }
 0x155   : > { %v2581_v47 = vadd.f32 %v2580_v28, %v2326_v41  ;;  %v3412_v28 = vld [vmem:[%s3735_s11 + $0x170] sm:$0xff]  }
 0x157   : > { %v2582_v49 = vadd.f32 %v2581_v47, %v2327_v44  ;;  %1595 = vperm.xlu2 %3521, %v837_v43   ;;  %v849_v47 = vld [vmem:[%s4720_s1 + $0x448] sm:$0xff] }
 0x158   : > { %1590 = vperm.xlu1 %3520, %v836_v33   ;;  %1585 = vperm.xlu0 %3519, %v835_v46   ;;  %v3041_v33 = vunpack.c.l.bf16 %v3412_v28 }
 0x159   : > { %v4101_v54 = vpop.permute.xlu2 %1430  ;;  %v2583_v58 = vadd.f32 %v2582_v49, %v2328_v39  ;;  %v3042_v39 = vunpack.c.h.bf16 %v3412_v28 }
 0x15a   : > { %v1381_v42 = vpop.permute.xlu1 %1380  ;;  %v1376_v57 = vpop.permute.xlu0 %1375 }
 0x15b   : > { %v2329_v45 = vmul.f32 %v3018_v36, %v1376_v57  ;;  %v2330_v0 = vmul.f32 %v3021_v55, %v1381_v42  ;;  %v847_v36 = vld [vmem:[%s4720_s1 + $0x438] sm:$0xff]  ;;  %v2340_v42 = vmul.f32 %v3041_v33, %v4101_v54 }
 0x15c   : > { %v3413_v55 = vld [vmem:[%s3735_s11 + $0x178] sm:$0xff]  }
 0x15d   : > { %v2584_v50 = vadd.f32 %v2583_v58, %v2329_v45  ;;  %v3045_v58 = vunpack.c.l.bf16 %v3413_v55  ;;  %v851_v54 = vld [vmem:[%s4720_s1 + $0x458] sm:$0xff] }
 0x15f   : > { %v2585_v53 = vadd.f32 %v2584_v50, %v2330_v0  ;;  %1610 = vperm.xlu2 %3521, %v840_v60   ;;  %v852_v0 = vld [vmem:[%s4720_s1 + $0x460] sm:$0xff] }
 0x160   : > { %1605 = vperm.xlu1 %3520, %v839_v51   ;;  %1600 = vperm.xlu0 %3519, %v838_v2   ;;  %v3414_v50 = vld [vmem:[%s3735_s11 + $0x180] sm:$0xff]   ;;  %v3046_v51 = vunpack.c.h.bf16 %v3413_v55 }
 0x161   : > { %v4114_v5 = vpop.permute.xlu2 %1445  ;;  %v2586_v63 = vadd.f32 %v2585_v53, %v2331_v56 }
 0x162   : > { %v1396_v8 = vpop.permute.xlu1 %1395  ;;  %v1391_v10 = vpop.permute.xlu0 %1390  ;;  %v2343_v59 = vmul.f32 %v3046_v51, %v4114_v5  ;;  %v854_v5 = vld [vmem:[%s4720_s1 + $0x470] sm:$0xff] }
 0x163   : > { %v2332_v11 = vmul.f32 %v3025_v4, %v1391_v10  ;;  %v2333_v14 = vmul.f32 %v3026_v7, %v1396_v8  ;;  %v850_v4 = vld [vmem:[%s4720_s1 + $0x450] sm:$0xff]  ;;  %v3049_v7 = vunpack.c.l.bf16 %v3414_v50  ;;  %v3050_v10 = vunpack.c.h.bf16 %v3414_v50 }
 0x165   : > { %v2587_v17 = vadd.f32 %v2586_v63, %v2332_v11  ;;  %v3415_v63 = vld [vmem:[%s3735_s11 + $0x188] sm:$0xff]  }
 0x167   : > { %v2588_v19 = vadd.f32 %v2587_v17, %v2333_v14  ;;  %1625 = vperm.xlu2 %3521, %v843_v13   ;;  %v855_v17 = vld [vmem:[%s4720_s1 + $0x478] sm:$0xff] }
 0x168   : > { %1620 = vperm.xlu1 %3520, %v842_v3   ;;  %1615 = vperm.xlu0 %3519, %v841_v61   ;;  %v3053_v3 = vunpack.c.l.bf16 %v3415_v63 }
 0x169   : > { %v4128_v23 = vpop.permute.xlu2 %1460  ;;  %v2589_v27 = vadd.f32 %v2588_v19, %v2334_v9  ;;  %v3054_v9 = vunpack.c.h.bf16 %v3415_v63 }
 0x16a   : > { %v1411_v12 = vpop.permute.xlu1 %1410  ;;  %v1406_v26 = vpop.permute.xlu0 %1405 }
 0x16b   : > { %v2335_v15 = vmul.f32 %v3030_v6, %v1406_v26  ;;  %v2336_v32 = vmul.f32 %v3033_v24, %v1411_v12  ;;  %v853_v6 = vld [vmem:[%s4720_s1 + $0x468] sm:$0xff]  ;;  %v3416_v24 = vld [vmem:[%s3735_s11 + $0x190] sm:$0xff]   ;;  %v2346_v12 = vmul.f32 %v3053_v3, %v4128_v23 }
 0x16c   : > { %v857_v23 = vld [vmem:[%s4720_s1 + $0x488] sm:$0xff] }
 0x16d   : > { %v2590_v16 = vadd.f32 %v2589_v27, %v2335_v15  ;;  %v3057_v27 = vunpack.c.l.bf16 %v3416_v24 }
 0x16f   : > { %v2591_v22 = vadd.f32 %v2590_v16, %v2336_v32  ;;  %1640 = vperm.xlu2 %3521, %v846_v29   ;;  %v858_v32 = vld [vmem:[%s4720_s1 + $0x490] sm:$0xff]  ;;  %v3417_v16 = vld [vmem:[%s3735_s11 + $0x198] sm:$0xff]  }
 0x170   : > { %1635 = vperm.xlu1 %3520, %v845_v20   ;;  %1630 = vperm.xlu0 %3519, %v844_v34   ;;  %v3058_v20 = vunpack.c.h.bf16 %v3416_v24 }
 0x171   : > { %v4141_v38 = vpop.permute.xlu2 %1475  ;;  %v2592_v31 = vadd.f32 %v2591_v22, %v2337_v25 }
 0x172   : > { %v1426_v41 = vpop.permute.xlu1 %1425  ;;  %v1421_v43 = vpop.permute.xlu0 %1420  ;;  %v2349_v28 = vmul.f32 %v3058_v20, %v4141_v38  ;;  %v860_v38 = vld [vmem:[%s4720_s1 + $0x4a0] sm:$0xff] }
 0x173   : > { %v2338_v44 = vmul.f32 %v3037_v37, %v1421_v43  ;;  %v2339_v46 = vmul.f32 %v3038_v40, %v1426_v41  ;;  %v856_v37 = vld [vmem:[%s4720_s1 + $0x480] sm:$0xff]  ;;  %v3061_v40 = vunpack.c.l.bf16 %v3417_v16  ;;  %v3062_v43 = vunpack.c.h.bf16 %v3417_v16 }
 0x175   : > { %v2593_v49 = vadd.f32 %v2592_v31, %v2338_v44  ;;  %v3418_v31 = vld [vmem:[%s3735_s11 + $0x1a0] sm:$0xff]  }
 0x177   : > { %v2594_v52 = vadd.f32 %v2593_v49, %v2339_v46  ;;  %1655 = vperm.xlu2 %3521, %v849_v47   ;;  %v861_v49 = vld [vmem:[%s4720_s1 + $0x4a8] sm:$0xff] }
 0x178   : > { %1650 = vperm.xlu1 %3520, %v848_v35   ;;  %1645 = vperm.xlu0 %3519, %v847_v36   ;;  %v3065_v35 = vunpack.c.l.bf16 %v3418_v31 }
 0x179   : > { %v4155_v57 = vpop.permute.xlu2 %1490  ;;  %v2595_v62 = vadd.f32 %v2594_v52, %v2340_v42  ;;  %v3066_v42 = vunpack.c.h.bf16 %v3418_v31 }
 0x17a   : > { %v1441_v45 = vpop.permute.xlu1 %1440  ;;  %v1436_v60 = vpop.permute.xlu0 %1435 }
 0x17b   : > { %v2341_v48 = vmul.f32 %v3042_v39, %v1436_v60  ;;  %v2342_v2 = vmul.f32 %v3045_v58, %v1441_v45  ;;  %v859_v39 = vld [vmem:[%s4720_s1 + $0x498] sm:$0xff]  ;;  %v3419_v58 = vld [vmem:[%s3735_s11 + $0x1a8] sm:$0xff]   ;;  %v2352_v45 = vmul.f32 %v3065_v35, %v4155_v57 }
 0x17c   : > { %v863_v57 = vld [vmem:[%s4720_s1 + $0x4b8] sm:$0xff] }
 0x17d   : > { %v2596_v53 = vadd.f32 %v2595_v62, %v2341_v48  ;;  %v3069_v62 = vunpack.c.l.bf16 %v3419_v58 }
 0x17f   : > { %v2597_v56 = vadd.f32 %v2596_v53, %v2342_v2  ;;  %1670 = vperm.xlu2 %3521, %v852_v0   ;;  %v864_v2 = vld [vmem:[%s4720_s1 + $0x4c0] sm:$0xff]  ;;  %v3420_v53 = vld [vmem:[%s3735_s11 + $0x1b0] sm:$0xff]  }
 0x180   : > { %1665 = vperm.xlu1 %3520, %v851_v54   ;;  %1660 = vperm.xlu0 %3519, %v850_v4   ;;  %v3070_v54 = vunpack.c.h.bf16 %v3419_v58 }
 0x181   : > { %v4168_v8 = vpop.permute.xlu2 %1505  ;;  %v2598_v1 = vadd.f32 %v2597_v56, %v2343_v59 }
 0x182   : > { %v1456_v11 = vpop.permute.xlu1 %1455  ;;  %v1451_v13 = vpop.permute.xlu0 %1450  ;;  %v2355_v63 = vmul.f32 %v3070_v54, %v4168_v8  ;;  %v866_v8 = vld [vmem:[%s4720_s1 + $0x4d0] sm:$0xff] }
 0x183   : > { %v2344_v14 = vmul.f32 %v3049_v7, %v1451_v13  ;;  %v2345_v61 = vmul.f32 %v3050_v10, %v1456_v11  ;;  %v862_v7 = vld [vmem:[%s4720_s1 + $0x4b0] sm:$0xff]  ;;  %v3073_v10 = vunpack.c.l.bf16 %v3420_v53  ;;  %v3074_v13 = vunpack.c.h.bf16 %v3420_v53 }
 0x185   : > { %v2599_v19 = vadd.f32 %v2598_v1, %v2344_v14  ;;  %v3421_v1 = vld [vmem:[%s3735_s11 + $0x1b8] sm:$0xff]  }
 0x187   : > { %v2600_v21 = vadd.f32 %v2599_v19, %v2345_v61  ;;  %1685 = vperm.xlu2 %3521, %v855_v17   ;;  %v867_v19 = vld [vmem:[%s4720_s1 + $0x4d8] sm:$0xff] }
 0x188   : > { %1680 = vperm.xlu1 %3520, %v854_v5   ;;  %1675 = vperm.xlu0 %3519, %v853_v6   ;;  %v3077_v5 = vunpack.c.l.bf16 %v3421_v1 }
 0x189   : > { %v4182_v26 = vpop.permute.xlu2 %1520  ;;  %v2601_v30 = vadd.f32 %v2600_v21, %v2346_v12  ;;  %v3078_v12 = vunpack.c.h.bf16 %v3421_v1 }
 0x18a   : > { %v1471_v15 = vpop.permute.xlu1 %1470  ;;  %v1466_v29 = vpop.permute.xlu0 %1465 }
 0x18b   : > { %v2347_v18 = vmul.f32 %v3054_v9, %v1466_v29  ;;  %v2348_v34 = vmul.f32 %v3057_v27, %v1471_v15  ;;  %v865_v9 = vld [vmem:[%s4720_s1 + $0x4c8] sm:$0xff]  ;;  %v3422_v27 = vld [vmem:[%s3735_s11 + $0x1c0] sm:$0xff]   ;;  %v2358_v15 = vmul.f32 %v3077_v5, %v4182_v26 }
 0x18c   : > { %v3082_v16 = vunpack.c.h.bf16 %v3422_v27  ;;  %v869_v26 = vld [vmem:[%s4720_s1 + $0x4e8] sm:$0xff] }
 0x18d   : > { %v2602_v22 = vadd.f32 %v2601_v30, %v2347_v18  ;;  %v3081_v30 = vunpack.c.l.bf16 %v3422_v27 }
 0x18f   : > { %v2603_v25 = vadd.f32 %v2602_v22, %v2348_v34  ;;  %1700 = vperm.xlu2 %3521, %v858_v32   ;;  %v870_v22 = vld [vmem:[%s4720_s1 + $0x4f0] sm:$0xff] }
 0x190   : > { %1695 = vperm.xlu1 %3520, %v857_v23   ;;  %1690 = vperm.xlu0 %3519, %v856_v37   ;;  %v3423_v23 = vld [vmem:[%s3735_s11 + $0x1c8] sm:$0xff]  }
 0x191   : > { %v4195_v41 = vpop.permute.xlu2 %1535  ;;  %v2604_v33 = vadd.f32 %v2603_v25, %v2349_v28  ;;  %v3085_v31 = vunpack.c.l.bf16 %v3423_v23 }
 0x192   : > { %v1486_v44 = vpop.permute.xlu1 %1485  ;;  %v1481_v47 = vpop.permute.xlu0 %1480  ;;  %v2361_v28 = vmul.f32 %v3082_v16, %v4195_v41 }
 0x193   : > { %v2350_v46 = vmul.f32 %v3061_v40, %v1481_v47  ;;  %v2351_v36 = vmul.f32 %v3062_v43, %v1486_v44  ;;  %v868_v40 = vld [vmem:[%s4720_s1 + $0x4e0] sm:$0xff]  ;;  %v3424_v44 = vld [vmem:[%s3735_s11 + $0x1d0] sm:$0xff]  }
 0x195   : > { %v2605_v52 = vadd.f32 %v2604_v33, %v2350_v46  ;;  %v3086_v46 = vunpack.c.h.bf16 %v3423_v23 }
 0x197   : > { %v2606_v55 = vadd.f32 %v2605_v52, %v2351_v36  ;;  %1715 = vperm.xlu2 %3521, %v861_v49   ;;  %v3089_v36 = vunpack.c.l.bf16 %v3424_v44 }
 0x198   : > { %1710 = vperm.xlu1 %3520, %v860_v38   ;;  %1705 = vperm.xlu0 %3519, %v859_v39   ;;  %v873_v38 = vld [vmem:[%s4720_s1 + $0x508] sm:$0xff] }
 0x199   : > { %v4209_v60 = vpop.permute.xlu2 %1550  ;;  %v2607_v50 = vadd.f32 %v2606_v55, %v2352_v45  ;;  %v872_v55 = vld [vmem:[%s4720_s1 + $0x500] sm:$0xff] }
 0x19a   : > { %v1501_v48 = vpop.permute.xlu1 %1500  ;;  %v1496_v0 = vpop.permute.xlu0 %1495  ;;  %v2364_v58 = vmul.f32 %v3089_v36, %v4209_v60  ;;  %v3426_v60 = vld [vmem:[%s3735_s11 + $0x1e0] sm:$0xff]  }
 0x19b   : > { %v2353_v51 = vmul.f32 %v3066_v42, %v1496_v0  ;;  %v2354_v4 = vmul.f32 %v3069_v62, %v1501_v48  ;;  %v871_v42 = vld [vmem:[%s4720_s1 + $0x4f8] sm:$0xff]  ;;  %v3090_v62 = vunpack.c.h.bf16 %v3424_v44  ;;  %v3097_v1 = vunpack.c.l.bf16 %v3426_v60 }
 0x19c   : > { %v3425_v48 = vld [vmem:[%s3735_s11 + $0x1d8] sm:$0xff]  }
 0x19d   : > { %v2608_v56 = vadd.f32 %v2607_v50, %v2353_v51  ;;  %v3093_v51 = vunpack.c.l.bf16 %v3425_v48  ;;  %v3094_v54 = vunpack.c.h.bf16 %v3425_v48 }
 0x19f   : > { %v2609_v59 = vadd.f32 %v2608_v56, %v2354_v4  ;;  %1730 = vperm.xlu2 %3521, %v864_v2   ;;  %v876_v56 = vld [vmem:[%s4720_s1 + $0x520] sm:$0xff] }
 0x1a0   : > { %1725 = vperm.xlu1 %3520, %v863_v57   ;;  %1720 = vperm.xlu0 %3519, %v862_v7  }
 0x1a1   : > { %v4222_v11 = vpop.permute.xlu2 %1565  ;;  %v2610_v3 = vadd.f32 %v2609_v59, %v2355_v63  ;;  %v875_v59 = vld [vmem:[%s4720_s1 + $0x518] sm:$0xff] }
 0x1a2   : > { %v1516_v14 = vpop.permute.xlu1 %1515  ;;  %v1511_v17 = vpop.permute.xlu0 %1510  ;;  %v2367_v63 = vmul.f32 %v3094_v54, %v4222_v11 }
 0x1a3   : > { %v2356_v61 = vmul.f32 %v3073_v10, %v1511_v17  ;;  %v2357_v6 = vmul.f32 %v3074_v13, %v1516_v14  ;;  %v874_v10 = vld [vmem:[%s4720_s1 + $0x510] sm:$0xff]  ;;  %v3427_v14 = vld [vmem:[%s3735_s11 + $0x1e8] sm:$0xff]  }
 0x1a5   : > { %v2611_v21 = vadd.f32 %v2610_v3, %v2356_v61  ;;  %v3098_v61 = vunpack.c.h.bf16 %v3426_v60 }
 0x1a7   : > { %v2612_v24 = vadd.f32 %v2611_v21, %v2357_v6  ;;  %1745 = vperm.xlu2 %3521, %v867_v19   ;;  %v3101_v6 = vunpack.c.l.bf16 %v3427_v14 }
 0x1a8   : > { %1740 = vperm.xlu1 %3520, %v866_v8   ;;  %1735 = vperm.xlu0 %3519, %v865_v9   ;;  %v879_v8 = vld [vmem:[%s4720_s1 + $0x538] sm:$0xff] }
 0x1a9   : > { %v4236_v29 = vpop.permute.xlu2 %1580  ;;  %v2613_v20 = vadd.f32 %v2612_v24, %v2358_v15  ;;  %v878_v24 = vld [vmem:[%s4720_s1 + $0x530] sm:$0xff] }
 0x1aa   : > { %v1531_v18 = vpop.permute.xlu1 %1530  ;;  %v1526_v32 = vpop.permute.xlu0 %1525  ;;  %v2370_v27 = vmul.f32 %v3101_v6, %v4236_v29  ;;  %v3429_v29 = vld [vmem:[%s3735_s11 + $0x1f8] sm:$0xff]  }
 0x1ab   : > { %v2359_v34 = vmul.f32 %v3078_v12, %v1526_v32  ;;  %v2360_v37 = vmul.f32 %v3081_v30, %v1531_v18  ;;  %v877_v12 = vld [vmem:[%s4720_s1 + $0x528] sm:$0xff]  ;;  %v3102_v30 = vunpack.c.h.bf16 %v3427_v14  ;;  %v3428_v18 = vld [vmem:[%s3735_s11 + $0x1f0] sm:$0xff]   ;;  %v3110_v36 = vunpack.c.h.bf16 %v3429_v29 }
 0x1ac   : > { %v3106_v23 = vunpack.c.h.bf16 %v3428_v18 }
 0x1ad   : > { %v2614_v25 = vadd.f32 %v2613_v20, %v2359_v34  ;;  %v3105_v20 = vunpack.c.l.bf16 %v3428_v18 }
 0x1af   : > { %v2615_v43 = vadd.f32 %v2614_v25, %v2360_v37  ;;  %1760 = vperm.xlu2 %3521, %v870_v22   ;;  %v882_v25 = vld [vmem:[%s4720_s1 + $0x550] sm:$0xff] }
 0x1b0   : > { %1755 = vperm.xlu1 %3520, %v869_v26   ;;  %1750 = vperm.xlu0 %3519, %v868_v40  }
 0x1b1   : > { %v2616_v47 = vadd.f32 %v2615_v43, %v2361_v28  ;;  %v4250_v33 = vpop.permute.xlu2 %1595  ;;  %v881_v28 = vld [vmem:[%s4720_s1 + $0x548] sm:$0xff]  ;;  %v880_v43 = vld [vmem:[%s4720_s1 + $0x540] sm:$0xff] }
 0x1b2   : > { %v1546_v49 = vpop.permute.xlu1 %1545  ;;  %v1541_v35 = vpop.permute.xlu0 %1540 }
 0x1b3   : > { %v2362_v52 = vmul.f32 %v3085_v31, %v1541_v35  ;;  %v2363_v41 = vmul.f32 %v3086_v46, %v1546_v49  ;;  %v2373_v31 = vmul.f32 %v3106_v23, %v4250_v33  ;;  %v3430_v46 = vld [vmem:[%s3735_s11 + $0x200] sm:$0xff]  }
 0x1b5   : > { %v2617_v39 = vadd.f32 %v2616_v47, %v2362_v52  ;;  %v3109_v47 = vunpack.c.l.bf16 %v3429_v29 }
 0x1b7   : > { %v2618_v45 = vadd.f32 %v2617_v39, %v2363_v41  ;;  %1775 = vperm.xlu2 %3521, %v873_v38   ;;  %v3113_v41 = vunpack.c.l.bf16 %v3430_v46 }
 0x1b8   : > { %1770 = vperm.xlu1 %3520, %v872_v55   ;;  %1765 = vperm.xlu0 %3519, %v871_v42   ;;  %v885_v55 = vld [vmem:[%s4720_s1 + $0x568] sm:$0xff] }
 0x1b9   : > { %v2619_v0 = vadd.f32 %v2618_v45, %v2364_v58  ;;  %v4263_v50 = vpop.permute.xlu2 %1610  ;;  %v884_v58 = vld [vmem:[%s4720_s1 + $0x560] sm:$0xff]  ;;  %v883_v45 = vld [vmem:[%s4720_s1 + $0x558] sm:$0xff] }
 0x1ba   : > { %v1561_v2 = vpop.permute.xlu1 %1560  ;;  %v1556_v53 = vpop.permute.xlu0 %1555 }
 0x1bb   : > { %v2365_v4 = vmul.f32 %v3090_v62, %v1556_v53  ;;  %v2366_v57 = vmul.f32 %v3093_v51, %v1561_v2  ;;  %v2376_v62 = vmul.f32 %v3113_v41, %v4263_v50  ;;  %v3431_v51 = vld [vmem:[%s3735_s11 + $0x208] sm:$0xff]   ;;  %v3432_v50 = vld [vmem:[%s3735_s11 + $0x210] sm:$0xff]  }
 0x1bc   : > { %v3117_v54 = vunpack.c.l.bf16 %v3431_v51  ;;  %v3118_v60 = vunpack.c.h.bf16 %v3431_v51  ;;  %v3122_v6 = vunpack.c.h.bf16 %v3432_v50 }
 0x1bd   : > { %v2620_v7 = vadd.f32 %v2619_v0, %v2365_v4  ;;  %v3114_v0 = vunpack.c.h.bf16 %v3430_v46 }
 0x1bf   : > { %v2621_v13 = vadd.f32 %v2620_v7, %v2366_v57  ;;  %1790 = vperm.xlu2 %3521, %v876_v56   ;;  %v888_v7 = vld [vmem:[%s4720_s1 + $0x580] sm:$0xff] }
 0x1c0   : > { %1785 = vperm.xlu1 %3520, %v875_v59   ;;  %1780 = vperm.xlu0 %3519, %v874_v10  }
 0x1c1   : > { %v2622_v17 = vadd.f32 %v2621_v13, %v2367_v63  ;;  %v4277_v3 = vpop.permute.xlu2 %1625  ;;  %v887_v63 = vld [vmem:[%s4720_s1 + $0x578] sm:$0xff]  ;;  %v886_v13 = vld [vmem:[%s4720_s1 + $0x570] sm:$0xff] }
 0x1c2   : > { %v1576_v19 = vpop.permute.xlu1 %1575  ;;  %v1571_v5 = vpop.permute.xlu0 %1570 }
 0x1c3   : > { %v2368_v21 = vmul.f32 %v3097_v1, %v1571_v5  ;;  %v2369_v11 = vmul.f32 %v3098_v61, %v1576_v19  ;;  %v2379_v1 = vmul.f32 %v3118_v60, %v4277_v3  ;;  %v3433_v61 = vld [vmem:[%s3735_s11 + $0x218] sm:$0xff]  }
 0x1c5   : > { %v2623_v9 = vadd.f32 %v2622_v17, %v2368_v21  ;;  %v3121_v17 = vunpack.c.l.bf16 %v3432_v50 }
 0x1c7   : > { %v2624_v15 = vadd.f32 %v2623_v9, %v2369_v11  ;;  %1805 = vperm.xlu2 %3521, %v879_v8   ;;  %v3125_v11 = vunpack.c.l.bf16 %v3433_v61 }
 0x1c8   : > { %1800 = vperm.xlu1 %3520, %v878_v24   ;;  %1795 = vperm.xlu0 %3519, %v877_v12   ;;  %v891_v24 = vld [vmem:[%s4720_s1 + $0x598] sm:$0xff] }
 0x1c9   : > { %v2625_v32 = vadd.f32 %v2624_v15, %v2370_v27  ;;  %v4290_v16 = vpop.permute.xlu2 %1640  ;;  %v890_v27 = vld [vmem:[%s4720_s1 + $0x590] sm:$0xff]  ;;  %v889_v15 = vld [vmem:[%s4720_s1 + $0x588] sm:$0xff] }
 0x1ca   : > { %v1591_v34 = vpop.permute.xlu1 %1590  ;;  %v1586_v22 = vpop.permute.xlu0 %1585 }
 0x1cb   : > { %v2371_v37 = vmul.f32 %v3102_v30, %v1586_v22  ;;  %v2372_v26 = vmul.f32 %v3105_v20, %v1591_v34  ;;  %v2382_v30 = vmul.f32 %v3125_v11, %v4290_v16  ;;  %v3434_v20 = vld [vmem:[%s3735_s11 + $0x220] sm:$0xff]   ;;  %v3435_v16 = vld [vmem:[%s3735_s11 + $0x228] sm:$0xff]  }
 0x1cc   : > { %v3129_v23 = vunpack.c.l.bf16 %v3434_v20  ;;  %v3130_v29 = vunpack.c.h.bf16 %v3434_v20  ;;  %v3134_v41 = vunpack.c.h.bf16 %v3435_v16 }
 0x1cd   : > { %v2626_v40 = vadd.f32 %v2625_v32, %v2371_v37  ;;  %v3126_v32 = vunpack.c.h.bf16 %v3433_v61 }
 0x1cf   : > { %v2627_v44 = vadd.f32 %v2626_v40, %v2372_v26  ;;  %1820 = vperm.xlu2 %3521, %v882_v25   ;;  %v894_v40 = vld [vmem:[%s4720_s1 + $0x5b0] sm:$0xff] }
 0x1d0   : > { %1815 = vperm.xlu1 %3520, %v881_v28   ;;  %1810 = vperm.xlu0 %3519, %v880_v43  }
 0x1d1   : > { %v2628_v49 = vadd.f32 %v2627_v44, %v2373_v31  ;;  %v4304_v35 = vpop.permute.xlu2 %1655  ;;  %v893_v31 = vld [vmem:[%s4720_s1 + $0x5a8] sm:$0xff]  ;;  %v892_v44 = vld [vmem:[%s4720_s1 + $0x5a0] sm:$0xff] }
 0x1d2   : > { %v1606_v52 = vpop.permute.xlu1 %1605  ;;  %v1601_v38 = vpop.permute.xlu0 %1600 }
 0x1d3   : > { %v2374_v39 = vmul.f32 %v3109_v47, %v1601_v38  ;;  %v2375_v33 = vmul.f32 %v3110_v36, %v1606_v52  ;;  %v2385_v47 = vmul.f32 %v3130_v29, %v4304_v35  ;;  %v3436_v36 = vld [vmem:[%s3735_s11 + $0x230] sm:$0xff]  }
 0x1d5   : > { %v2629_v42 = vadd.f32 %v2628_v49, %v2374_v39  ;;  %v3133_v49 = vunpack.c.l.bf16 %v3435_v16 }
 0x1d7   : > { %v2630_v48 = vadd.f32 %v2629_v42, %v2375_v33  ;;  %1835 = vperm.xlu2 %3521, %v885_v55   ;;  %v3137_v33 = vunpack.c.l.bf16 %v3436_v36 }
 0x1d8   : > { %1830 = vperm.xlu1 %3520, %v884_v58   ;;  %1825 = vperm.xlu0 %3519, %v883_v45   ;;  %v897_v58 = vld [vmem:[%s4720_s1 + $0x5c8] sm:$0xff] }
 0x1d9   : > { %v2631_v2 = vadd.f32 %v2630_v48, %v2376_v62  ;;  %v4317_v53 = vpop.permute.xlu2 %1670  ;;  %v896_v62 = vld [vmem:[%s4720_s1 + $0x5c0] sm:$0xff]  ;;  %v895_v48 = vld [vmem:[%s4720_s1 + $0x5b8] sm:$0xff] }
 0x1da   : > { %v1621_v4 = vpop.permute.xlu1 %1620  ;;  %v1616_v56 = vpop.permute.xlu0 %1615 }
 0x1db   : > { %v2377_v57 = vmul.f32 %v3114_v0, %v1616_v56  ;;  %v2378_v59 = vmul.f32 %v3117_v54, %v1621_v4  ;;  %v2388_v0 = vmul.f32 %v3137_v33, %v4317_v53  ;;  %v3437_v54 = vld [vmem:[%s3735_s11 + $0x238] sm:$0xff]   ;;  %v3438_v53 = vld [vmem:[%s3735_s11 + $0x240] sm:$0xff]  }
 0x1dc   : > { %v3141_v60 = vunpack.c.l.bf16 %v3437_v54  ;;  %v3142_v50 = vunpack.c.h.bf16 %v3437_v54  ;;  %v3146_v11 = vunpack.c.h.bf16 %v3438_v53 }
 0x1dd   : > { %v2632_v10 = vadd.f32 %v2631_v2, %v2377_v57  ;;  %v3138_v2 = vunpack.c.h.bf16 %v3436_v36 }
 0x1df   : > { %v2633_v14 = vadd.f32 %v2632_v10, %v2378_v59  ;;  %1850 = vperm.xlu2 %3521, %v888_v7   ;;  %v900_v10 = vld [vmem:[%s4720_s1 + $0x5e0] sm:$0xff] }
 0x1e0   : > { %1845 = vperm.xlu1 %3520, %v887_v63   ;;  %1840 = vperm.xlu0 %3519, %v886_v13  }
 0x1e1   : > { %v2634_v19 = vadd.f32 %v2633_v14, %v2379_v1  ;;  %v4331_v5 = vpop.permute.xlu2 %1685  ;;  %v899_v1 = vld [vmem:[%s4720_s1 + $0x5d8] sm:$0xff]  ;;  %v898_v14 = vld [vmem:[%s4720_s1 + $0x5d0] sm:$0xff] }
 0x1e2   : > { %v1636_v21 = vpop.permute.xlu1 %1635  ;;  %v1631_v8 = vpop.permute.xlu0 %1630 }
 0x1e3   : > { %v2380_v9 = vmul.f32 %v3121_v17, %v1631_v8  ;;  %v2381_v3 = vmul.f32 %v3122_v6, %v1636_v21  ;;  %v2391_v17 = vmul.f32 %v3142_v50, %v4331_v5  ;;  %v3439_v6 = vld [vmem:[%s3735_s11 + $0x248] sm:$0xff]  }
 0x1e5   : > { %v2635_v12 = vadd.f32 %v2634_v19, %v2380_v9  ;;  %v3145_v19 = vunpack.c.l.bf16 %v3438_v53 }
 0x1e7   : > { %v2636_v18 = vadd.f32 %v2635_v12, %v2381_v3  ;;  %1865 = vperm.xlu2 %3521, %v891_v24   ;;  %v3149_v3 = vunpack.c.l.bf16 %v3439_v6 }
 0x1e8   : > { %1860 = vperm.xlu1 %3520, %v890_v27   ;;  %1855 = vperm.xlu0 %3519, %v889_v15   ;;  %v903_v27 = vld [vmem:[%s4720_s1 + $0x5f8] sm:$0xff] }
 0x1e9   : > { %v2637_v34 = vadd.f32 %v2636_v18, %v2382_v30  ;;  %v4344_v22 = vpop.permute.xlu2 %1700  ;;  %v902_v30 = vld [vmem:[%s4720_s1 + $0x5f0] sm:$0xff]  ;;  %v901_v18 = vld [vmem:[%s4720_s1 + $0x5e8] sm:$0xff] }
 0x1ea   : > { %v1651_v37 = vpop.permute.xlu1 %1650  ;;  %v1646_v25 = vpop.permute.xlu0 %1645 }
 0x1eb   : > { %v2383_v26 = vmul.f32 %v3126_v32, %v1646_v25  ;;  %v2384_v28 = vmul.f32 %v3129_v23, %v1651_v37  ;;  %v2394_v32 = vmul.f32 %v3149_v3, %v4344_v22  ;;  %v3440_v23 = vld [vmem:[%s3735_s11 + $0x250] sm:$0xff]   ;;  %v3441_v22 = vld [vmem:[%s3735_s11 + $0x258] sm:$0xff]  }
 0x1ec   : > { %v3153_v29 = vunpack.c.l.bf16 %v3440_v23  ;;  %v3154_v16 = vunpack.c.h.bf16 %v3440_v23  ;;  %v3158_v33 = vunpack.c.h.bf16 %v3441_v22 }
 0x1ed   : > { %v2638_v43 = vadd.f32 %v2637_v34, %v2383_v26  ;;  %v3150_v34 = vunpack.c.h.bf16 %v3439_v6 }
 0x1ef   : > { %v2639_v46 = vadd.f32 %v2638_v43, %v2384_v28  ;;  %1880 = vperm.xlu2 %3521, %v894_v40   ;;  %v906_v43 = vld [vmem:[%s4720_s1 + $0x610] sm:$0xff] }
 0x1f0   : > { %1875 = vperm.xlu1 %3520, %v893_v31   ;;  %1870 = vperm.xlu0 %3519, %v892_v44  }
 0x1f1   : > { %v2640_v52 = vadd.f32 %v2639_v46, %v2385_v47  ;;  %v4358_v38 = vpop.permute.xlu2 %1715  ;;  %v905_v47 = vld [vmem:[%s4720_s1 + $0x608] sm:$0xff]  ;;  %v904_v46 = vld [vmem:[%s4720_s1 + $0x600] sm:$0xff] }
 0x1f2   : > { %v1666_v39 = vpop.permute.xlu1 %1665  ;;  %v1661_v55 = vpop.permute.xlu0 %1660 }
 0x1f3   : > { %v2386_v42 = vmul.f32 %v3133_v49, %v1661_v55  ;;  %v2387_v35 = vmul.f32 %v3134_v41, %v1666_v39  ;;  %v2397_v49 = vmul.f32 %v3154_v16, %v4358_v38  ;;  %v3442_v41 = vld [vmem:[%s3735_s11 + $0x260] sm:$0xff]  }
 0x1f5   : > { %v2641_v45 = vadd.f32 %v2640_v52, %v2386_v42  ;;  %v3157_v52 = vunpack.c.l.bf16 %v3441_v22 }
 0x1f7   : > { %v2642_v51 = vadd.f32 %v2641_v45, %v2387_v35  ;;  %1895 = vperm.xlu2 %3521, %v897_v58   ;;  %v3161_v35 = vunpack.c.l.bf16 %v3442_v41 }
 0x1f8   : > { %1890 = vperm.xlu1 %3520, %v896_v62   ;;  %1885 = vperm.xlu0 %3519, %v895_v48   ;;  %v909_v62 = vld [vmem:[%s4720_s1 + $0x628] sm:$0xff] }
 0x1f9   : > { %v2643_v4 = vadd.f32 %v2642_v51, %v2388_v0  ;;  %v4371_v56 = vpop.permute.xlu2 %1730  ;;  %v908_v0 = vld [vmem:[%s4720_s1 + $0x620] sm:$0xff]  ;;  %v907_v51 = vld [vmem:[%s4720_s1 + $0x618] sm:$0xff] }
 0x1fa   : > { %v1681_v57 = vpop.permute.xlu1 %1680  ;;  %v1676_v7 = vpop.permute.xlu0 %1675 }
 0x1fb   : > { %v2389_v59 = vmul.f32 %v3138_v2, %v1676_v7  ;;  %v2390_v63 = vmul.f32 %v3141_v60, %v1681_v57  ;;  %v2400_v2 = vmul.f32 %v3161_v35, %v4371_v56  ;;  %v3443_v60 = vld [vmem:[%s3735_s11 + $0x268] sm:$0xff]   ;;  %v3444_v56 = vld [vmem:[%s3735_s11 + $0x270] sm:$0xff]  }
 0x1fc   : > { %v3165_v50 = vunpack.c.l.bf16 %v3443_v60  ;;  %v3166_v53 = vunpack.c.h.bf16 %v3443_v60  ;;  %v3170_v3 = vunpack.c.h.bf16 %v3444_v56 }
 0x1fd   : > { %v2644_v13 = vadd.f32 %v2643_v4, %v2389_v59  ;;  %v3162_v4 = vunpack.c.h.bf16 %v3442_v41 }
 0x1ff   : > { %v2645_v61 = vadd.f32 %v2644_v13, %v2390_v63  ;;  %1910 = vperm.xlu2 %3521, %v900_v10   ;;  %v912_v13 = vld [vmem:[%s4720_s1 + $0x640] sm:$0xff] }
 0x200   : > { %1905 = vperm.xlu1 %3520, %v899_v1   ;;  %1900 = vperm.xlu0 %3519, %v898_v14  }
 0x201   : > { %v2646_v21 = vadd.f32 %v2645_v61, %v2391_v17  ;;  %v4385_v8 = vpop.permute.xlu2 %1745  ;;  %v911_v17 = vld [vmem:[%s4720_s1 + $0x638] sm:$0xff]  ;;  %v910_v61 = vld [vmem:[%s4720_s1 + $0x630] sm:$0xff] }
 0x202   : > { %v1696_v9 = vpop.permute.xlu1 %1695  ;;  %v1691_v24 = vpop.permute.xlu0 %1690 }
 0x203   : > { %v2392_v12 = vmul.f32 %v3145_v19, %v1691_v24  ;;  %v2393_v5 = vmul.f32 %v3146_v11, %v1696_v9  ;;  %v2403_v19 = vmul.f32 %v3166_v53, %v4385_v8  ;;  %v3445_v11 = vld [vmem:[%s3735_s11 + $0x278] sm:$0xff]  }
 0x205   : > { %v2647_v15 = vadd.f32 %v2646_v21, %v2392_v12  ;;  %v3169_v21 = vunpack.c.l.bf16 %v3444_v56 }
 0x207   : > { %v2648_v20 = vadd.f32 %v2647_v15, %v2393_v5  ;;  %1925 = vperm.xlu2 %3521, %v903_v27   ;;  %v3173_v5 = vunpack.c.l.bf16 %v3445_v11 }
 0x208   : > { %1920 = vperm.xlu1 %3520, %v902_v30   ;;  %1915 = vperm.xlu0 %3519, %v901_v18   ;;  %v915_v30 = vld [vmem:[%s4720_s1 + $0x658] sm:$0xff] }
 0x209   : > { %v2649_v37 = vadd.f32 %v2648_v20, %v2394_v32  ;;  %v4398_v25 = vpop.permute.xlu2 %1760  ;;  %v914_v32 = vld [vmem:[%s4720_s1 + $0x650] sm:$0xff]  ;;  %v913_v20 = vld [vmem:[%s4720_s1 + $0x648] sm:$0xff] }
 0x20a   : > { %v1711_v26 = vpop.permute.xlu1 %1710  ;;  %v1706_v40 = vpop.permute.xlu0 %1705 }
 0x20b   : > { %v2395_v28 = vmul.f32 %v3150_v34, %v1706_v40  ;;  %v2396_v31 = vmul.f32 %v3153_v29, %v1711_v26  ;;  %v2406_v34 = vmul.f32 %v3173_v5, %v4398_v25  ;;  %v3446_v29 = vld [vmem:[%s3735_s11 + $0x280] sm:$0xff]  }
 0x20c   : > { %v3177_v16 = vunpack.c.l.bf16 %v3446_v29  ;;  %v3178_v25 = vunpack.c.h.bf16 %v3446_v29 }
 0x20d   : > { %v2650_v44 = vadd.f32 %v2649_v37, %v2395_v28  ;;  %v3174_v37 = vunpack.c.h.bf16 %v3445_v11 }
 0x20f   : > { %v2651_v36 = vadd.f32 %v2650_v44, %v2396_v31  ;;  %1940 = vperm.xlu2 %3521, %v906_v43   ;;  %v918_v31 = vld [vmem:[%s4720_s1 + $0x670] sm:$0xff]  ;;  %v3447_v44 = vld [vmem:[%s3735_s11 + $0x288] sm:$0xff]  }
 0x210   : > { %1935 = vperm.xlu1 %3520, %v905_v47   ;;  %1930 = vperm.xlu0 %3519, %v904_v46   ;;  %v3181_v41 = vunpack.c.l.bf16 %v3447_v44 }
 0x211   : > { %v2652_v39 = vadd.f32 %v2651_v36, %v2397_v49  ;;  %v4412_v55 = vpop.permute.xlu2 %1775  ;;  %v917_v49 = vld [vmem:[%s4720_s1 + $0x668] sm:$0xff]  ;;  %v916_v36 = vld [vmem:[%s4720_s1 + $0x660] sm:$0xff] }
 0x212   : > { %v1726_v42 = vpop.permute.xlu1 %1725  ;;  %v1721_v58 = vpop.permute.xlu0 %1720 }
 0x213   : > { %v2398_v45 = vmul.f32 %v3157_v52, %v1721_v58  ;;  %v2399_v38 = vmul.f32 %v3158_v33, %v1726_v42  ;;  %v3182_v42 = vunpack.c.h.bf16 %v3447_v44  ;;  %v3448_v58 = vld [vmem:[%s3735_s11 + $0x290] sm:$0xff]  }
 0x214   : > { %v3186_v60 = vunpack.c.h.bf16 %v3448_v58 }
 0x215   : > { %v2653_v48 = vadd.f32 %v2652_v39, %v2398_v45  ;;  %v2409_v39 = vmul.f32 %v3178_v25, %v4412_v55  ;;  %v920_v55 = vld [vmem:[%s4720_s1 + $0x680] sm:$0xff] }
 0x217   : > { %v2654_v54 = vadd.f32 %v2653_v48, %v2399_v38  ;;  %1955 = vperm.xlu2 %3521, %v909_v62   ;;  %v921_v48 = vld [vmem:[%s4720_s1 + $0x688] sm:$0xff] }
 0x218   : > { %1950 = vperm.xlu1 %3520, %v908_v0   ;;  %1945 = vperm.xlu0 %3519, %v907_v51   ;;  %v3185_v0 = vunpack.c.l.bf16 %v3448_v58 }
 0x219   : > { %v2655_v57 = vadd.f32 %v2654_v54, %v2400_v2  ;;  %v4425_v7 = vpop.permute.xlu2 %1790  ;;  %v919_v54 = vld [vmem:[%s4720_s1 + $0x678] sm:$0xff] }
 0x21a   : > { %v1741_v59 = vpop.permute.xlu1 %1740  ;;  %v1736_v10 = vpop.permute.xlu0 %1735 }
 0x21b   : > { %v2401_v63 = vmul.f32 %v3162_v4, %v1736_v10  ;;  %v2402_v1 = vmul.f32 %v3165_v50, %v1741_v59  ;;  %v2412_v50 = vmul.f32 %v3185_v0, %v4425_v7  ;;  %v923_v7 = vld [vmem:[%s4720_s1 + $0x698] sm:$0xff] }
 0x21d   : > { %v2656_v14 = vadd.f32 %v2655_v57, %v2401_v63  ;;  %v3449_v57 = vld [vmem:[%s3735_s11 + $0x298] sm:$0xff]  }
 0x21e   : > { %v3189_v10 = vunpack.c.l.bf16 %v3449_v57 }
 0x21f   : > { %v2657_v6 = vadd.f32 %v2656_v14, %v2402_v1  ;;  %1970 = vperm.xlu2 %3521, %v912_v13   ;;  %v924_v1 = vld [vmem:[%s4720_s1 + $0x6a0] sm:$0xff] }
 0x220   : > { %1965 = vperm.xlu1 %3520, %v911_v17   ;;  %1960 = vperm.xlu0 %3519, %v910_v61   ;;  %v3450_v14 = vld [vmem:[%s3735_s11 + $0x2a0] sm:$0xff]   ;;  %v3190_v17 = vunpack.c.h.bf16 %v3449_v57 }
 0x221   : > { %v2658_v9 = vadd.f32 %v2657_v6, %v2403_v19  ;;  %v4439_v24 = vpop.permute.xlu2 %1805  ;;  %v922_v6 = vld [vmem:[%s4720_s1 + $0x690] sm:$0xff]  ;;  %v3193_v11 = vunpack.c.l.bf16 %v3450_v14 }
 0x222   : > { %v1756_v12 = vpop.permute.xlu1 %1755  ;;  %v1751_v27 = vpop.permute.xlu0 %1750 }
 0x223   : > { %v2404_v15 = vmul.f32 %v3169_v21, %v1751_v27  ;;  %v2405_v8 = vmul.f32 %v3170_v3, %v1756_v12  ;;  %v3194_v12 = vunpack.c.h.bf16 %v3450_v14  ;;  %v3451_v27 = vld [vmem:[%s3735_s11 + $0x2a8] sm:$0xff]  }
 0x224   : > { %v3198_v29 = vunpack.c.h.bf16 %v3451_v27 }
 0x225   : > { %v2659_v18 = vadd.f32 %v2658_v9, %v2404_v15  ;;  %v2415_v9 = vmul.f32 %v3190_v17, %v4439_v24  ;;  %v926_v24 = vld [vmem:[%s4720_s1 + $0x6b0] sm:$0xff] }
 0x227   : > { %v2660_v23 = vadd.f32 %v2659_v18, %v2405_v8  ;;  %1985 = vperm.xlu2 %3521, %v915_v30   ;;  %v927_v18 = vld [vmem:[%s4720_s1 + $0x6b8] sm:$0xff] }
 0x228   : > { %1980 = vperm.xlu1 %3520, %v914_v32   ;;  %1975 = vperm.xlu0 %3519, %v913_v20   ;;  %v3197_v32 = vunpack.c.l.bf16 %v3451_v27 }
 0x229   : > { %v2661_v26 = vadd.f32 %v2660_v23, %v2406_v34  ;;  %v4452_v40 = vpop.permute.xlu2 %1820  ;;  %v925_v23 = vld [vmem:[%s4720_s1 + $0x6a8] sm:$0xff] }
 0x22a   : > { %v1771_v28 = vpop.permute.xlu1 %1770  ;;  %v1766_v43 = vpop.permute.xlu0 %1765 }
 0x22b   : > { %v2407_v22 = vmul.f32 %v3174_v37, %v1766_v43  ;;  %v2408_v47 = vmul.f32 %v3177_v16, %v1771_v28  ;;  %v2418_v16 = vmul.f32 %v3197_v32, %v4452_v40  ;;  %v929_v40 = vld [vmem:[%s4720_s1 + $0x6c8] sm:$0xff] }
 0x22d   : > { %v2662_v46 = vadd.f32 %v2661_v26, %v2407_v22  ;;  %v3452_v26 = vld [vmem:[%s3735_s11 + $0x2b0] sm:$0xff]  }
 0x22e   : > { %v3201_v43 = vunpack.c.l.bf16 %v3452_v26 }
 0x22f   : > { %v2663_v52 = vadd.f32 %v2662_v46, %v2408_v47  ;;  %2000 = vperm.xlu2 %3521, %v918_v31   ;;  %v930_v47 = vld [vmem:[%s4720_s1 + $0x6d0] sm:$0xff]  ;;  %v3453_v46 = vld [vmem:[%s3735_s11 + $0x2b8] sm:$0xff]  }
 0x230   : > { %1995 = vperm.xlu1 %3520, %v917_v49   ;;  %1990 = vperm.xlu0 %3519, %v916_v36   ;;  %v3202_v49 = vunpack.c.h.bf16 %v3452_v26 }
 0x231   : > { %v4465_v33 = vpop.permute.xlu2 %1835  ;;  %v2664_v62 = vadd.f32 %v2663_v52, %v2409_v39 }
 0x232   : > { %v1786_v35 = vpop.permute.xlu1 %1785  ;;  %v1781_v45 = vpop.permute.xlu0 %1780  ;;  %v2421_v58 = vmul.f32 %v3202_v49, %v4465_v33  ;;  %v932_v33 = vld [vmem:[%s4720_s1 + $0x6e0] sm:$0xff] }
 0x233   : > { %v2410_v38 = vmul.f32 %v3181_v41, %v1781_v45  ;;  %v2411_v51 = vmul.f32 %v3182_v42, %v1786_v35  ;;  %v928_v41 = vld [vmem:[%s4720_s1 + $0x6c0] sm:$0xff]  ;;  %v3205_v42 = vunpack.c.l.bf16 %v3453_v46  ;;  %v3206_v45 = vunpack.c.h.bf16 %v3453_v46 }
 0x235   : > { %v2665_v2 = vadd.f32 %v2664_v62, %v2410_v38  ;;  %v3454_v62 = vld [vmem:[%s3735_s11 + $0x2c0] sm:$0xff]  }
 0x237   : > { %v2666_v4 = vadd.f32 %v2665_v2, %v2411_v51  ;;  %2015 = vperm.xlu2 %3521, %v921_v48   ;;  %v933_v2 = vld [vmem:[%s4720_s1 + $0x6e8] sm:$0xff] }
 0x238   : > { %2010 = vperm.xlu1 %3520, %v920_v55   ;;  %2005 = vperm.xlu0 %3519, %v919_v54   ;;  %v3209_v55 = vunpack.c.l.bf16 %v3454_v62 }
 0x239   : > { %v4479_v59 = vpop.permute.xlu2 %1850  ;;  %v2667_v13 = vadd.f32 %v2666_v4, %v2412_v50  ;;  %v3210_v50 = vunpack.c.h.bf16 %v3454_v62 }
 0x23a   : > { %v1801_v53 = vpop.permute.xlu1 %1800  ;;  %v1796_v63 = vpop.permute.xlu0 %1795 }
 0x23b   : > { %v2413_v56 = vmul.f32 %v3186_v60, %v1796_v63  ;;  %v2414_v61 = vmul.f32 %v3189_v10, %v1801_v53  ;;  %v931_v60 = vld [vmem:[%s4720_s1 + $0x6d8] sm:$0xff]  ;;  %v3455_v10 = vld [vmem:[%s3735_s11 + $0x2c8] sm:$0xff]   ;;  %v2424_v53 = vmul.f32 %v3209_v55, %v4479_v59 }
 0x23c   : > { %v935_v59 = vld [vmem:[%s4720_s1 + $0x6f8] sm:$0xff] }
 0x23d   : > { %v2668_v19 = vadd.f32 %v2667_v13, %v2413_v56  ;;  %v3213_v13 = vunpack.c.l.bf16 %v3455_v10 }
 0x23f   : > { %v2669_v21 = vadd.f32 %v2668_v19, %v2414_v61  ;;  %2030 = vperm.xlu2 %3521, %v924_v1   ;;  %v936_v61 = vld [vmem:[%s4720_s1 + $0x700] sm:$0xff]  ;;  %v3456_v19 = vld [vmem:[%s3735_s11 + $0x2d0] sm:$0xff]  }
 0x240   : > { %2025 = vperm.xlu1 %3520, %v923_v7   ;;  %2020 = vperm.xlu0 %3519, %v922_v6   ;;  %v3214_v7 = vunpack.c.h.bf16 %v3455_v10 }
 0x241   : > { %v4492_v3 = vpop.permute.xlu2 %1865  ;;  %v2670_v8 = vadd.f32 %v2669_v21, %v2415_v9 }
 0x242   : > { %v1816_v5 = vpop.permute.xlu1 %1815  ;;  %v1811_v15 = vpop.permute.xlu0 %1810  ;;  %v2427_v27 = vmul.f32 %v3214_v7, %v4492_v3  ;;  %v938_v3 = vld [vmem:[%s4720_s1 + $0x710] sm:$0xff] }
 0x243   : > { %v2416_v30 = vmul.f32 %v3193_v11, %v1811_v15  ;;  %v2417_v20 = vmul.f32 %v3194_v12, %v1816_v5  ;;  %v934_v11 = vld [vmem:[%s4720_s1 + $0x6f0] sm:$0xff]  ;;  %v3217_v12 = vunpack.c.l.bf16 %v3456_v19  ;;  %v3218_v15 = vunpack.c.h.bf16 %v3456_v19 }
 0x245   : > { %v2671_v34 = vadd.f32 %v2670_v8, %v2416_v30  ;;  %v3457_v30 = vld [vmem:[%s3735_s11 + $0x2d8] sm:$0xff]  }
 0x247   : > { %v2672_v37 = vadd.f32 %v2671_v34, %v2417_v20  ;;  %2045 = vperm.xlu2 %3521, %v927_v18   ;;  %v939_v34 = vld [vmem:[%s4720_s1 + $0x718] sm:$0xff] }
 0x248   : > { %2040 = vperm.xlu1 %3520, %v926_v24   ;;  %2035 = vperm.xlu0 %3519, %v925_v23   ;;  %v3221_v24 = vunpack.c.l.bf16 %v3457_v30 }
 0x249   : > { %v4506_v28 = vpop.permute.xlu2 %1880  ;;  %v2673_v25 = vadd.f32 %v2672_v37, %v2418_v16  ;;  %v3222_v16 = vunpack.c.h.bf16 %v3457_v30 }
 0x24a   : > { %v1831_v22 = vpop.permute.xlu1 %1830  ;;  %v1826_v31 = vpop.permute.xlu0 %1825 }
 0x24b   : > { %v2419_v44 = vmul.f32 %v3198_v29, %v1826_v31  ;;  %v2420_v36 = vmul.f32 %v3201_v43, %v1831_v22  ;;  %v937_v29 = vld [vmem:[%s4720_s1 + $0x708] sm:$0xff]  ;;  %v3458_v43 = vld [vmem:[%s3735_s11 + $0x2e0] sm:$0xff]   ;;  %v2430_v22 = vmul.f32 %v3221_v24, %v4506_v28 }
 0x24c   : > { %v941_v28 = vld [vmem:[%s4720_s1 + $0x728] sm:$0xff] }
 0x24d   : > { %v2674_v52 = vadd.f32 %v2673_v25, %v2419_v44  ;;  %v3225_v44 = vunpack.c.l.bf16 %v3458_v43 }
 0x24f   : > { %v2675_v39 = vadd.f32 %v2674_v52, %v2420_v36  ;;  %2060 = vperm.xlu2 %3521, %v930_v47   ;;  %v942_v36 = vld [vmem:[%s4720_s1 + $0x730] sm:$0xff]  ;;  %v3459_v52 = vld [vmem:[%s3735_s11 + $0x2e8] sm:$0xff]  }
 0x250   : > { %2055 = vperm.xlu1 %3520, %v929_v40   ;;  %2050 = vperm.xlu0 %3519, %v928_v41   ;;  %v3226_v40 = vunpack.c.h.bf16 %v3458_v43 }
 0x251   : > { %v4519_v35 = vpop.permute.xlu2 %1895  ;;  %v2676_v51 = vadd.f32 %v2675_v39, %v2421_v58 }
 0x252   : > { %v1846_v38 = vpop.permute.xlu1 %1845  ;;  %v1841_v48 = vpop.permute.xlu0 %1840  ;;  %v2433_v62 = vmul.f32 %v3226_v40, %v4519_v35  ;;  %v944_v35 = vld [vmem:[%s4720_s1 + $0x740] sm:$0xff] }
 0x253   : > { %v2422_v0 = vmul.f32 %v3205_v42, %v1841_v48  ;;  %v2423_v54 = vmul.f32 %v3206_v45, %v1846_v38  ;;  %v940_v42 = vld [vmem:[%s4720_s1 + $0x720] sm:$0xff]  ;;  %v3229_v45 = vunpack.c.l.bf16 %v3459_v52  ;;  %v3230_v48 = vunpack.c.h.bf16 %v3459_v52 }
 0x255   : > { %v2677_v4 = vadd.f32 %v2676_v51, %v2422_v0  ;;  %v3460_v0 = vld [vmem:[%s3735_s11 + $0x2f0] sm:$0xff]  }
 0x257   : > { %v2678_v57 = vadd.f32 %v2677_v4, %v2423_v54  ;;  %2075 = vperm.xlu2 %3521, %v933_v2   ;;  %v945_v4 = vld [vmem:[%s4720_s1 + $0x748] sm:$0xff] }
 0x258   : > { %2070 = vperm.xlu1 %3520, %v932_v33   ;;  %2065 = vperm.xlu0 %3519, %v931_v60   ;;  %v3233_v33 = vunpack.c.l.bf16 %v3460_v0 }
 0x259   : > { %v4533_v63 = vpop.permute.xlu2 %1910  ;;  %v2679_v17 = vadd.f32 %v2678_v57, %v2424_v53  ;;  %v3234_v53 = vunpack.c.h.bf16 %v3460_v0 }
 0x25a   : > { %v1861_v56 = vpop.permute.xlu1 %1860  ;;  %v1856_v1 = vpop.permute.xlu0 %1855 }
 0x25b   : > { %v2425_v14 = vmul.f32 %v3210_v50, %v1856_v1  ;;  %v2426_v6 = vmul.f32 %v3213_v13, %v1861_v56  ;;  %v943_v50 = vld [vmem:[%s4720_s1 + $0x738] sm:$0xff]  ;;  %v2436_v56 = vmul.f32 %v3233_v33, %v4533_v63 }
 0x25c   : > { %v3461_v13 = vld [vmem:[%s3735_s11 + $0x2f8] sm:$0xff]  }
 0x25d   : > { %v2680_v21 = vadd.f32 %v2679_v17, %v2425_v14  ;;  %v3237_v14 = vunpack.c.l.bf16 %v3461_v13  ;;  %v947_v63 = vld [vmem:[%s4720_s1 + $0x758] sm:$0xff] }
 0x25f   : > { %v2681_v9 = vadd.f32 %v2680_v21, %v2426_v6  ;;  %2090 = vperm.xlu2 %3521, %v936_v61   ;;  %v948_v6 = vld [vmem:[%s4720_s1 + $0x760] sm:$0xff] }
 0x260   : > { %2085 = vperm.xlu1 %3520, %v935_v59   ;;  %2080 = vperm.xlu0 %3519, %v934_v11   ;;  %v3462_v21 = vld [vmem:[%s3735_s11 + $0x300] sm:$0xff]   ;;  %v3238_v59 = vunpack.c.h.bf16 %v3461_v13 }
 0x261   : > { %v4546_v5 = vpop.permute.xlu2 %1925  ;;  %v2682_v20 = vadd.f32 %v2681_v9, %v2427_v27 }
 0x262   : > { %v1876_v8 = vpop.permute.xlu1 %1875  ;;  %v1871_v18 = vpop.permute.xlu0 %1870  ;;  %v2439_v30 = vmul.f32 %v3238_v59, %v4546_v5  ;;  %v950_v5 = vld [vmem:[%s4720_s1 + $0x770] sm:$0xff] }
 0x263   : > { %v2428_v32 = vmul.f32 %v3217_v12, %v1871_v18  ;;  %v2429_v23 = vmul.f32 %v3218_v15, %v1876_v8  ;;  %v946_v12 = vld [vmem:[%s4720_s1 + $0x750] sm:$0xff]  ;;  %v3241_v15 = vunpack.c.l.bf16 %v3462_v21  ;;  %v3242_v18 = vunpack.c.h.bf16 %v3462_v21 }
 0x265   : > { %v2683_v37 = vadd.f32 %v2682_v20, %v2428_v32  ;;  %v3463_v32 = vld [vmem:[%s3735_s11 + $0x308] sm:$0xff]  }
 0x267   : > { %v2684_v26 = vadd.f32 %v2683_v37, %v2429_v23  ;;  %2105 = vperm.xlu2 %3521, %v939_v34   ;;  %v951_v37 = vld [vmem:[%s4720_s1 + $0x778] sm:$0xff] }
 0x268   : > { %2100 = vperm.xlu1 %3520, %v938_v3   ;;  %2095 = vperm.xlu0 %3519, %v937_v29   ;;  %v3245_v3 = vunpack.c.l.bf16 %v3463_v32 }
 0x269   : > { %v4560_v31 = vpop.permute.xlu2 %1940  ;;  %v2685_v49 = vadd.f32 %v2684_v26, %v2430_v22  ;;  %v3246_v22 = vunpack.c.h.bf16 %v3463_v32 }
 0x26a   : > { %v1891_v25 = vpop.permute.xlu1 %1890  ;;  %v1886_v47 = vpop.permute.xlu0 %1885 }
 0x26b   : > { %v2431_v46 = vmul.f32 %v3222_v16, %v1886_v47  ;;  %v2432_v41 = vmul.f32 %v3225_v44, %v1891_v25  ;;  %v949_v16 = vld [vmem:[%s4720_s1 + $0x768] sm:$0xff]  ;;  %v3464_v44 = vld [vmem:[%s3735_s11 + $0x310] sm:$0xff]   ;;  %v2442_v25 = vmul.f32 %v3245_v3, %v4560_v31 }
 0x26c   : > { %v953_v31 = vld [vmem:[%s4720_s1 + $0x788] sm:$0xff] }
 0x26d   : > { %v2686_v39 = vadd.f32 %v2685_v49, %v2431_v46  ;;  %v3249_v46 = vunpack.c.l.bf16 %v3464_v44 }
 0x26f   : > { %v2687_v58 = vadd.f32 %v2686_v39, %v2432_v41  ;;  %2120 = vperm.xlu2 %3521, %v942_v36   ;;  %v954_v41 = vld [vmem:[%s4720_s1 + $0x790] sm:$0xff]  ;;  %v3465_v39 = vld [vmem:[%s3735_s11 + $0x318] sm:$0xff]  }
 0x270   : > { %2115 = vperm.xlu1 %3520, %v941_v28   ;;  %2110 = vperm.xlu0 %3519, %v940_v42   ;;  %v3250_v28 = vunpack.c.h.bf16 %v3464_v44 }
 0x271   : > { %v4573_v38 = vpop.permute.xlu2 %1955  ;;  %v2688_v54 = vadd.f32 %v2687_v58, %v2433_v62 }
 0x272   : > { %v1906_v51 = vpop.permute.xlu1 %1905  ;;  %v1901_v2 = vpop.permute.xlu0 %1900  ;;  %v2445_v0 = vmul.f32 %v3250_v28, %v4573_v38  ;;  %v956_v38 = vld [vmem:[%s4720_s1 + $0x7a0] sm:$0xff]  ;;  %v966_v28 = vld [vmem:[%s4720_s1 + $0x7f0] sm:$0xff] }
 0x273   : > { %v2434_v55 = vmul.f32 %v3229_v45, %v1901_v2  ;;  %v2435_v60 = vmul.f32 %v3230_v48, %v1906_v51  ;;  %v952_v45 = vld [vmem:[%s4720_s1 + $0x780] sm:$0xff]  ;;  %v3253_v48 = vunpack.c.l.bf16 %v3465_v39  ;;  %v3254_v2 = vunpack.c.h.bf16 %v3465_v39 }
 0x275   : > { %v2689_v57 = vadd.f32 %v2688_v54, %v2434_v55  ;;  %v3466_v55 = vld [vmem:[%s3735_s11 + $0x320] sm:$0xff]  }
 0x277   : > { %v2690_v10 = vadd.f32 %v2689_v57, %v2435_v60  ;;  %2135 = vperm.xlu2 %3521, %v945_v4   ;;  %v957_v57 = vld [vmem:[%s4720_s1 + $0x7a8] sm:$0xff] }
 0x278   : > { %2130 = vperm.xlu1 %3520, %v944_v35   ;;  %2125 = vperm.xlu0 %3519, %v943_v50   ;;  %v3257_v35 = vunpack.c.l.bf16 %v3466_v55 }
 0x279   : > { %v4587_v1 = vpop.permute.xlu2 %1970  ;;  %v2691_v7 = vadd.f32 %v2690_v10, %v2436_v56  ;;  %v3258_v56 = vunpack.c.h.bf16 %v3466_v55 }
 0x27a   : > { %v1921_v17 = vpop.permute.xlu1 %1920  ;;  %v1916_v61 = vpop.permute.xlu0 %1915 }
 0x27b   : > { %v2437_v19 = vmul.f32 %v3234_v53, %v1916_v61  ;;  %v2438_v11 = vmul.f32 %v3237_v14, %v1921_v17  ;;  %v955_v53 = vld [vmem:[%s4720_s1 + $0x798] sm:$0xff]  ;;  %v3467_v14 = vld [vmem:[%s3735_s11 + $0x328] sm:$0xff]   ;;  %v2448_v17 = vmul.f32 %v3257_v35, %v4587_v1 }
 0x27c   : > { %v959_v1 = vld [vmem:[%s4720_s1 + $0x7b8] sm:$0xff] }
 0x27d   : > { %v2692_v9 = vadd.f32 %v2691_v7, %v2437_v19  ;;  %v3261_v19 = vunpack.c.l.bf16 %v3467_v14 }
 0x27f   : > { %v2693_v27 = vadd.f32 %v2692_v9, %v2438_v11  ;;  %2150 = vperm.xlu2 %3521, %v948_v6   ;;  %v960_v11 = vld [vmem:[%s4720_s1 + $0x7c0] sm:$0xff]  ;;  %v3468_v9 = vld [vmem:[%s3735_s11 + $0x330] sm:$0xff]  }
 0x280   : > { %2145 = vperm.xlu1 %3520, %v947_v63   ;;  %2140 = vperm.xlu0 %3519, %v946_v12   ;;  %v3262_v63 = vunpack.c.h.bf16 %v3467_v14 }
 0x281   : > { %v4600_v8 = vpop.permute.xlu2 %1985  ;;  %v2694_v23 = vadd.f32 %v2693_v27, %v2439_v30 }
 0x282   : > { %v1936_v20 = vpop.permute.xlu1 %1935  ;;  %v1931_v34 = vpop.permute.xlu0 %1930  ;;  %v2451_v32 = vmul.f32 %v3262_v63, %v4600_v8  ;;  %v962_v8 = vld [vmem:[%s4720_s1 + $0x7d0] sm:$0xff] }
 0x283   : > { %v2440_v24 = vmul.f32 %v3241_v15, %v1931_v34  ;;  %v2441_v29 = vmul.f32 %v3242_v18, %v1936_v20  ;;  %v958_v15 = vld [vmem:[%s4720_s1 + $0x7b0] sm:$0xff]  ;;  %v3265_v18 = vunpack.c.l.bf16 %v3468_v9  ;;  %v3266_v20 = vunpack.c.h.bf16 %v3468_v9  ;;  %v3469_v34 = vld [vmem:[%s3735_s11 + $0x338] sm:$0xff]   ;;  %v3474_v9 = vld [vmem:[%s3735_s11 + $0x360] sm:$0xff]  }
 0x285   : > { %v2695_v26 = vadd.f32 %v2694_v23, %v2440_v24 }
 0x287   : > { %v2696_v43 = vadd.f32 %v2695_v26, %v2441_v29  ;;  %2165 = vperm.xlu2 %3521, %v951_v37   ;;  %v963_v26 = vld [vmem:[%s4720_s1 + $0x7d8] sm:$0xff] }
 0x288   : > { %2160 = vperm.xlu1 %3520, %v950_v5   ;;  %2155 = vperm.xlu0 %3519, %v949_v16   ;;  %v3269_v5 = vunpack.c.l.bf16 %v3469_v34 }
 0x289   : > { %v4614_v47 = vpop.permute.xlu2 %2000  ;;  %v2697_v40 = vadd.f32 %v2696_v43, %v2442_v25  ;;  %v3270_v25 = vunpack.c.h.bf16 %v3469_v34 }
 0x28a   : > { %v1951_v49 = vpop.permute.xlu1 %1950  ;;  %v1946_v36 = vpop.permute.xlu0 %1945 }
 0x28b   : > { %v2443_v52 = vmul.f32 %v3246_v22, %v1946_v36  ;;  %v2444_v42 = vmul.f32 %v3249_v46, %v1951_v49  ;;  %v961_v22 = vld [vmem:[%s4720_s1 + $0x7c8] sm:$0xff]  ;;  %v3470_v46 = vld [vmem:[%s3735_s11 + $0x340] sm:$0xff]   ;;  %v2454_v49 = vmul.f32 %v3269_v5, %v4614_v47 }
 0x28c   : > { %v3273_v36 = vunpack.c.l.bf16 %v3470_v46  ;;  %v964_v47 = vld [vmem:[%s4720_s1 + $0x7e0] sm:$0xff] }
 0x28d   : > { %v2698_v58 = vadd.f32 %v2697_v40, %v2443_v52 }
 0x28f   : > { %v2699_v62 = vadd.f32 %v2698_v58, %v2444_v42  ;;  %2180 = vperm.xlu2 %3521, %v954_v41   ;;  %v3471_v42 = vld [vmem:[%s3735_s11 + $0x348] sm:$0xff]   ;;  %v3274_v58 = vunpack.c.h.bf16 %v3470_v46 }
 0x290   : > { %2175 = vperm.xlu1 %3520, %v953_v31   ;;  %2170 = vperm.xlu0 %3519, %v952_v45  }
 0x291   : > { %v4627_v51 = vpop.permute.xlu2 %2015  ;;  %v2700_v60 = vadd.f32 %v2699_v62, %v2445_v0 }
 0x292   : > { %v1966_v54 = vpop.permute.xlu1 %1965  ;;  %v1961_v4 = vpop.permute.xlu0 %1960  ;;  %v2457_v55 = vmul.f32 %v3274_v58, %v4627_v51 }
 0x293   : > { %v2446_v33 = vmul.f32 %v3253_v48, %v1961_v4  ;;  %v2447_v50 = vmul.f32 %v3254_v2, %v1966_v54  ;;  %v965_v48 = vld [vmem:[%s4720_s1 + $0x7e8] sm:$0xff]  ;;  %v3277_v2 = vunpack.c.l.bf16 %v3471_v42  ;;  %v3278_v54 = vunpack.c.h.bf16 %v3471_v42  ;;  %v3472_v4 = vld [vmem:[%s3735_s11 + $0x350] sm:$0xff]  }
 0x295   : > { %v2701_v10 = vadd.f32 %v2700_v60, %v2446_v33 }
 0x297   : > { %v2702_v13 = vadd.f32 %v2701_v10, %v2447_v50  ;;  %2195 = vperm.xlu2 %3521, %v957_v57   ;;  %v3281_v50 = vunpack.c.l.bf16 %v3472_v4 }
 0x298   : > { %2190 = vperm.xlu1 %3520, %v956_v38   ;;  %2185 = vperm.xlu0 %3519, %v955_v53   ;;  %v2765_v53 = vld [vmem:[#allocation2] sm:$0x1] }
 0x299   : > { %v4641_v61 = vpop.permute.xlu2 %2030  ;;  %v2703_v59 = vadd.f32 %v2702_v13, %v2448_v17  ;;  %v967_v13 = vld [vmem:[%s4720_s1 + $0x7f8] sm:$0xff]  ;;  %v3282_v17 = vunpack.c.h.bf16 %v3472_v4 }
 0x29a   : > { %v1981_v7 = vpop.permute.xlu1 %1980  ;;  %v1976_v6 = vpop.permute.xlu0 %1975  ;;  %v2460_v51 = vmul.f32 %v3281_v50, %v4641_v61 }
 0x29b   : > { %v2449_v21 = vmul.f32 %v3258_v56, %v1976_v6  ;;  %v2450_v12 = vmul.f32 %v3261_v19, %v1981_v7  ;;  %v3473_v19 = vld [vmem:[%s3735_s11 + $0x358] sm:$0xff]  }
 0x29c   : > { %v3285_v7 = vunpack.c.l.bf16 %v3473_v19  ;;  %v3286_v63 = vunpack.c.h.bf16 %v3473_v19 }
 0x29d   : > { %v2704_v27 = vadd.f32 %v2703_v59, %v2449_v21 }
 0x29f   : > { %v2705_v30 = vadd.f32 %v2704_v27, %v2450_v12  ;;  %2210 = vperm.xlu2 %3521, %v960_v11  }
 0x2a0   : > { %2205 = vperm.xlu1 %3520, %v959_v1   ;;  %2200 = vperm.xlu0 %3519, %v958_v15   ;;  %v3289_v15 = vunpack.c.l.bf16 %v3474_v9 }
 0x2a1   : > { %v4655_v37 = vpop.permute.xlu2 %2045  ;;  %v2706_v29 = vadd.f32 %v2705_v30, %v2451_v32  ;;  %v3290_v32 = vunpack.c.h.bf16 %v3474_v9 }
 0x2a2   : > { %v1996_v24 = vpop.permute.xlu1 %1995  ;;  %v1991_v23 = vpop.permute.xlu0 %1990  ;;  %v2463_v30 = vmul.f32 %v3286_v63, %v4655_v37 }
 0x2a3   : > { %v2452_v3 = vmul.f32 %v3265_v18, %v1991_v23  ;;  %v2453_v16 = vmul.f32 %v3266_v20, %v1996_v24  ;;  %v3475_v20 = vld [vmem:[%s3735_s11 + $0x368] sm:$0xff]  }
 0x2a5   : > { %v2707_v43 = vadd.f32 %v2706_v29, %v2452_v3  ;;  %v3293_v3 = vunpack.c.l.bf16 %v3475_v20 }
 0x2a7   : > { %v2708_v44 = vadd.f32 %v2707_v43, %v2453_v16  ;;  %2225 = vperm.xlu2 %3521, %v963_v26   ;;  %v3294_v16 = vunpack.c.h.bf16 %v3475_v20  ;;  %v3476_v43 = vld [vmem:[%s3735_s11 + $0x370] sm:$0xff]  }
 0x2a8   : > { %2220 = vperm.xlu1 %3520, %v962_v8   ;;  %2215 = vperm.xlu0 %3519, %v961_v22   ;;  %v3297_v22 = vunpack.c.l.bf16 %v3476_v43 }
 0x2a9   : > { %v2709_v39 = vadd.f32 %v2708_v44, %v2454_v49  ;;  %v2061_v31 = vpop.permute.xlu2 %2060 }
 0x2aa   : > { %v2011_v52 = vpop.permute.xlu1 %2010  ;;  %v2006_v40 = vpop.permute.xlu0 %2005  ;;  %v2466_v8 = vmul.f32 %v3293_v3, %v2061_v31 }
 0x2ab   : > { %v2455_v41 = vmul.f32 %v3270_v25, %v2006_v40  ;;  %v2456_v45 = vmul.f32 %v3273_v36, %v2011_v52  ;;  %v3477_v36 = vld [vmem:[%s3735_s11 + $0x378] sm:$0xff]   ;;  %v3298_v52 = vunpack.c.h.bf16 %v3476_v43 }
 0x2ac   : > { %v3302_v58 = vunpack.c.h.bf16 %v3477_v36 }
 0x2ad   : > { %v2710_v62 = vadd.f32 %v2709_v39, %v2455_v41 }
 0x2af   : > { %v2711_v0 = vadd.f32 %v2710_v62, %v2456_v45  ;;  %2240 = vperm.xlu2 %3521, %v966_v28   ;;  %v3301_v28 = vunpack.c.l.bf16 %v3477_v36  ;;  %v3478_v45 = vld [vmem:[%s3735_s11 + $0x380] sm:$0xff]  }
 0x2b0   : > { %2235 = vperm.xlu1 %3520, %v965_v48   ;;  %2230 = vperm.xlu0 %3519, %v964_v47  }
 0x2b1   : > { %v2712_v35 = vadd.f32 %v2711_v0, %v2457_v55  ;;  %v2076_v56 = vpop.permute.xlu2 %2075  ;;  %v3305_v0 = vunpack.c.l.bf16 %v3478_v45 }
 0x2b2   : > { %v2026_v33 = vpop.permute.xlu1 %2025  ;;  %v2021_v60 = vpop.permute.xlu0 %2020  ;;  %v2469_v42 = vmul.f32 %v3298_v52, %v2076_v56 }
 0x2b3   : > { %v2458_v57 = vmul.f32 %v3277_v2, %v2021_v60  ;;  %v2459_v10 = vmul.f32 %v3278_v54, %v2026_v33  ;;  %v3306_v33 = vunpack.c.h.bf16 %v3478_v45  ;;  %v3479_v60 = vld [vmem:[%s3735_s11 + $0x388] sm:$0xff]   ;;  %v3485_v45 = vld [vmem:[%s3735_s11 + $0x3b8] sm:$0xff]  }
 0x2b4   : > { %v3310_v56 = vunpack.c.h.bf16 %v3479_v60 }
 0x2b5   : > { %v2713_v38 = vadd.f32 %v2712_v35, %v2458_v57  ;;  %v3309_v35 = vunpack.c.l.bf16 %v3479_v60 }
 0x2b7   : > { %v2714_v14 = vadd.f32 %v2713_v38, %v2459_v10 }
 0x2b8   : > { %2768 = vperm.xlu1 %3520, %v2765_v53   ;;  %2245 = vperm.xlu0 %3519, %v967_v13   ;;  %v3480_v13 = vld [vmem:[%s3735_s11 + $0x390] sm:$0xff]  }
 0x2b9   : > { %v2715_v11 = vadd.f32 %v2714_v14, %v2460_v51  ;;  %v2091_v18 = vpop.permute.xlu2 %2090 }
 0x2ba   : > { %v2041_v6 = vpop.permute.xlu1 %2040  ;;  %v2036_v21 = vpop.permute.xlu0 %2035  ;;  %v2472_v57 = vmul.f32 %v3305_v0, %v2091_v18 }
 0x2bb   : > { %v2461_v59 = vmul.f32 %v3282_v17, %v2036_v21  ;;  %v2462_v12 = vmul.f32 %v3285_v7, %v2041_v6  ;;  %v3313_v7 = vunpack.c.l.bf16 %v3480_v13  ;;  %v3314_v21 = vunpack.c.h.bf16 %v3480_v13 }
 0x2bd   : > { %v2716_v27 = vadd.f32 %v2715_v11, %v2461_v59  ;;  %v3481_v59 = vld [vmem:[%s3735_s11 + $0x398] sm:$0xff]  }
 0x2be   : > { %v3318_v18 = vunpack.c.h.bf16 %v3481_v59 }
 0x2bf   : > { %v2717_v1 = vadd.f32 %v2716_v27, %v2462_v12  ;;  %v3317_v27 = vunpack.c.l.bf16 %v3481_v59  ;;  %v3488_v59 = vld [vmem:[%s3735_s11 + $0x3d0] sm:$0xff]  }
 0x2c1   : > { %v2718_v23 = vadd.f32 %v2717_v1, %v2463_v30  ;;  %v2106_v37 = vpop.permute.xlu2 %2105 }
 0x2c2   : > { %v2056_v34 = vpop.permute.xlu1 %2055  ;;  %v2051_v24 = vpop.permute.xlu0 %2050  ;;  %v2475_v6 = vmul.f32 %v3310_v56, %v2106_v37  ;;  %v3484_v37 = vld [vmem:[%s3735_s11 + $0x3b0] sm:$0xff]  }
 0x2c3   : > { %v2464_v61 = vmul.f32 %v3289_v15, %v2051_v24  ;;  %v2465_v29 = vmul.f32 %v3290_v32, %v2056_v34  ;;  %v3482_v32 = vld [vmem:[%s3735_s11 + $0x3a0] sm:$0xff]  }
 0x2c4   : > { %v3321_v24 = vunpack.c.l.bf16 %v3482_v32 }
 0x2c5   : > { %v2719_v26 = vadd.f32 %v2718_v23, %v2464_v61 }
 0x2c7   : > { %v2720_v5 = vadd.f32 %v2719_v26, %v2465_v29  ;;  %v3483_v26 = vld [vmem:[%s3735_s11 + $0x3a8] sm:$0xff]  }
 0x2c9   : > { %v2721_v49 = vadd.f32 %v2720_v5, %v2466_v8  ;;  %v2121_v2 = vpop.permute.xlu2 %2120  ;;  %v3322_v5 = vunpack.c.h.bf16 %v3482_v32 }
 0x2ca   : > { %v2071_v44 = vpop.permute.xlu1 %2070  ;;  %v2066_v25 = vpop.permute.xlu0 %2065  ;;  %v2478_v20 = vmul.f32 %v3317_v27, %v2121_v2 }
 0x2cb   : > { %v2467_v46 = vmul.f32 %v3294_v16, %v2066_v25  ;;  %v2468_v40 = vmul.f32 %v3297_v22, %v2071_v44  ;;  %v3325_v22 = vunpack.c.l.bf16 %v3483_v26  ;;  %v3326_v25 = vunpack.c.h.bf16 %v3483_v26 }
 0x2cd   : > { %v2722_v41 = vadd.f32 %v2721_v49, %v2467_v46 }
 0x2cf   : > { %v2723_v39 = vadd.f32 %v2722_v41, %v2468_v40  ;;  %v3329_v41 = vunpack.c.l.bf16 %v3484_v37 }
 0x2d1   : > { %v2724_v47 = vadd.f32 %v2723_v39, %v2469_v42  ;;  %v2136_v19 = vpop.permute.xlu2 %2135 }
 0x2d2   : > { %v2086_v62 = vpop.permute.xlu1 %2085  ;;  %v2081_v48 = vpop.permute.xlu0 %2080  ;;  %v2481_v44 = vmul.f32 %v3322_v5, %v2136_v19 }
 0x2d3   : > { %v2470_v31 = vmul.f32 %v3301_v28, %v2081_v48  ;;  %v2471_v55 = vmul.f32 %v3302_v58, %v2086_v62  ;;  %v3330_v58 = vunpack.c.h.bf16 %v3484_v37  ;;  %v3333_v48 = vunpack.c.l.bf16 %v3485_v45  ;;  %v3491_v37 = vld [vmem:[%s3735_s11 + $0x3e8] sm:$0xff]  }
 0x2d5   : > { %v2725_v54 = vadd.f32 %v2724_v47, %v2470_v31 }
 0x2d7   : > { %v2726_v4 = vadd.f32 %v2725_v54, %v2471_v55  ;;  %v3486_v55 = vld [vmem:[%s3735_s11 + $0x3c0] sm:$0xff]   ;;  %v3334_v54 = vunpack.c.h.bf16 %v3485_v45 }
 0x2d9   : > { %v2727_v53 = vadd.f32 %v2726_v4, %v2472_v57  ;;  %v2151_v34 = vpop.permute.xlu2 %2150 }
 0x2da   : > { %v2101_v50 = vpop.permute.xlu1 %2100  ;;  %v2096_v10 = vpop.permute.xlu0 %2095  ;;  %v2484_v62 = vmul.f32 %v3329_v41, %v2151_v34 }
 0x2db   : > { %v2473_v38 = vmul.f32 %v3306_v33, %v2096_v10  ;;  %v2474_v14 = vmul.f32 %v3309_v35, %v2101_v50  ;;  %v3337_v35 = vunpack.c.l.bf16 %v3486_v55  ;;  %v3338_v10 = vunpack.c.h.bf16 %v3486_v55 }
 0x2dd   : > { %v2728_v17 = vadd.f32 %v2727_v53, %v2473_v38  ;;  %v3487_v38 = vld [vmem:[%s3735_s11 + $0x3c8] sm:$0xff]  }
 0x2df   : > { %v2729_v51 = vadd.f32 %v2728_v17, %v2474_v14  ;;  %v3341_v17 = vunpack.c.l.bf16 %v3487_v38 }
 0x2e1   : > { %v2730_v12 = vadd.f32 %v2729_v51, %v2475_v6  ;;  %v2166_v36 = vpop.permute.xlu2 %2165 }
 0x2e2   : > { %v2116_v11 = vpop.permute.xlu1 %2115  ;;  %v2111_v9 = vpop.permute.xlu0 %2110  ;;  %v2487_v50 = vmul.f32 %v3334_v54, %v2166_v36 }
 0x2e3   : > { %v2476_v63 = vmul.f32 %v3313_v7, %v2111_v9  ;;  %v2477_v1 = vmul.f32 %v3314_v21, %v2116_v11  ;;  %v3342_v21 = vunpack.c.h.bf16 %v3487_v38  ;;  %v3345_v9 = vunpack.c.l.bf16 %v3488_v59 }
 0x2e5   : > { %v2731_v15 = vadd.f32 %v2730_v12, %v2476_v63 }
 0x2e7   : > { %v2732_v30 = vadd.f32 %v2731_v15, %v2477_v1  ;;  %v3489_v15 = vld [vmem:[%s3735_s11 + $0x3d8] sm:$0xff]  }
 0x2e8   : > { %v3349_v34 = vunpack.c.l.bf16 %v3489_v15 }
 0x2e9   : > { %v2733_v29 = vadd.f32 %v2732_v30, %v2478_v20  ;;  %v2181_v4 = vpop.permute.xlu2 %2180  ;;  %v3346_v30 = vunpack.c.h.bf16 %v3488_v59 }
 0x2ea   : > { %v2131_v61 = vpop.permute.xlu1 %2130  ;;  %v2126_v23 = vpop.permute.xlu0 %2125  ;;  %v2490_v11 = vmul.f32 %v3341_v17, %v2181_v4 }
 0x2eb   : > { %v2479_v3 = vmul.f32 %v3318_v18, %v2126_v23  ;;  %v2480_v16 = vmul.f32 %v3321_v24, %v2131_v61  ;;  %v3350_v23 = vunpack.c.h.bf16 %v3489_v15 }
 0x2ed   : > { %v2734_v43 = vadd.f32 %v2733_v29, %v2479_v3  ;;  %v3490_v3 = vld [vmem:[%s3735_s11 + $0x3e0] sm:$0xff]  }
 0x2ef   : > { %v2735_v8 = vadd.f32 %v2734_v43, %v2480_v16  ;;  %v3353_v43 = vunpack.c.l.bf16 %v3490_v3 }
 0x2f1   : > { %v2736_v40 = vadd.f32 %v2735_v8, %v2481_v44  ;;  %v2196_v7 = vpop.permute.xlu2 %2195 }
 0x2f2   : > { %v2146_v46 = vpop.permute.xlu1 %2145  ;;  %v2141_v49 = vpop.permute.xlu0 %2140  ;;  %v2493_v24 = vmul.f32 %v3346_v30, %v2196_v7 }
 0x2f3   : > { %v2482_v52 = vmul.f32 %v3325_v22, %v2141_v49  ;;  %v2483_v39 = vmul.f32 %v3326_v25, %v2146_v46  ;;  %v3354_v25 = vunpack.c.h.bf16 %v3490_v3  ;;  %v3357_v49 = vunpack.c.l.bf16 %v3491_v37 }
 0x2f5   : > { %v2737_v28 = vadd.f32 %v2736_v40, %v2482_v52 }
 0x2f7   : > { %v2738_v42 = vadd.f32 %v2737_v28, %v2483_v39  ;;  %v3492_v28 = vld [vmem:[%s3735_s11 + $0x3f0] sm:$0xff]  }
 0x2f9   : > { %v2739_v2 = vadd.f32 %v2738_v42, %v2484_v62  ;;  %v2211_v61 = vpop.permute.xlu2 %2210  ;;  %v3358_v42 = vunpack.c.h.bf16 %v3491_v37 }
 0x2fa   : > { %v2161_v31 = vpop.permute.xlu1 %2160  ;;  %v2156_v47 = vpop.permute.xlu0 %2155  ;;  %v2496_v46 = vmul.f32 %v3353_v43, %v2211_v61 }
 0x2fb   : > { %v2485_v0 = vmul.f32 %v3330_v58, %v2156_v47  ;;  %v2486_v33 = vmul.f32 %v3333_v48, %v2161_v31  ;;  %v3361_v48 = vunpack.c.l.bf16 %v3492_v28  ;;  %v3362_v47 = vunpack.c.h.bf16 %v3492_v28 }
 0x2fd   : > { %v2740_v60 = vadd.f32 %v2739_v2, %v2485_v0  ;;  %v3493_v0 = vld [vmem:[%s3735_s11 + $0x3f8] sm:$0xff]  }
 0x2ff   : > { %v2741_v57 = vadd.f32 %v2740_v60, %v2486_v33  ;;  %v3365_v33 = vunpack.c.l.bf16 %v3493_v0 }
 0x301   : > { %v2742_v14 = vadd.f32 %v2741_v57, %v2487_v50  ;;  %v2226_v39 = vpop.permute.xlu2 %2225 }
 0x302   : > { %v2176_v53 = vpop.permute.xlu1 %2175  ;;  %v2171_v13 = vpop.permute.xlu0 %2170  ;;  %v2499_v31 = vmul.f32 %v3358_v42, %v2226_v39 }
 0x303   : > { %v2488_v56 = vmul.f32 %v3337_v35, %v2171_v13  ;;  %v2489_v19 = vmul.f32 %v3338_v10, %v2176_v53  ;;  %v3366_v10 = vunpack.c.h.bf16 %v3493_v0 }
 0x305   : > { %v2743_v51 = vadd.f32 %v2742_v14, %v2488_v56 }
 0x307   : > { %v2744_v6 = vadd.f32 %v2743_v51, %v2489_v19 }
 0x309   : > { %v2745_v1 = vadd.f32 %v2744_v6, %v2490_v11  ;;  %v2241_v35 = vpop.permute.xlu2 %2240 }
 0x30a   : > { %v2191_v63 = vpop.permute.xlu1 %2190  ;;  %v2186_v12 = vpop.permute.xlu0 %2185  ;;  %v2502_v38 = vmul.f32 %v3365_v33, %v2241_v35 }
 0x30b   : > { %v2491_v27 = vmul.f32 %v3342_v21, %v2186_v12  ;;  %v2492_v18 = vmul.f32 %v3345_v9, %v2191_v63 }
 0x30d   : > { %v2746_v32 = vadd.f32 %v2745_v1, %v2491_v27 }
 0x30f   : > { %v2747_v20 = vadd.f32 %v2746_v32, %v2492_v18 }
 0x311   : > { %v2748_v16 = vadd.f32 %v2747_v20, %v2493_v24 }
 0x312   : > { %v2206_v29 = vpop.permute.xlu1 %2205  ;;  %v2201_v26 = vpop.permute.xlu0 %2200 }
 0x313   : > { %v2494_v5 = vmul.f32 %v3349_v34, %v2201_v26  ;;  %v2495_v8 = vmul.f32 %v3350_v23, %v2206_v29 }
 0x315   : > { %v2749_v22 = vadd.f32 %v2748_v16, %v2494_v5 }
 0x317   : > { %v2750_v44 = vadd.f32 %v2749_v22, %v2495_v8 }
 0x319   : > { %v2751_v41 = vadd.f32 %v2750_v44, %v2496_v46 }
 0x31a   : > { %v2221_v36 = vpop.permute.xlu1 %2220  ;;  %v2216_v52 = vpop.permute.xlu0 %2215 }
 0x31b   : > { %v2497_v40 = vmul.f32 %v3354_v25, %v2216_v52  ;;  %v2498_v58 = vmul.f32 %v3357_v49, %v2221_v36 }
 0x31d   : > { %v2752_v45 = vadd.f32 %v2751_v41, %v2497_v40 }
 0x31f   : > { %v2753_v62 = vadd.f32 %v2752_v45, %v2498_v58 }
 0x321   : > { %v2754_v4 = vadd.f32 %v2753_v62, %v2499_v31 }
 0x322   : > { %v2236_v2 = vpop.permute.xlu1 %2235  ;;  %v2231_v55 = vpop.permute.xlu0 %2230 }
 0x323   : > { %v2500_v54 = vmul.f32 %v3361_v48, %v2231_v55  ;;  %v2501_v60 = vmul.f32 %v3362_v47, %v2236_v2 }
 0x325   : > { %v2755_v57 = vadd.f32 %v2754_v4, %v2500_v54 }
 0x327   : > { %v2756_v50 = vadd.f32 %v2755_v57, %v2501_v60 }
 0x329   : > { %v2757_v56 = vadd.f32 %v2756_v50, %v2502_v38 }
 0x32a   : > { %v2246_v53 = vpop.permute.xlu0 %2245  ;;  %v2769_v6 = vpop.permute.xlu1 %2768 }
 0x32b   : > { %v2503_v13 = vmul.f32 %v3366_v10, %v2246_v53  ;;  %v2771_v59 = vperm.slane %v2769_v6, 0 }
 0x32d   : > { %v2758_v14 = vadd.f32 %v2757_v56, %v2503_v13 }
 0x32f   : > { %v2759_v17 = vrot.slane %v2758_v14, 4 }
 0x331   : > { %v2760_v19 = vadd.f32 %v2759_v17, %v2758_v14 }
 0x333   : > { %v2761_v51 = vrot.slane %v2760_v19, 2 }
 0x335   : > { %v2762_v7 = vadd.f32 %v2761_v51, %v2760_v19 }
 0x337   : > { %v2763_v21 = vrot.slane %v2762_v7, 1 }
 0x339   : > { %v2764_v11 = vadd.f32 %v2763_v21, %v2762_v7 }
 0x33b   : > { %v2772_v9 = vadd.f32 %v2771_v59, %v2764_v11 }
 0x33d   : > { %2773 = vst [vmem:[%s199_s24] sm:$0x1] %v2772_v9 }
 0x33e PF: > { %s15_s16 = sadd.s32 1, %s3544_s16   ;;  %s4723_s14 = smov %s3540_s15 }
 0x33f   : > { %p12_p5 = scmp.ge.s32.totalorder %s15_s16, 4   ;;  %s4724_s15 = smov %s4726_s2 }
 0x341   :  { %14 = sbr.rel (!%p12_p5) target bundleno = 3 (0x3), region = 62 }

</bundles_post_ra>
